<compile_context>
chip_gen: v7x
topology: tpu7x:2x2x1
jax: 0.10.0
libtpu: 0.0.40
codegen_flags: <defaults>
</compile_context>

<pallas_src>
import jax
import jax.numpy as jnp
import numpy as np
from jax.experimental import pallas as pl
from jax.experimental.pallas import tpu as pltpu

# ----- module "hyper parameters" (args) — deterministic, in-script ------------------
SEQUENCE_WEIGHT = 0.8              # args.sequence_weight
SELFSUP_DISTANCE = "charbonnier"   # only the charbonnier branch of the module is ported
CROP = 64                          # hard-coded in selfsup_transform_flow
_DEN_EPS = 1e-6


def _charbonnier(x, y, eps=0.01, q=0.4):
    """charbonnier(x, y) = (sqrt((x-y)^2 + 1e-3^2) + eps)^q  (DDFlow robust loss)."""
    r = jnp.sqrt((x - y) ** 2 + 0.001 ** 2)
    return (r + eps) ** q


def _bilinear_matrix(out_size, in_size):
    """Interpolation matrix (out_size, in_size) for F.interpolate(bilinear, align_corners=True)."""
    if in_size == 1:
        return jnp.ones((out_size, 1), jnp.float32)
    src = jnp.arange(out_size, dtype=jnp.float32) * (in_size - 1) / (out_size - 1)
    j0 = jnp.clip(jnp.floor(src).astype(jnp.int32), 0, in_size - 2)
    frac = src - j0.astype(jnp.float32)
    rows = jnp.arange(out_size)
    m = jnp.zeros((out_size, in_size), jnp.float32)
    m = m.at[rows, j0].add(1.0 - frac)
    m = m.at[rows, j0 + 1].add(frac)
    return m


# ------------------------------ tiling heuristics ------------------------------------
def _pad_bytes(r, c, itemsize=4):
    """Bytes of one (r, c) slab after TPU tile padding (sublane tile depends on dtype width)."""
    sub = {4: 8, 2: 16, 1: 32}.get(itemsize, 8)
    return (-(-r // sub) * sub) * (-(-c // 128) * 128) * itemsize


def _vmem_capacity_bytes():
    try:
        return int(pltpu.get_tpu_info().vmem_capacity_bytes)
    except Exception:
        return 64 * 1024 * 1024            # conservative fallback (v7x per-core VMEM)


def _choose_tiling(g, iters, h, w, hd, wd, stud_isz, tc_isz, mask_isz,
                   budget_bytes, gb_cap=16, min_steps=8):
    """Jointly pick (GB, HC).

    GB = groups per grid step: as large as the VMEM budget allows, capped so that
    NB = G // GB >= 2 (keeps the "parallel" group axis shardable across both
    TensorCores on v7x).  HC = number of H row-chunks for the stud/mask streams
    (the upsampled teacher is cached full-H in VMEM, so HC only affects them)."""
    hc_counts = [c for c in range(1, h + 1) if h % c == 0 and (h // c) % 8 == 0]
    if not hc_counts:
        hc_counts = [1]                    # full-H block (equal-to-dim is always legal)

    def working_set(gb, hc):
        dbl = 2 * (gb * 2 * _pad_bytes(hd, wd, tc_isz)             # teacher crop
                   + _pad_bytes(h, hd)                             # row interp matrix
                   + 2 * _pad_bytes(wd, w)                         # column interp matrices
                   + gb * iters * 2 * _pad_bytes(hc, w, stud_isz)  # student chunk
                   + gb * _pad_bytes(hc, w, mask_isz)              # mask chunk
                   + _pad_bytes(gb, 1))                            # output
        scratch = (gb * 2 * _pad_bytes(h, w)      # cached upsampled teacher (full H)
                   + gb * _pad_bytes(hc, w)       # per-chunk distance accumulator
                   + gb * _pad_bytes(2, w))       # numerator / denominator rows
        return dbl + scratch

    for gb in sorted((d for d in range(1, g + 1) if g % d == 0), reverse=True):
        if gb > gb_cap:
            continue
        nb = g // gb
        if g >= 2 and nb < 2:              # keep >= 2 blocks on the parallel axis
            continue
        fitting = [c for c in hc_counts if working_set(gb, h // c) <= budget_bytes]
        if not fitting:
            continue
        good = [c for c in fitting if nb * c >= min_steps and h // c >= 32]
        if good:
            return gb, good[0]             # largest Hc with enough steps to pipeline
        good = [c for c in fitting if h // c >= 32]
        if good:
            return gb, good[-1]
        return gb, fitting[-1]
    return 1, hc_counts[-1]


# ------------------------------ Pallas kernel ----------------------------------------
def _make_kernel(gb, hcount, iters, seq_weights):
    """seq_weights: static per-iteration weights = weights * sequence_weight ** it."""

    def kernel(tc_ref, wh_ref, wwt_ref, stud_ref, mask_ref, out_ref,
               up_ref, acc_ref, part_ref):
        # tc_ref   : (GB, 2, Hd, Wd)         cropped teacher flow (fetched once per group block)
        # wh_ref   : (H, Hd)                 row interpolation matrix (full H)
        # wwt_ref  : (2, Wd, W)              column interp matrices, per-channel scale folded in
        # stud_ref : (GB, ITERS, 2, Hc, W)   student flows, this H-chunk (native dtype)
        # mask_ref : (GB, 1, Hc, W)          eraser mask, this H-chunk (native dtype)
        # out_ref  : (1, GB, 1)              per-group (seq-weighted, normalized) loss
        # up_ref   : (HC, GB, 2, Hc, W) f32  cached upsampled teacher (ALL chunks, written at h==0)
        # part_ref : (GB, 2, W) f32          [.,0,.]=numerator rows, [.,1,.]=mask rows
        #
        # NOTE: the accumulator / upsample-cache pattern (init+compute at h==0,
        # finalize at the last h) requires the H axis to stay the LAST grid axis and
        # to be marked "arbitrary" — do not reorder or mark it "parallel".
        h = pl.program_id(1)
        hd = tc_ref.shape[2]
        hc = acc_ref.shape[1]
        w = acc_ref.shape[2]

        @pl.when(h == 0)
        def _init():
            part_ref[...] = jnp.zeros_like(part_ref)
            # Separable bilinear upsample (align_corners=True) on the MXU, cached for
            # every H-chunk of this group block.  The column pass is batched across
            # groups (one matmul per channel, M = GB*Hd); the per-channel W/Wd, H/Hd
            # flow rescale is already folded into wwt_ref.
            wh = wh_ref[...]                                           # (H, Hd)
            for c in range(2):
                tc_c = tc_ref[:, c].astype(jnp.float32)                # (GB, Hd, Wd)
                col = jnp.dot(tc_c.reshape(gb * hd, tc_c.shape[2]), wwt_ref[c],
                              preferred_element_type=jnp.float32)      # (GB*Hd, W)
                col = col.reshape(gb, hd, w)
                for g in range(gb):
                    up_ref[:, g, c] = jnp.dot(
                        wh, col[g], preferred_element_type=jnp.float32
                    ).reshape(hcount, hc, w)

        # Sequence-weighted charbonnier distance over all iterations, on whole
        # (GB, 2, Hc, W) channel slabs; accumulated in VMEM so the eraser-mask
        # multiply, cast and row reduction happen once per chunk (not per iter).
        for it in range(iters):
            d = _charbonnier(up_ref[h], stud_ref[:, it].astype(jnp.float32))  # (GB,2,Hc,W)
            contrib = (d[:, 0] + d[:, 1]) * seq_weights[it]                    # (GB,Hc,W)
            if it == 0:
                acc_ref[...] = contrib
            else:
                acc_ref[...] += contrib

        m = mask_ref[:, 0].astype(jnp.float32)                                 # (GB,Hc,W)
        part_ref[:, 0:1, :] += jnp.sum(acc_ref[...] * m, axis=1, keepdims=True)
        part_ref[:, 1:2, :] += jnp.sum(m, axis=1, keepdims=True)

        # Final lane (W) reduction + normalization: one scalar per group, stored once.
        @pl.when(h == pl.num_programs(1) - 1)
        def _finalize():
            sums = jnp.sum(part_ref[...], axis=-1)                             # (GB, 2)
            out_ref[0] = sums[:, 0:1] / (sums[:, 1:2] + _DEN_EPS)

    return kernel


# ------------------------------ wrapper ----------------------------------------------
def selfsup_loss_pallas(flows_stud, flows_teacher, masks_eraser,
                        sequence_weight=SEQUENCE_WEIGHT, weights=1.0):
    if not isinstance(weights, (int, float, np.integer, np.floating)):
        raise NotImplementedError(
            "selfsup_loss_pallas: only a scalar `weights` is supported "
            "(the PyTorch module default); got %r" % type(weights))

    B, N, ITERS, C, H, W = flows_stud.shape
    assert C == 2
    assert H > 2 * CROP and W > 2 * CROP, "selfsup_transform_flow crops 64 px per side"
    G = B * N

    # selfsup_transform_flow: crop 64 px on each side (tiny static slice, XLA glue).
    tc = flows_teacher[..., CROP:-CROP, CROP:-CROP]            # (B, N, 2, Hd, Wd)
    Hd, Wd = tc.shape[-2], tc.shape[-1]
    tc = tc.reshape(G, 2, Hd, Wd)
    stud = flows_stud.reshape(G, ITERS, 2, H, W)               # native dtype, cast in-kernel
    mask = masks_eraser.reshape(G, 1, H, W)
    if mask.dtype == jnp.bool_:
        mask = mask.astype(jnp.uint8)                          # 1 B/elem HBM, f32 cast in-kernel

    wh = _bilinear_matrix(H, Hd)                               # (H, Hd)
    wwt = _bilinear_matrix(W, Wd).T                            # (Wd, W)
    # Fold per-channel flow rescaling (u: W/Wd, v: H/Hd) into the column matrices.
    wwt_s = jnp.stack([wwt * (float(W) / float(Wd)),
                       wwt * (float(H) / float(Hd))], axis=0)  # (2, Wd, W)

    vmem_cap = _vmem_capacity_bytes()                          # 128 MiB v5e/v6e, 64 MiB v7x
    budget = vmem_cap * 3 // 8                                 # ~48 MiB / ~24 MiB
    vmem_limit = min(vmem_cap * 3 // 4, 100 * 1024 * 1024)

    GB, HC = _choose_tiling(G, ITERS, H, W, Hd, Wd,
                            stud.dtype.itemsize, tc.dtype.itemsize, mask.dtype.itemsize,
                            budget)
    NB = G // GB                                               # group blocks (grid axis 0)
    Hc = H // HC                                               # rows per H-chunk (axis 1)

    seq_w = tuple(float(weights) * float(sequence_weight) ** i for i in range(ITERS))
    kernel = _make_kernel(GB, HC, ITERS, seq_w)

    out = pl.pallas_call(
        kernel,
        out_shape=jax.ShapeDtypeStruct((NB, GB, 1), jnp.float32),
        grid=(NB, HC),
        in_specs=[
            pl.BlockSpec((GB, 2, Hd, Wd), lambda g, h: (g, 0, 0, 0)),
            pl.BlockSpec((H, Hd), lambda g, h: (0, 0)),
            pl.BlockSpec((2, Wd, W), lambda g, h: (0, 0, 0)),
            pl.BlockSpec((GB, ITERS, 2, Hc, W), lambda g, h: (g, 0, 0, h, 0)),
            pl.BlockSpec((GB, 1, Hc, W), lambda g, h: (g, 0, h, 0)),
        ],
        out_specs=pl.BlockSpec((1, GB, 1), lambda g, h: (g, 0, 0)),
        scratch_shapes=[
            pltpu.VMEM((HC, GB, 2, Hc, W), jnp.float32),       # cached upsampled teacher
            pltpu.VMEM((GB, Hc, W), jnp.float32),              # per-chunk distance accumulator
            pltpu.VMEM((GB, 2, W), jnp.float32),               # numerator / denominator rows
        ],
        compiler_params=pltpu.CompilerParams(
            dimension_semantics=("parallel", "arbitrary"),     # H axis MUST stay "arbitrary"
            vmem_limit_bytes=int(vmem_limit),
        ),
    )(tc, wh, wwt_s, stud, mask)

    # tiny glue: per-group losses are already seq-weighted and normalized.
    return out.reshape(G).mean()


# ------------------------------ plain-JAX reference ----------------------------------
def selfsup_loss_reference(flows_stud, flows_teacher, masks_eraser,
                           sequence_weight=SEQUENCE_WEIGHT, weights=1.0):
    B, N, ITERS, C, H, W = flows_stud.shape
    x = flows_teacher.reshape(-1, C, H, W)
    xc = x[..., CROP:-CROP, CROP:-CROP]
    Hd, Wd = xc.shape[-2:]
    wh = _bilinear_matrix(H, Hd)
    ww = _bilinear_matrix(W, Wd)
    up = jnp.einsum("hk,gckl,wl->gchw", wh, xc.astype(jnp.float32), ww)
    up = up.at[:, 0].multiply(W / Wd)
    up = up.at[:, 1].multiply(H / Hd)
    ft = up.reshape(B, N, 1, C, H, W)
    m = masks_eraser[:, :, None].astype(jnp.float32)   # (B, N, 1, 1, H, W)
    d = _charbonnier(ft, flows_stud.astype(jnp.float32))
    num = (d * m * weights).sum((-1, -2, -3))          # (B, N, ITERS)
    den = m.sum((-1, -2, -3)) + _DEN_EPS               # (B, N, 1)
    loss = num / den
    seq_w = (sequence_weight ** jnp.arange(ITERS, dtype=jnp.float32)).reshape(1, 1, ITERS)
    return (loss * seq_w).sum(-1).mean()


if __name__ == "__main__":
    # small shapes consistent with the module (H, W must exceed 128 because of the
    # hard-coded 64-pixel crop in selfsup_transform_flow)
    B, N, ITERS, H, W = 1, 2, 3, 160, 160
    key = jax.random.PRNGKey(0)
    k1, k2, k3 = jax.random.split(key, 3)
    flows_stud = jax.random.normal(k1, (B, N, ITERS, 2, H, W), jnp.float32)
    flows_teacher = jax.random.normal(k2, (B, N, 2, H, W), jnp.float32)
    masks_eraser = (jax.random.uniform(k3, (B, N, 1, H, W)) > 0.3).astype(jnp.float32)

    loss_fn = jax.jit(selfsup_loss_pallas)
    loss = jax.block_until_ready(loss_fn(flows_stud, flows_teacher, masks_eraser))

    ref = jax.block_until_ready(
        selfsup_loss_reference(flows_stud, flows_teacher, masks_eraser))

    assert jnp.allclose(loss, ref, rtol=1e-4, atol=1e-5), (loss, ref)
    print("KERNEL_OK")
</pallas_src>

<mosaic_0001>
module attributes {stable_mosaic.version = 11 : i64} {
  func.func private @main(%arg0: i32) attributes {dimension_semantics = [#tpu.dimension_semantics<core_parallel>], iteration_bounds = array<i64: 2>, tpu.core_type = #tpu.core_type<sc_scalar_subcore>, window_params = []} {
    return
  }
}

module attributes {stable_mosaic.version = 11 : i64} {
  func.func private @main(%arg0: i32) attributes {dimension_semantics = [#tpu.dimension_semantics<core_parallel>], iteration_bounds = array<i64: 2>, tpu.core_type = #tpu.core_type<sc_scalar_subcore>, window_params = []} {
    return
  }
}

module attributes {stable_mosaic.version = 11 : i64} {
  func.func @kernel(%arg0: i32, %arg1: i32, %arg2: memref<1x2x32x32xf32, #tpu.memory_space<vmem>>, %arg3: memref<160x32xf32, #tpu.memory_space<vmem>>, %arg4: memref<2x32x160xf32, #tpu.memory_space<vmem>>, %arg5: memref<1x3x2x40x160xf32, #tpu.memory_space<vmem>>, %arg6: memref<1x1x40x160xf32, #tpu.memory_space<vmem>>, %arg7: memref<1x1x1xf32, #tpu.memory_space<vmem>>, %arg8: memref<4x1x2x40x160xf32, #tpu.memory_space<vmem>>, %arg9: memref<1x40x160xf32, #tpu.memory_space<vmem>>, %arg10: memref<1x2x160xf32, #tpu.memory_space<vmem>>) attributes {dimension_semantics = [#tpu.dimension_semantics<parallel>, #tpu.dimension_semantics<arbitrary>], iteration_bounds = array<i64: 2, 4>, scalar_prefetch = 0 : i64, scratch_operands = 3 : i64, tpu.core_type = #tpu.core_type<tc>, window_params = [{transform_indices = @transform_0, window_bounds = array<i64: 1, 2, 32, 32>}, {pipeline_mode = #tpu.pipeline_mode<synchronous>, transform_indices = @transform_1, window_bounds = array<i64: 160, 32>}, {pipeline_mode = #tpu.pipeline_mode<synchronous>, transform_indices = @transform_2, window_bounds = array<i64: 2, 32, 160>}, {transform_indices = @transform_3, window_bounds = array<i64: 1, 3, 2, 40, 160>}, {transform_indices = @transform_4, window_bounds = array<i64: 1, 1, 40, 160>}, {transform_indices = @transform_5, window_bounds = array<i64: 1, 1, 1>}]} {
    %c0_i32 = arith.constant 0 : i32
    %0 = arith.cmpi eq, %arg1, %c0_i32 : i32
    %1 = arith.extui %0 : i1 to i32
    %c0_i32_0 = arith.constant 0 : i32
    %2 = arith.cmpi ne, %1, %c0_i32_0 : i32
    scf.if %2 {
      %cst_73 = arith.constant 0.000000e+00 : f32
      %90 = vector.broadcast %cst_73 : f32 to vector<1x2x160xf32>
      %c0_74 = arith.constant 0 : index
      %c0_75 = arith.constant 0 : index
      %c0_76 = arith.constant 0 : index
      %91 = vector.load %arg10[%c0_74, %c0_75, %c0_76] : memref<1x2x160xf32, #tpu.memory_space<vmem>>, vector<1x2x160xf32>
      tpu.vector_store %arg10[%c0_74, %c0_75, %c0_76], %90 {strides = array<i32>} : memref<1x2x160xf32, #tpu.memory_space<vmem>>, vector<1x2x160xf32>,
      %c0_77 = arith.constant 0 : index
      %c0_78 = arith.constant 0 : index
      %92 = vector.load %arg3[%c0_77, %c0_78] : memref<160x32xf32, #tpu.memory_space<vmem>>, vector<160x32xf32>
      %c0_79 = arith.constant 0 : index
      %c0_80 = arith.constant 0 : index
      %c0_81 = arith.constant 0 : index
      %c0_82 = arith.constant 0 : index
      %93 = vector.load %arg2[%c0_79, %c0_80, %c0_81, %c0_82] : memref<1x2x32x32xf32, #tpu.memory_space<vmem>>, vector<1x1x32x32xf32>
      %94 = vector.shape_cast %93 : vector<1x1x32x32xf32> to vector<1x32x32xf32>
      %95 = vector.shape_cast %94 : vector<1x32x32xf32> to vector<32x32xf32>
      %c0_83 = arith.constant 0 : index
      %c0_84 = arith.constant 0 : index
      %c0_85 = arith.constant 0 : index
      %96 = vector.load %arg4[%c0_83, %c0_84, %c0_85] : memref<2x32x160xf32, #tpu.memory_space<vmem>>, vector<1x32x160xf32>
      %97 = vector.shape_cast %96 : vector<1x32x160xf32> to vector<32x160xf32>
      %cst_86 = arith.constant dense<0.000000e+00> : vector<32x160xf32>
      %98 = tpu.matmul %95, %97, %cst_86 {dimension_numbers = #tpu.dot_dimension_numbers<[1], [0], [0], [1], [0, 0, 1, 1], [], []>} : vector<32x32xf32>, vector<32x160xf32>, vector<32x160xf32> -> vector<32x160xf32>
      %99 = vector.shape_cast %98 : vector<32x160xf32> to vector<1x32x160xf32>
      %100 = vector.shape_cast %99 : vector<1x32x160xf32> to vector<32x160xf32>
      %cst_87 = arith.constant dense<0.000000e+00> : vector<160x160xf32>
      %101 = tpu.matmul %92, %100, %cst_87 {dimension_numbers = #tpu.dot_dimension_numbers<[1], [0], [0], [1], [0, 0, 1, 1], [], []>} : vector<160x32xf32>, vector<32x160xf32>, vector<160x160xf32> -> vector<160x160xf32>
      %102 = vector.shape_cast %101 : vector<160x160xf32> to vector<4x40x160xf32>
      %c0_88 = arith.constant 0 : index
      %c0_89 = arith.constant 0 : index
      %c0_90 = arith.constant 0 : index
      %c0_91 = arith.constant 0 : index
      %c0_92 = arith.constant 0 : index
      %103 = vector.load %arg8[%c0_88, %c0_89, %c0_90, %c0_91, %c0_92] : memref<4x1x2x40x160xf32, #tpu.memory_space<vmem>>, vector<4x1x1x40x160xf32>
      %104 = vector.shape_cast %103 : vector<4x1x1x40x160xf32> to vector<4x40x160xf32>
      %105 = vector.shape_cast %102 : vector<4x40x160xf32> to vector<4x1x1x40x160xf32>
      tpu.vector_store %arg8[%c0_88, %c0_89, %c0_90, %c0_91, %c0_92], %105 {strides = array<i32>} : memref<4x1x2x40x160xf32, #tpu.memory_space<vmem>>, vector<4x1x1x40x160xf32>,
      %c0_93 = arith.constant 0 : index
      %c1_94 = arith.constant 1 : index
      %c0_95 = arith.constant 0 : index
      %c0_96 = arith.constant 0 : index
      %106 = vector.load %arg2[%c0_93, %c1_94, %c0_95, %c0_96] : memref<1x2x32x32xf32, #tpu.memory_space<vmem>>, vector<1x1x32x32xf32>
      %107 = vector.shape_cast %106 : vector<1x1x32x32xf32> to vector<1x32x32xf32>
      %108 = vector.shape_cast %107 : vector<1x32x32xf32> to vector<32x32xf32>
      %c1_97 = arith.constant 1 : index
      %c0_98 = arith.constant 0 : index
      %c0_99 = arith.constant 0 : index
      %109 = vector.load %arg4[%c1_97, %c0_98, %c0_99] : memref<2x32x160xf32, #tpu.memory_space<vmem>>, vector<1x32x160xf32>
      %110 = vector.shape_cast %109 : vector<1x32x160xf32> to vector<32x160xf32>
      %cst_100 = arith.constant dense<0.000000e+00> : vector<32x160xf32>
      %111 = tpu.matmul %108, %110, %cst_100 {dimension_numbers = #tpu.dot_dimension_numbers<[1], [0], [0], [1], [0, 0, 1, 1], [], []>} : vector<32x32xf32>, vector<32x160xf32>, vector<32x160xf32> -> vector<32x160xf32>
      %112 = vector.shape_cast %111 : vector<32x160xf32> to vector<1x32x160xf32>
      %113 = vector.shape_cast %112 : vector<1x32x160xf32> to vector<32x160xf32>
      %cst_101 = arith.constant dense<0.000000e+00> : vector<160x160xf32>
      %114 = tpu.matmul %92, %113, %cst_101 {dimension_numbers = #tpu.dot_dimension_numbers<[1], [0], [0], [1], [0, 0, 1, 1], [], []>} : vector<160x32xf32>, vector<32x160xf32>, vector<160x160xf32> -> vector<160x160xf32>
      %115 = vector.shape_cast %114 : vector<160x160xf32> to vector<4x40x160xf32>
      %c0_102 = arith.constant 0 : index
      %c0_103 = arith.constant 0 : index
      %c1_104 = arith.constant 1 : index
      %c0_105 = arith.constant 0 : index
      %c0_106 = arith.constant 0 : index
      %116 = vector.load %arg8[%c0_102, %c0_103, %c1_104, %c0_105, %c0_106] : memref<4x1x2x40x160xf32, #tpu.memory_space<vmem>>, vector<4x1x1x40x160xf32>
      %117 = vector.shape_cast %116 : vector<4x1x1x40x160xf32> to vector<4x40x160xf32>
      %118 = vector.shape_cast %115 : vector<4x40x160xf32> to vector<4x1x1x40x160xf32>
      tpu.vector_store %arg8[%c0_102, %c0_103, %c1_104, %c0_105, %c0_106], %118 {strides = array<i32>} : memref<4x1x2x40x160xf32, #tpu.memory_space<vmem>>, vector<4x1x1x40x160xf32>,
    } else {
    }
    %3 = arith.index_cast %arg1 : i32 to index
    %c0 = arith.constant 0 : index
    %c0_1 = arith.constant 0 : index
    %c0_2 = arith.constant 0 : index
    %c0_3 = arith.constant 0 : index
    %4 = vector.load %arg8[%3, %c0, %c0_1, %c0_2, %c0_3] : memref<4x1x2x40x160xf32, #tpu.memory_space<vmem>>, vector<1x1x2x40x160xf32>
    %5 = vector.shape_cast %4 : vector<1x1x2x40x160xf32> to vector<1x2x40x160xf32>
    %c0_4 = arith.constant 0 : index
    %c0_5 = arith.constant 0 : index
    %c0_6 = arith.constant 0 : index
    %c0_7 = arith.constant 0 : index
    %c0_8 = arith.constant 0 : index
    %6 = vector.load %arg5[%c0_4, %c0_5, %c0_6, %c0_7, %c0_8] : memref<1x3x2x40x160xf32, #tpu.memory_space<vmem>>, vector<1x1x2x40x160xf32>
    %7 = vector.shape_cast %6 : vector<1x1x2x40x160xf32> to vector<1x2x40x160xf32>
    %8 = arith.subf %5, %7 : vector<1x2x40x160xf32>
    %9 = arith.mulf %8, %8 : vector<1x2x40x160xf32>
    %cst = arith.constant 9.99999997E-7 : f32
    %10 = vector.broadcast %cst : f32 to vector<1x2x40x160xf32>
    %11 = arith.addf %9, %10 : vector<1x2x40x160xf32>
    %12 = math.sqrt %11 : vector<1x2x40x160xf32>
    %cst_9 = arith.constant 0.00999999977 : f32
    %13 = vector.broadcast %cst_9 : f32 to vector<1x2x40x160xf32>
    %14 = arith.addf %12, %13 : vector<1x2x40x160xf32>
    %cst_10 = arith.constant 4.000000e-01 : f32
    %15 = vector.broadcast %cst_10 : f32 to vector<1x2x40x160xf32>
    %16 = math.powf %14, %15 : vector<1x2x40x160xf32>
    %17 = vector.extract_strided_slice %16 {offsets = [0, 0, 0, 0], sizes = [1, 1, 40, 160], strides = [1, 1, 1, 1]} : vector<1x2x40x160xf32> to vector<1x1x40x160xf32>
    %18 = vector.shape_cast %17 : vector<1x1x40x160xf32> to vector<1x40x160xf32>
    %19 = vector.extract_strided_slice %16 {offsets = [0, 1, 0, 0], sizes = [1, 1, 40, 160], strides = [1, 1, 1, 1]} : vector<1x2x40x160xf32> to vector<1x1x40x160xf32>
    %20 = vector.shape_cast %19 : vector<1x1x40x160xf32> to vector<1x40x160xf32>
    %21 = arith.addf %18, %20 : vector<1x40x160xf32>
    %cst_11 = arith.constant 1.000000e+00 : f32
    %22 = vector.broadcast %cst_11 : f32 to vector<1x40x160xf32>
    %23 = arith.mulf %21, %22 : vector<1x40x160xf32>
    %c0_12 = arith.constant 0 : index
    %c0_13 = arith.constant 0 : index
    %c0_14 = arith.constant 0 : index
    %24 = vector.load %arg9[%c0_12, %c0_13, %c0_14] : memref<1x40x160xf32, #tpu.memory_space<vmem>>, vector<1x40x160xf32>
    tpu.vector_store %arg9[%c0_12, %c0_13, %c0_14], %23 {strides = array<i32>} : memref<1x40x160xf32, #tpu.memory_space<vmem>>, vector<1x40x160xf32>,
    %25 = arith.index_cast %arg1 : i32 to index
    %c0_15 = arith.constant 0 : index
    %c0_16 = arith.constant 0 : index
    %c0_17 = arith.constant 0 : index
    %c0_18 = arith.constant 0 : index
    %26 = vector.load %arg8[%25, %c0_15, %c0_16, %c0_17, %c0_18] : memref<4x1x2x40x160xf32, #tpu.memory_space<vmem>>, vector<1x1x2x40x160xf32>
    %27 = vector.shape_cast %26 : vector<1x1x2x40x160xf32> to vector<1x2x40x160xf32>
    %c0_19 = arith.constant 0 : index
    %c1 = arith.constant 1 : index
    %c0_20 = arith.constant 0 : index
    %c0_21 = arith.constant 0 : index
    %c0_22 = arith.constant 0 : index
    %28 = vector.load %arg5[%c0_19, %c1, %c0_20, %c0_21, %c0_22] : memref<1x3x2x40x160xf32, #tpu.memory_space<vmem>>, vector<1x1x2x40x160xf32>
    %29 = vector.shape_cast %28 : vector<1x1x2x40x160xf32> to vector<1x2x40x160xf32>
    %30 = arith.subf %27, %29 : vector<1x2x40x160xf32>
    %31 = arith.mulf %30, %30 : vector<1x2x40x160xf32>
    %cst_23 = arith.constant 9.99999997E-7 : f32
    %32 = vector.broadcast %cst_23 : f32 to vector<1x2x40x160xf32>
    %33 = arith.addf %31, %32 : vector<1x2x40x160xf32>
    %34 = math.sqrt %33 : vector<1x2x40x160xf32>
    %cst_24 = arith.constant 0.00999999977 : f32
    %35 = vector.broadcast %cst_24 : f32 to vector<1x2x40x160xf32>
    %36 = arith.addf %34, %35 : vector<1x2x40x160xf32>
    %cst_25 = arith.constant 4.000000e-01 : f32
    %37 = vector.broadcast %cst_25 : f32 to vector<1x2x40x160xf32>
    %38 = math.powf %36, %37 : vector<1x2x40x160xf32>
    %39 = vector.extract_strided_slice %38 {offsets = [0, 0, 0, 0], sizes = [1, 1, 40, 160], strides = [1, 1, 1, 1]} : vector<1x2x40x160xf32> to vector<1x1x40x160xf32>
    %40 = vector.shape_cast %39 : vector<1x1x40x160xf32> to vector<1x40x160xf32>
    %41 = vector.extract_strided_slice %38 {offsets = [0, 1, 0, 0], sizes = [1, 1, 40, 160], strides = [1, 1, 1, 1]} : vector<1x2x40x160xf32> to vector<1x1x40x160xf32>
    %42 = vector.shape_cast %41 : vector<1x1x40x160xf32> to vector<1x40x160xf32>
    %43 = arith.addf %40, %42 : vector<1x40x160xf32>
    %cst_26 = arith.constant 8.000000e-01 : f32
    %44 = vector.broadcast %cst_26 : f32 to vector<1x40x160xf32>
    %45 = arith.mulf %43, %44 : vector<1x40x160xf32>
    %c0_27 = arith.constant 0 : index
    %c0_28 = arith.constant 0 : index
    %c0_29 = arith.constant 0 : index
    %46 = vector.load %arg9[%c0_27, %c0_28, %c0_29] : memref<1x40x160xf32, #tpu.memory_space<vmem>>, vector<1x40x160xf32>
    %47 = arith.addf %46, %45 : vector<1x40x160xf32>
    %c0_30 = arith.constant 0 : index
    %c0_31 = arith.constant 0 : index
    %c0_32 = arith.constant 0 : index
    %48 = vector.load %arg9[%c0_30, %c0_31, %c0_32] : memref<1x40x160xf32, #tpu.memory_space<vmem>>, vector<1x40x160xf32>
    tpu.vector_store %arg9[%c0_30, %c0_31, %c0_32], %47 {strides = array<i32>} : memref<1x40x160xf32, #tpu.memory_space<vmem>>, vector<1x40x160xf32>,
    %49 = arith.index_cast %arg1 : i32 to index
    %c0_33 = arith.constant 0 : index
    %c0_34 = arith.constant 0 : index
    %c0_35 = arith.constant 0 : index
    %c0_36 = arith.constant 0 : index
    %50 = vector.load %arg8[%49, %c0_33, %c0_34, %c0_35, %c0_36] : memref<4x1x2x40x160xf32, #tpu.memory_space<vmem>>, vector<1x1x2x40x160xf32>
    %51 = vector.shape_cast %50 : vector<1x1x2x40x160xf32> to vector<1x2x40x160xf32>
    %c0_37 = arith.constant 0 : index
    %c2 = arith.constant 2 : index
    %c0_38 = arith.constant 0 : index
    %c0_39 = arith.constant 0 : index
    %c0_40 = arith.constant 0 : index
    %52 = vector.load %arg5[%c0_37, %c2, %c0_38, %c0_39, %c0_40] : memref<1x3x2x40x160xf32, #tpu.memory_space<vmem>>, vector<1x1x2x40x160xf32>
    %53 = vector.shape_cast %52 : vector<1x1x2x40x160xf32> to vector<1x2x40x160xf32>
    %54 = arith.subf %51, %53 : vector<1x2x40x160xf32>
    %55 = arith.mulf %54, %54 : vector<1x2x40x160xf32>
    %cst_41 = arith.constant 9.99999997E-7 : f32
    %56 = vector.broadcast %cst_41 : f32 to vector<1x2x40x160xf32>
    %57 = arith.addf %55, %56 : vector<1x2x40x160xf32>
    %58 = math.sqrt %57 : vector<1x2x40x160xf32>
    %cst_42 = arith.constant 0.00999999977 : f32
    %59 = vector.broadcast %cst_42 : f32 to vector<1x2x40x160xf32>
    %60 = arith.addf %58, %59 : vector<1x2x40x160xf32>
    %cst_43 = arith.constant 4.000000e-01 : f32
    %61 = vector.broadcast %cst_43 : f32 to vector<1x2x40x160xf32>
    %62 = math.powf %60, %61 : vector<1x2x40x160xf32>
    %63 = vector.extract_strided_slice %62 {offsets = [0, 0, 0, 0], sizes = [1, 1, 40, 160], strides = [1, 1, 1, 1]} : vector<1x2x40x160xf32> to vector<1x1x40x160xf32>
    %64 = vector.shape_cast %63 : vector<1x1x40x160xf32> to vector<1x40x160xf32>
    %65 = vector.extract_strided_slice %62 {offsets = [0, 1, 0, 0], sizes = [1, 1, 40, 160], strides = [1, 1, 1, 1]} : vector<1x2x40x160xf32> to vector<1x1x40x160xf32>
    %66 = vector.shape_cast %65 : vector<1x1x40x160xf32> to vector<1x40x160xf32>
    %67 = arith.addf %64, %66 : vector<1x40x160xf32>
    %cst_44 = arith.constant 6.400000e-01 : f32
    %68 = vector.broadcast %cst_44 : f32 to vector<1x40x160xf32>
    %69 = arith.mulf %67, %68 : vector<1x40x160xf32>
    %c0_45 = arith.constant 0 : index
    %c0_46 = arith.constant 0 : index
    %c0_47 = arith.constant 0 : index
    %70 = vector.load %arg9[%c0_45, %c0_46, %c0_47] : memref<1x40x160xf32, #tpu.memory_space<vmem>>, vector<1x40x160xf32>
    %71 = arith.addf %70, %69 : vector<1x40x160xf32>
    %c0_48 = arith.constant 0 : index
    %c0_49 = arith.constant 0 : index
    %c0_50 = arith.constant 0 : index
    %72 = vector.load %arg9[%c0_48, %c0_49, %c0_50] : memref<1x40x160xf32, #tpu.memory_space<vmem>>, vector<1x40x160xf32>
    tpu.vector_store %arg9[%c0_48, %c0_49, %c0_50], %71 {strides = array<i32>} : memref<1x40x160xf32, #tpu.memory_space<vmem>>, vector<1x40x160xf32>,
    %c0_51 = arith.constant 0 : index
    %c0_52 = arith.constant 0 : index
    %c0_53 = arith.constant 0 : index
    %c0_54 = arith.constant 0 : index
    %73 = vector.load %arg6[%c0_51, %c0_52, %c0_53, %c0_54] : memref<1x1x40x160xf32, #tpu.memory_space<vmem>>, vector<1x1x40x160xf32>
    %74 = vector.shape_cast %73 : vector<1x1x40x160xf32> to vector<1x40x160xf32>
    %c0_55 = arith.constant 0 : index
    %c0_56 = arith.constant 0 : index
    %c0_57 = arith.constant 0 : index
    %75 = vector.load %arg10[%c0_55, %c0_56, %c0_57] : memref<1x2x160xf32, #tpu.memory_space<vmem>>, vector<1x1x160xf32>
    %c0_58 = arith.constant 0 : index
    %c0_59 = arith.constant 0 : index
    %c0_60 = arith.constant 0 : index
    %76 = vector.load %arg9[%c0_58, %c0_59, %c0_60] : memref<1x40x160xf32, #tpu.memory_space<vmem>>, vector<1x40x160xf32>
    %77 = arith.mulf %76, %74 : vector<1x40x160xf32>
    %cst_61 = arith.constant dense<0.000000e+00> : vector<1x160xf32>
    %78 = vector.multi_reduction <add>, %77, %cst_61 [1] : vector<1x40x160xf32> to vector<1x160xf32>
    %79 = vector.shape_cast %78 : vector<1x160xf32> to vector<1x1x160xf32>
    %80 = arith.addf %75, %79 : vector<1x1x160xf32>
    %c0_62 = arith.constant 0 : index
    %c0_63 = arith.constant 0 : index
    %c0_64 = arith.constant 0 : index
    %81 = vector.load %arg10[%c0_62, %c0_63, %c0_64] : memref<1x2x160xf32, #tpu.memory_space<vmem>>, vector<1x1x160xf32>
    tpu.vector_store %arg10[%c0_62, %c0_63, %c0_64], %80 {strides = array<i32>} : memref<1x2x160xf32, #tpu.memory_space<vmem>>, vector<1x1x160xf32>,
    %c0_65 = arith.constant 0 : index
    %c1_66 = arith.constant 1 : index
    %c0_67 = arith.constant 0 : index
    %82 = vector.load %arg10[%c0_65, %c1_66, %c0_67] : memref<1x2x160xf32, #tpu.memory_space<vmem>>, vector<1x1x160xf32>
    %cst_68 = arith.constant dense<0.000000e+00> : vector<1x160xf32>
    %83 = vector.multi_reduction <add>, %74, %cst_68 [1] : vector<1x40x160xf32> to vector<1x160xf32>
    %84 = vector.shape_cast %83 : vector<1x160xf32> to vector<1x1x160xf32>
    %85 = arith.addf %82, %84 : vector<1x1x160xf32>
    %c0_69 = arith.constant 0 : index
    %c1_70 = arith.constant 1 : index
    %c0_71 = arith.constant 0 : index
    %86 = vector.load %arg10[%c0_69, %c1_70, %c0_71] : memref<1x2x160xf32, #tpu.memory_space<vmem>>, vector<1x1x160xf32>
    tpu.vector_store %arg10[%c0_69, %c1_70, %c0_71], %85 {strides = array<i32>} : memref<1x2x160xf32, #tpu.memory_space<vmem>>, vector<1x1x160xf32>,
    %c3_i32 = arith.constant 3 : i32
    %87 = arith.cmpi eq, %arg1, %c3_i32 : i32
    %88 = arith.extui %87 : i1 to i32
    %c0_i32_72 = arith.constant 0 : i32
    %89 = arith.cmpi ne, %88, %c0_i32_72 : i32
    scf.if %89 {
      %c0_73 = arith.constant 0 : index
      %c0_74 = arith.constant 0 : index
      %c0_75 = arith.constant 0 : index
      %90 = vector.load %arg10[%c0_73, %c0_74, %c0_75] : memref<1x2x160xf32, #tpu.memory_space<vmem>>, vector<1x2x160xf32>
      %cst_76 = arith.constant dense<0.000000e+00> : vector<1x2xf32>
      %91 = vector.multi_reduction <add>, %90, %cst_76 [2] : vector<1x2x160xf32> to vector<1x2xf32>
      %92 = vector.extract_strided_slice %91 {offsets = [0, 0], sizes = [1, 1], strides = [1, 1]} : vector<1x2xf32> to vector<1x1xf32>
      %93 = vector.extract_strided_slice %91 {offsets = [0, 1], sizes = [1, 1], strides = [1, 1]} : vector<1x2xf32> to vector<1x1xf32>
      %cst_77 = arith.constant 9.99999997E-7 : f32
      %94 = vector.broadcast %cst_77 : f32 to vector<1x1xf32>
      %95 = arith.addf %93, %94 : vector<1x1xf32>
      %96 = arith.divf %92, %95 : vector<1x1xf32>
      %c0_78 = arith.constant 0 : index
      %c0_79 = arith.constant 0 : index
      %c0_80 = arith.constant 0 : index
      %97 = vector.load %arg7[%c0_78, %c0_79, %c0_80] : memref<1x1x1xf32, #tpu.memory_space<vmem>>, vector<1x1x1xf32>
      %98 = vector.shape_cast %97 : vector<1x1x1xf32> to vector<1x1xf32>
      %99 = vector.shape_cast %96 : vector<1x1xf32> to vector<1x1x1xf32>
      tpu.vector_store %arg7[%c0_78, %c0_79, %c0_80], %99 {strides = array<i32>} : memref<1x1x1xf32, #tpu.memory_space<vmem>>, vector<1x1x1xf32>,
    } else {
    }
    return
  }
  func.func @transform_0(%arg0: i32, %arg1: i32) -> (i32, i32, i32, i32) {
    %c0_i32 = arith.constant 0 : i32
    %c0_i32_0 = arith.constant 0 : i32
    %c0_i32_1 = arith.constant 0 : i32
    %c0_i32_2 = arith.constant 0 : i32
    return %arg0, %c0_i32, %c0_i32_0, %c0_i32_1 : i32, i32, i32, i32
  }
  func.func @transform_1(%arg0: i32, %arg1: i32) -> (i32, i32) {
    %c0_i32 = arith.constant 0 : i32
    %c0_i32_0 = arith.constant 0 : i32
    %c0_i32_1 = arith.constant 0 : i32
    return %c0_i32, %c0_i32_0 : i32, i32
  }
  func.func @transform_2(%arg0: i32, %arg1: i32) -> (i32, i32, i32) {
    %c0_i32 = arith.constant 0 : i32
    %c0_i32_0 = arith.constant 0 : i32
    %c0_i32_1 = arith.constant 0 : i32
    %c0_i32_2 = arith.constant 0 : i32
    return %c0_i32, %c0_i32_0, %c0_i32_1 : i32, i32, i32
  }
  func.func @transform_3(%arg0: i32, %arg1: i32) -> (i32, i32, i32, i32, i32) {
    %c0_i32 = arith.constant 0 : i32
    %c0_i32_0 = arith.constant 0 : i32
    %c0_i32_1 = arith.constant 0 : i32
    %c0_i32_2 = arith.constant 0 : i32
    return %arg0, %c0_i32, %c0_i32_0, %arg1, %c0_i32_1 : i32, i32, i32, i32, i32
  }
  func.func @transform_4(%arg0: i32, %arg1: i32) -> (i32, i32, i32, i32) {
    %c0_i32 = arith.constant 0 : i32
    %c0_i32_0 = arith.constant 0 : i32
    %c0_i32_1 = arith.constant 0 : i32
    return %arg0, %c0_i32, %arg1, %c0_i32_0 : i32, i32, i32, i32
  }
  func.func @transform_5(%arg0: i32, %arg1: i32) -> (i32, i32, i32) {
    %c0_i32 = arith.constant 0 : i32
    %c0_i32_0 = arith.constant 0 : i32
    %c0_i32_1 = arith.constant 0 : i32
    return %arg0, %c0_i32, %c0_i32_0 : i32, i32, i32
  }
}

</mosaic_0001>

<bundles_post_ra>
// kernel: selfsup_loss_pallas.1
= control target key start
LH: loop header
LB: loop body
LE: loop exit
PB: predicated region body
PF: predicated region fallthrough
CT: control target
= control target key end

     0   :  { %s7515_s0 = inlined_call_operand.vmem [shape: f32[2,2,32,32], index: 0, kind: input, shape index: {}]   ;;  %s7516_s1 = inlined_call_operand.vmem [shape: f32[160,32], index: 1, kind: input, shape index: {}]   ;;  %s7517_s2 = inlined_call_operand.vmem [shape: f32[2,32,160], index: 2, kind: input, shape index: {}]   ;;  %s7518_s3 = inlined_call_operand.vmem [shape: f32[2,3,2,160,160], index: 3, kind: input, shape index: {}]   ;;  %s7519_s4 = inlined_call_operand.vmem [shape: f32[2,1,160,160], index: 4, kind: input, shape index: {}]   ;;  %s7520_s5 = inlined_call_operand.vmem [shape: f32[2,1,1], index: 5, kind: output, shape index: {}]  }
   0x1   :  { %7522 = sst [smem:[#allocation6_spill]] %s7518_s3 }
   0x2   :  { %s4654_s18 = smov 0   ;;  %s4656_s19 = smov 0  }
   0x3   :  { %s4658_s20 = smov 0   ;;  %s4660_s21 = smov 0  }
   0x4   :  { %s4662_s22 = smov 0   ;;  %s4664_s23 = smov 0  }
   0x5   :  { %s4666_s24 = smov 0  }
   0x6 LB: > { %s24_s25 = sadd.s32 1, %s4612_s22  ;;  %s27_s26 = sadd.s32 1, %s4616_s23  ;;  %s4620_s24 = sphi %s4666_s24, %s15_s24   ;;  %s4616_s23 = sphi %s4664_s23, %s7689_s23   ;;  %s4612_s22 = sphi %s4662_s22, %s7688_s22   ;;  %s4608_s21 = sphi %s4660_s21, %s7687_s21   ;;  %s4604_s20 = sphi %s4658_s20, %s7686_s20   ;;  %s4600_s19 = sphi %s4656_s19, %s7685_s19   ;;  %s4596_s18 = sphi %s4654_s18, %s7684_s18  }
   0x7   : > { %p25_p0 = scmp.ge.s32.totalorder %s24_s25, 4  ;;  %p111_p1 = scmp.ne.s32.totalorder %s4600_s19, %s4596_s18 }
   0x8   : > { %p112_p2 = scmp.eq.s32.totalorder %s4620_s24, 0  ;;  %s104_s30 = sadd.s32 1, %s4600_s19 }
   0x9   : > { %s7691_s25 = smov (%p25_p0, %s24_s25), 0  ;;  %s7693_s26 = smov (!%p25_p0, %s27_s26), %s4616_s23 }
   0xa   : > { %p113_p3 = por %p112_p2, %p111_p1  ;;  %p29_p4 = scmp.ge.s32.totalorder %s7693_s26, 2 }
   0xb   : > { %s100_s27 = ssub.s32 %s4612_s22, %s7691_s25  ;;  %p2433_p6 = scmp.ge.s32.totalorder %s4620_s24, 8 }
   0xc   : > { %s7695_s26 = smov (%p29_p4, %s7693_s26), 0 }
   0xd   : > { %s99_s28 = ssub.s32 %s4616_s23, %s7695_s26  ;;  %197 = sbr.rel (%p2433_p6) target bundleno = 59 (0x3b), region = 24 }
   0xe   : > { %s101_s29 = sor.u32 %s100_s27, %s99_s28 }
   0xf   : > { %p102_p5 = scmp.eq.s32.totalorder %s101_s29, 0 }
  0x11   : > { %s4705_s6 = scalar_select %p102_p5, %s4600_s19, %s104_s30  }
  0x14   : > { %208 = sbr.rel (!%p113_p3) target bundleno = 59 (0x3b), region = 32  ;;  %s210_s7 = sand.u32 (%p113_p3), 1, %s4600_s19  }
  0x15   : > { %s2547_s8 = smul.u32 (%p113_p3), 10, %s4612_s22  ;;  %s7523_s3 = sld [smem:[#allocation6_spill]] (%p113_p3) }
  0x16   : > { %s2582_s9 = smul.u32 (%p113_p3), 480, %s210_s7 }
  0x17   : > { %s2583_s10 = smul.u32 (%p113_p3), 240, %s4616_s23 }
  0x18   : > { %s4719_s16 = scalar_lea.vmem (%p113_p3), [#allocation5], %s2582_s9 }
  0x19   : > { %s216_s11 = sadd.s32 (%p113_p3), %s2583_s10, %s2547_s8 }
  0x1a   : > { %s2435_s12 = sshll.u32 (%p113_p3), %s216_s11, 3 }
  0x1b   : > { %s4714_s15 = scalar_lea.vmem %s7523_s3, %s2435_s12 }
  0x1c   : > { %v231_v0 = vld [vmem:[%s4714_s15] sm:$0xff]  ;;  %v233_v1 = vld [vmem:[%s4714_s15 + $0x8] sm:$0xff]  ;;  %v235_v2 = vld [vmem:[%s4714_s15 + $0x10] sm:$0xff] }
  0x1d   : > { %232 = vst [vmem:[%s4719_s16] sm:$0xff] %v231_v0  ;;  %234 = vst [vmem:[%s4719_s16 + $0x8] sm:$0xff] %v233_v1  ;;  %v237_v3 = vld [vmem:[%s4714_s15 + $0x18] sm:$0xff]  ;;  %v239_v4 = vld [vmem:[%s4714_s15 + $0x20] sm:$0xff] }
  0x1e   : > { %236 = vst [vmem:[%s4719_s16 + $0x10] sm:$0xff] %v235_v2  ;;  %v241_v5 = vld [vmem:[%s4714_s15 + $0x28] sm:$0xff]  ;;  %238 = vst [vmem:[%s4719_s16 + $0x18] sm:$0xff] %v237_v3  ;;  %v243_v6 = vld [vmem:[%s4714_s15 + $0x30] sm:$0xff] }
  0x1f   : > { %240 = vst [vmem:[%s4719_s16 + $0x20] sm:$0xff] %v239_v4  ;;  %242 = vst [vmem:[%s4719_s16 + $0x28] sm:$0xff] %v241_v5  ;;  %v245_v7 = vld [vmem:[%s4714_s15 + $0x38] sm:$0xff]  ;;  %v247_v8 = vld [vmem:[%s4714_s15 + $0x40] sm:$0xff] }
  0x20   : > { %244 = vst [vmem:[%s4719_s16 + $0x30] sm:$0xff] %v243_v6  ;;  %246 = vst [vmem:[%s4719_s16 + $0x38] sm:$0xff] %v245_v7  ;;  %v249_v9 = vld [vmem:[%s4714_s15 + $0x48] sm:$0xff]  ;;  %v251_v10 = vld [vmem:[%s4714_s15 + $0x140] sm:$0xff] }
  0x21   : > { %248 = vst [vmem:[%s4719_s16 + $0x40] sm:$0xff] %v247_v8  ;;  %v253_v11 = vld [vmem:[%s4714_s15 + $0x148] sm:$0xff]  ;;  %250 = vst [vmem:[%s4719_s16 + $0x48] sm:$0xff] %v249_v9  ;;  %v255_v12 = vld [vmem:[%s4714_s15 + $0x150] sm:$0xff] }
  0x22   : > { %252 = vst [vmem:[%s4719_s16 + $0x50] sm:$0xff] %v251_v10  ;;  %254 = vst [vmem:[%s4719_s16 + $0x58] sm:$0xff] %v253_v11  ;;  %v257_v13 = vld [vmem:[%s4714_s15 + $0x158] sm:$0xff]  ;;  %v259_v14 = vld [vmem:[%s4714_s15 + $0x160] sm:$0xff] }
  0x23   : > { %256 = vst [vmem:[%s4719_s16 + $0x60] sm:$0xff] %v255_v12  ;;  %258 = vst [vmem:[%s4719_s16 + $0x68] sm:$0xff] %v257_v13  ;;  %v261_v15 = vld [vmem:[%s4714_s15 + $0x168] sm:$0xff]  ;;  %v263_v16 = vld [vmem:[%s4714_s15 + $0x170] sm:$0xff] }
  0x24   : > { %260 = vst [vmem:[%s4719_s16 + $0x70] sm:$0xff] %v259_v14  ;;  %v265_v17 = vld [vmem:[%s4714_s15 + $0x178] sm:$0xff]  ;;  %262 = vst [vmem:[%s4719_s16 + $0x78] sm:$0xff] %v261_v15  ;;  %v267_v18 = vld [vmem:[%s4714_s15 + $0x180] sm:$0xff] }
  0x25   : > { %264 = vst [vmem:[%s4719_s16 + $0x80] sm:$0xff] %v263_v16  ;;  %266 = vst [vmem:[%s4719_s16 + $0x88] sm:$0xff] %v265_v17  ;;  %v269_v19 = vld [vmem:[%s4714_s15 + $0x188] sm:$0xff]  ;;  %v271_v20 = vld [vmem:[%s4714_s15 + $0x280] sm:$0xff] }
  0x26   : > { %268 = vst [vmem:[%s4719_s16 + $0x90] sm:$0xff] %v267_v18  ;;  %270 = vst [vmem:[%s4719_s16 + $0x98] sm:$0xff] %v269_v19  ;;  %v273_v21 = vld [vmem:[%s4714_s15 + $0x288] sm:$0xff]  ;;  %v275_v22 = vld [vmem:[%s4714_s15 + $0x290] sm:$0xff] }
  0x27   : > { %272 = vst [vmem:[%s4719_s16 + $0xa0] sm:$0xff] %v271_v20  ;;  %v277_v23 = vld [vmem:[%s4714_s15 + $0x298] sm:$0xff]  ;;  %274 = vst [vmem:[%s4719_s16 + $0xa8] sm:$0xff] %v273_v21  ;;  %v279_v24 = vld [vmem:[%s4714_s15 + $0x2a0] sm:$0xff] }
  0x28   : > { %276 = vst [vmem:[%s4719_s16 + $0xb0] sm:$0xff] %v275_v22  ;;  %278 = vst [vmem:[%s4719_s16 + $0xb8] sm:$0xff] %v277_v23  ;;  %v281_v25 = vld [vmem:[%s4714_s15 + $0x2a8] sm:$0xff]  ;;  %v283_v26 = vld [vmem:[%s4714_s15 + $0x2b0] sm:$0xff] }
  0x29   : > { %280 = vst [vmem:[%s4719_s16 + $0xc0] sm:$0xff] %v279_v24  ;;  %282 = vst [vmem:[%s4719_s16 + $0xc8] sm:$0xff] %v281_v25  ;;  %v285_v27 = vld [vmem:[%s4714_s15 + $0x2b8] sm:$0xff]  ;;  %v287_v28 = vld [vmem:[%s4714_s15 + $0x2c0] sm:$0xff] }
  0x2a   : > { %284 = vst [vmem:[%s4719_s16 + $0xd0] sm:$0xff] %v283_v26  ;;  %v289_v29 = vld [vmem:[%s4714_s15 + $0x2c8] sm:$0xff]  ;;  %286 = vst [vmem:[%s4719_s16 + $0xd8] sm:$0xff] %v285_v27  ;;  %v291_v30 = vld [vmem:[%s4714_s15 + $0x3c0] sm:$0xff] }
  0x2b   : > { %288 = vst [vmem:[%s4719_s16 + $0xe0] sm:$0xff] %v287_v28  ;;  %290 = vst [vmem:[%s4719_s16 + $0xe8] sm:$0xff] %v289_v29  ;;  %v293_v31 = vld [vmem:[%s4714_s15 + $0x3c8] sm:$0xff]  ;;  %v295_v32 = vld [vmem:[%s4714_s15 + $0x3d0] sm:$0xff] }
  0x2c   : > { %292 = vst [vmem:[%s4719_s16 + $0xf0] sm:$0xff] %v291_v30  ;;  %294 = vst [vmem:[%s4719_s16 + $0xf8] sm:$0xff] %v293_v31  ;;  %v297_v33 = vld [vmem:[%s4714_s15 + $0x3d8] sm:$0xff]  ;;  %v299_v34 = vld [vmem:[%s4714_s15 + $0x3e0] sm:$0xff] }
  0x2d   : > { %296 = vst [vmem:[%s4719_s16 + $0x100] sm:$0xff] %v295_v32  ;;  %v301_v35 = vld [vmem:[%s4714_s15 + $0x3e8] sm:$0xff]  ;;  %298 = vst [vmem:[%s4719_s16 + $0x108] sm:$0xff] %v297_v33  ;;  %v303_v36 = vld [vmem:[%s4714_s15 + $0x3f0] sm:$0xff] }
  0x2e   : > { %300 = vst [vmem:[%s4719_s16 + $0x110] sm:$0xff] %v299_v34  ;;  %302 = vst [vmem:[%s4719_s16 + $0x118] sm:$0xff] %v301_v35  ;;  %v305_v37 = vld [vmem:[%s4714_s15 + $0x3f8] sm:$0xff]  ;;  %v307_v38 = vld [vmem:[%s4714_s15 + $0x400] sm:$0xff] }
  0x2f   : > { %304 = vst [vmem:[%s4719_s16 + $0x120] sm:$0xff] %v303_v36  ;;  %306 = vst [vmem:[%s4719_s16 + $0x128] sm:$0xff] %v305_v37  ;;  %v309_v39 = vld [vmem:[%s4714_s15 + $0x408] sm:$0xff]  ;;  %v311_v40 = vld [vmem:[%s4714_s15 + $0x500] sm:$0xff] }
  0x30   : > { %308 = vst [vmem:[%s4719_s16 + $0x130] sm:$0xff] %v307_v38  ;;  %v313_v41 = vld [vmem:[%s4714_s15 + $0x508] sm:$0xff]  ;;  %310 = vst [vmem:[%s4719_s16 + $0x138] sm:$0xff] %v309_v39  ;;  %v315_v42 = vld [vmem:[%s4714_s15 + $0x510] sm:$0xff] }
  0x31   : > { %312 = vst [vmem:[%s4719_s16 + $0x140] sm:$0xff] %v311_v40  ;;  %314 = vst [vmem:[%s4719_s16 + $0x148] sm:$0xff] %v313_v41  ;;  %v317_v43 = vld [vmem:[%s4714_s15 + $0x518] sm:$0xff]  ;;  %v319_v44 = vld [vmem:[%s4714_s15 + $0x520] sm:$0xff] }
  0x32   : > { %316 = vst [vmem:[%s4719_s16 + $0x150] sm:$0xff] %v315_v42  ;;  %318 = vst [vmem:[%s4719_s16 + $0x158] sm:$0xff] %v317_v43  ;;  %v321_v45 = vld [vmem:[%s4714_s15 + $0x528] sm:$0xff]  ;;  %v323_v46 = vld [vmem:[%s4714_s15 + $0x530] sm:$0xff] }
  0x33   : > { %320 = vst [vmem:[%s4719_s16 + $0x160] sm:$0xff] %v319_v44  ;;  %v325_v47 = vld [vmem:[%s4714_s15 + $0x538] sm:$0xff]  ;;  %322 = vst [vmem:[%s4719_s16 + $0x168] sm:$0xff] %v321_v45  ;;  %v327_v48 = vld [vmem:[%s4714_s15 + $0x540] sm:$0xff] }
  0x34   : > { %324 = vst [vmem:[%s4719_s16 + $0x170] sm:$0xff] %v323_v46  ;;  %326 = vst [vmem:[%s4719_s16 + $0x178] sm:$0xff] %v325_v47  ;;  %v329_v49 = vld [vmem:[%s4714_s15 + $0x548] sm:$0xff]  ;;  %v331_v50 = vld [vmem:[%s4714_s15 + $0x640] sm:$0xff] }
  0x35   : > { %328 = vst [vmem:[%s4719_s16 + $0x180] sm:$0xff] %v327_v48  ;;  %330 = vst [vmem:[%s4719_s16 + $0x188] sm:$0xff] %v329_v49  ;;  %v333_v51 = vld [vmem:[%s4714_s15 + $0x648] sm:$0xff]  ;;  %v335_v52 = vld [vmem:[%s4714_s15 + $0x650] sm:$0xff] }
  0x36   : > { %332 = vst [vmem:[%s4719_s16 + $0x190] sm:$0xff] %v331_v50  ;;  %v337_v53 = vld [vmem:[%s4714_s15 + $0x658] sm:$0xff]  ;;  %334 = vst [vmem:[%s4719_s16 + $0x198] sm:$0xff] %v333_v51  ;;  %v339_v54 = vld [vmem:[%s4714_s15 + $0x660] sm:$0xff] }
  0x37   : > { %336 = vst [vmem:[%s4719_s16 + $0x1a0] sm:$0xff] %v335_v52  ;;  %338 = vst [vmem:[%s4719_s16 + $0x1a8] sm:$0xff] %v337_v53  ;;  %v341_v55 = vld [vmem:[%s4714_s15 + $0x668] sm:$0xff]  ;;  %v343_v56 = vld [vmem:[%s4714_s15 + $0x670] sm:$0xff] }
  0x38   : > { %340 = vst [vmem:[%s4719_s16 + $0x1b0] sm:$0xff] %v339_v54  ;;  %342 = vst [vmem:[%s4719_s16 + $0x1b8] sm:$0xff] %v341_v55  ;;  %v345_v57 = vld [vmem:[%s4714_s15 + $0x678] sm:$0xff]  ;;  %v347_v58 = vld [vmem:[%s4714_s15 + $0x680] sm:$0xff] }
  0x39   : > { %344 = vst [vmem:[%s4719_s16 + $0x1c0] sm:$0xff] %v343_v56  ;;  %v349_v59 = vld [vmem:[%s4714_s15 + $0x688] sm:$0xff]  ;;  %346 = vst [vmem:[%s4719_s16 + $0x1c8] sm:$0xff] %v345_v57 }
  0x3a   : > { %348 = vst [vmem:[%s4719_s16 + $0x1d0] sm:$0xff] %v347_v58  ;;  %350 = vst [vmem:[%s4719_s16 + $0x1d8] sm:$0xff] %v349_v59 }
  0x3b PF: > { %p2436_p7 = scmp.ge.s32.totalorder %s4620_s24, 1  ;;  %p369_p8 = scmp.lt.s32.totalorder %s4620_s24, 9 }
  0x3d   : > { %p370_p9 = pnand %p2436_p7, %p369_p8 }
  0x3e   : > { %s376_s17 = sand.u32 (!%p370_p9), 1, %s4596_s18   ;;  %p416_p10 = scmp.lt.s32.totalorder (!%p370_p9), %s4608_s21, 1 }
  0x3f   : > { %373 = sbr.rel (%p370_p9) target bundleno = 1245 (0x4dd), region = 59  ;;  %p2441_p12 = scmp.ne.s32.totalorder (!%p370_p9), %s4604_s20, 0 }
  0x40   : > { %s2584_s27 = smul.u32 (!%p370_p9), 480, %s376_s17 }
  0x41   : > { %s422_s28 = smul.u32 (!%p370_p9), 5, %s4604_s20 }
  0x42   : > { %s4862_s3 = scalar_lea.vmem (!%p370_p9), [#allocation5], %s2584_s27 }
  0x43   : > { %p425_p11 = scmp.lt.s32.totalorder (!%p370_p9), %s422_s28, 19 }
  0x46   : > { %s7697_s21 = smov (!%p416_p10, %s4608_s21), 1  ;;  %s7699_s28 = smov (!%p425_p11, %s422_s28), 19 }
  0x47   : > { %s2548_s29 = sshll.u32 %s7697_s21, 6  ;;  %s2585_s9 = smul.u32 40, %s7697_s21  ;;  %vm440_vm0 = vcmask (!%p2441_p12), 1041408   ;;  %vm441_vm1 = vcmask (!%p2441_p12), 257026   ;;  %v469_v60 = vld [vmem:[%s7517_s2 + $0x8] sm:$0xff] (!%p2441_p12)  ;;  %v471_v61 = vld [vmem:[%s7517_s2 + $0x18] sm:$0xff] (!%p2441_p12) }
  0x48   : > { %s4850_s8 = scalar_lea.vmem %s7515_s0, %s2548_s29  ;;  %s435_s18 = scalar_lea.vmem %s7520_s5, %s7697_s21  ;;  %v2471_v62 = vld [vmem:[%s7517_s2 + $0x48] sm:$0xff] (!%p2441_p12)  ;;  %vm442_vm2 = vmor (!%p2441_p12), %vm441_vm1, %vm440_vm0  ;;  %v2550_v63 = vpack.c.bf16 (!%p2441_p12), %v471_v61, %v469_v60  ;;  %v2473_v0 = vld [vmem:[%s7517_s2 + $0x58] sm:$0xff] (!%p2441_p12)  ;;  %v4622_v2 = vmov (!%p2441_p12), 0.0   ;;  %vm476_vm3 = vcmask (!%p2441_p12), 261120  }
  0x49   : > { %s2439_s12 = sshll.u32 %s7699_s28, 1  ;;  %439 = sbr.rel (%p2441_p12) target bundleno = 605 (0x25d), region = 67  ;;  %v468_v1 = vld [vmem:[%s7517_s2] sm:$0xff] (!%p2441_p12)  ;;  %553 = vmatprep.mubr.f32.mxu1 (!%p2441_p12), %v4622_v2  ;;  %953 = vmatprep.mubr.f32.mxu0 (!%p2441_p12), %v4622_v2  ;;  %v2566_v3 = vpack.c.bf16 (!%p2441_p12), %v2473_v0, %v2471_v62  ;;  %v470_v4 = vld [vmem:[%s7517_s2 + $0x10] sm:$0xff] (!%p2441_p12)  ;;  %443 = vst.msk [vmem:[#allocation4] sm:$0xf] (!%p2441_p12), %vm442_vm2, %v4622_v2 }
  0x4a   : > { %s429_s13 = sadd.s32 %s2585_s9, %s2439_s12  ;;  %v2470_v5 = vld [vmem:[%s7517_s2 + $0x40] sm:$0xff] (!%p2441_p12)  ;;  %v2472_v6 = vld [vmem:[%s7517_s2 + $0x50] sm:$0xff] (!%p2441_p12)  ;;  %2551 = vmatprep.subr.bf16.mxu1 (!%p2441_p12), %v2550_v63  ;;  %v2552_v7 = vpack.c.bf16 (!%p2441_p12), %v470_v4, %v468_v1  ;;  %v473_v9 = vld [vmem:[%s7517_s2 + $0x28] sm:$0xff] (!%p2441_p12) }
  0x4b   : > { %s2440_s14 = sshll.u32 %s429_s13, 3  ;;  %v2568_v8 = vpack.c.bf16 (!%p2441_p12), %v2472_v6, %v2470_v5  ;;  %v475_v10 = vld [vmem:[%s7517_s2 + $0x38] sm:$0xff] (!%p2441_p12)  ;;  %v2475_v11 = vld [vmem:[%s7517_s2 + $0x68] sm:$0xff] (!%p2441_p12)  ;;  %2567 = vmatprep.subr.bf16.mxu0 (!%p2441_p12), %v2566_v3  ;;  %v472_v14 = vld [vmem:[%s7517_s2 + $0x20] sm:$0xff] (!%p2441_p12) }
  0x4c   : > { %s4860_s17 = scalar_lea.vmem %s7519_s4, %s2440_s14  ;;  %v2554_v12 = vpack.c.bf16 (!%p2441_p12), %v475_v10, %v473_v9  ;;  %v2477_v13 = vld [vmem:[%s7517_s2 + $0x78] sm:$0xff] (!%p2441_p12)  ;;  %v474_v15 = vld [vmem:[%s7517_s2 + $0x30] sm:$0xff] (!%p2441_p12)  ;;  %2553 = vmatpush1.bf16.msra.mxu1 (!%p2441_p12), %v2552_v7  ;;  %v2474_v18 = vld [vmem:[%s7517_s2 + $0x60] sm:$0xff] (!%p2441_p12) }
  0x4d   : > { %2569 = vmatpush1.bf16.msra.mxu0 (!%p2441_p12), %v2568_v8  ;;  %v2570_v16 = vpack.c.bf16 (!%p2441_p12), %v2477_v13, %v2475_v11  ;;  %v2556_v17 = vpack.c.bf16 (!%p2441_p12), %v474_v15, %v472_v14  ;;  %v2476_v19 = vld [vmem:[%s7517_s2 + $0x70] sm:$0xff] (!%p2441_p12)  ;;  %v464_v21 = vld [vmem:[%s4850_s8] sm:$0xff] (!%p2441_p12)  ;;  %v465_v23 = vld [vmem:[%s4850_s8 + $0x8] sm:$0xff] (!%p2441_p12) }
  0x4e   : > { %2555 = vmatprep.subr.bf16.mxu1 (!%p2441_p12), %v2554_v12  ;;  %v2572_v20 = vpack.c.bf16 (!%p2441_p12), %v2476_v19, %v2474_v18  ;;  %v2466_v22 = vld [vmem:[%s4850_s8 + $0x20] sm:$0xff] (!%p2441_p12)  ;;  %v2467_v24 = vld [vmem:[%s4850_s8 + $0x28] sm:$0xff] (!%p2441_p12)  ;;  %v466_v25 = vld [vmem:[%s4850_s8 + $0x10] sm:$0xff] (!%p2441_p12) }
  0x4f   : > { %2571 = vmatprep.subr.bf16.mxu0 (!%p2441_p12), %v2570_v16  ;;  %v2468_v26 = vld [vmem:[%s4850_s8 + $0x30] sm:$0xff] (!%p2441_p12)  ;;  %v467_v27 = vld [vmem:[%s4850_s8 + $0x18] sm:$0xff] (!%p2441_p12)  ;;  %v444_v53 = vld [vmem:[%s7516_s1] sm:$0xff] (!%p2441_p12) }
  0x50   : > { %2557 = vmatpush1.bf16.msra.mxu1 %v2556_v17  ;;  %v2469_v28 = vld [vmem:[%s4850_s8 + $0x38] sm:$0xff]  ;;  %v445_v54 = vld [vmem:[%s7516_s1 + $0x8] sm:$0xff]  ;;  %v446_v55 = vld [vmem:[%s7516_s1 + $0x10] sm:$0xff] }
  0x51   : > { %2573 = vmatpush1.bf16.msra.mxu0 %v2572_v20  ;;  %v447_v56 = vld [vmem:[%s7516_s1 + $0x18] sm:$0xff]  ;;  %v448_v57 = vld [vmem:[%s7516_s1 + $0x20] sm:$0xff]  ;;  %v449_v58 = vld [vmem:[%s7516_s1 + $0x28] sm:$0xff] }
  0x52   : > { %v450_v59 = vld [vmem:[%s7516_s1 + $0x30] sm:$0xff]  ;;  %v451_v60 = vld [vmem:[%s7516_s1 + $0x38] sm:$0xff]  ;;  %v452_v61 = vld [vmem:[%s7516_s1 + $0x40] sm:$0xff] }
  0x53   : > { %2442 = vmatmul.mubr.msk.f32.vlgmr.msra.gmra.mrb[0].mxu1 %vm476_vm3, %v464_v21  ;;  %v453_v62 = vld [vmem:[%s7516_s1 + $0x48] sm:$0xff]  ;;  %v454_v63 = vld [vmem:[%s7516_s1 + $0x50] sm:$0xff]  ;;  %v455_v0 = vld [vmem:[%s7516_s1 + $0x58] sm:$0xff] }
  0x54   : > { %2478 = vmatmul.mubr.msk.f32.vlgmr.msra.gmra.mrb[0].mxu0 %vm476_vm3, %v2466_v22  ;;  %559 = vmatprep.mubr.f32.mxu1 %v4622_v2  ;;  %v456_v1 = vld [vmem:[%s7516_s1 + $0x60] sm:$0xff]  ;;  %v457_v3 = vld [vmem:[%s7516_s1 + $0x68] sm:$0xff]  ;;  %v458_v4 = vld [vmem:[%s7516_s1 + $0x70] sm:$0xff] }
  0x55   : > { %959 = vmatprep.mubr.f32.mxu0 %v4622_v2  ;;  %v459_v5 = vld [vmem:[%s7516_s1 + $0x78] sm:$0xff]  ;;  %v460_v6 = vld [vmem:[%s7516_s1 + $0x80] sm:$0xff]  ;;  %v461_v7 = vld [vmem:[%s7516_s1 + $0x88] sm:$0xff] }
  0x56   : > { %v462_v8 = vld [vmem:[%s7516_s1 + $0x90] sm:$0xff]  ;;  %v463_v9 = vld [vmem:[%s7516_s1 + $0x98] sm:$0xff] }
  0x57   : > { %2443 = vmatmul.mubr.msk.f32.gmra.mrb[2].mxu1 %vm476_vm3, %v465_v23 }
  0x58   : > { %2479 = vmatmul.mubr.msk.f32.gmra.mrb[2].mxu0 %vm476_vm3, %v2467_v24  ;;  %565 = vmatprep.mubr.f32.mxu1 %v4622_v2 }
  0x59   : > { %965 = vmatprep.mubr.f32.mxu0 %v4622_v2 }
  0x5b   : > { %2444 = vmatmul.mubr.msk.f32.gmra.mrb[4].mxu1 %vm476_vm3, %v466_v25 }
  0x5c   : > { %2480 = vmatmul.mubr.msk.f32.gmra.mrb[4].mxu0 %vm476_vm3, %v2468_v26  ;;  %571 = vmatprep.mubr.f32.mxu1 %v4622_v2 }
  0x5d   : > { %971 = vmatprep.mubr.f32.mxu0 %v4622_v2 }
  0x5f   : > { %2445 = vmatmul.mubr.msk.f32.gmra.mrb[6].mxu1 %vm476_vm3, %v467_v27 }
  0x60   : > { %2481 = vmatmul.mubr.msk.f32.gmra.mrb[6].mxu0 %vm476_vm3, %v2469_v28  ;;  %702 = vmatprep.mubr.f32.mxu1 %v4622_v2 }
  0x61   : > { %1042 = vmatprep.mubr.f32.mxu0 %v4622_v2 }
 0x126   : > { %v555_v29 = vpop.f32.mrb[0].mxu1 }
 0x127   : > { %v955_v30 = vpop.f32.mrb[0].mxu0  ;;  %v557_v31 = vpop.f32.mrb[1].mxu1 }
 0x128   : > { %v957_v32 = vpop.f32.mrb[1].mxu0 }
 0x12a   : > { %v561_v33 = vpop.f32.mrb[2].mxu1 }
 0x12b   : > { %v961_v34 = vpop.f32.mrb[2].mxu0  ;;  %v2560_v35 = vpack.c.bf16 %v561_v33, %v555_v29  ;;  %v563_v37 = vpop.f32.mrb[3].mxu1 }
 0x12c   : > { %v2576_v36 = vpack.c.bf16 %v961_v34, %v955_v30  ;;  %v963_v38 = vpop.f32.mrb[3].mxu0  ;;  %v2558_v39 = vpack.c.bf16 %v563_v37, %v557_v31 }
 0x12d   : > { %v2574_v40 = vpack.c.bf16 %v963_v38, %v957_v32 }
 0x12e   : > { %v567_v41 = vpop.f32.mrb[4].mxu1  ;;  %2559 = vmatprep.subr.bf16.mxu1 %v2558_v39 }
 0x12f   : > { %v967_v42 = vpop.f32.mrb[4].mxu0  ;;  %2575 = vmatprep.subr.bf16.mxu0 %v2574_v40  ;;  %v569_v43 = vpop.f32.mrb[5].mxu1  ;;  %2561 = vmatpush1.bf16.msra.mxu1 %v2560_v35 }
 0x130   : > { %v969_v44 = vpop.f32.mrb[5].mxu0  ;;  %2577 = vmatpush1.bf16.msra.mxu0 %v2576_v36 }
 0x132   : > { %v573_v45 = vpop.f32.mrb[6].mxu1 }
 0x133   : > { %v973_v46 = vpop.f32.mrb[6].mxu0  ;;  %v2564_v47 = vpack.c.bf16 %v573_v45, %v567_v41  ;;  %v575_v49 = vpop.f32.mrb[7].mxu1 }
 0x134   : > { %v2580_v48 = vpack.c.bf16 %v973_v46, %v967_v42  ;;  %v975_v50 = vpop.f32.mrb[7].mxu0  ;;  %v2562_v51 = vpack.c.bf16 %v575_v49, %v569_v43 }
 0x135   : > { %v2578_v52 = vpack.c.bf16 %v975_v50, %v969_v44 }
 0x136   : > { %2563 = vmatprep.subr.bf16.mxu1 %v2562_v51 }
 0x137   : > { %2579 = vmatprep.subr.bf16.mxu0 %v2578_v52  ;;  %2565 = vmatpush1.bf16.msra.mxu1 %v2564_v47 }
 0x138   : > { %2581 = vmatpush1.bf16.msra.mxu0 %v2580_v48 }
 0x13a   : > { %2446 = vmatmul.mubr.msk.f32.vlgmr.msra.gmra.mrb[8].mxu1 %vm476_vm3, %v444_v53 }
 0x13b   : > { %2482 = vmatmul.mubr.msk.f32.vlgmr.msra.gmra.mrb[8].mxu0 %vm476_vm3, %v444_v53  ;;  %708 = vmatprep.mubr.f32.mxu1 %v4622_v2 }
 0x13c   : > { %1048 = vmatprep.mubr.f32.mxu0 %v4622_v2 }
 0x13e   : > { %2447 = vmatmul.mubr.msk.f32.gmra.mrb[10].mxu1 %vm476_vm3, %v445_v54 }
 0x13f   : > { %2483 = vmatmul.mubr.msk.f32.gmra.mrb[10].mxu0 %vm476_vm3, %v445_v54  ;;  %714 = vmatprep.mubr.f32.mxu1 %v4622_v2 }
 0x140   : > { %1054 = vmatprep.mubr.f32.mxu0 %v4622_v2 }
 0x142   : > { %2448 = vmatmul.mubr.msk.f32.gmra.mrb[12].mxu1 %vm476_vm3, %v446_v55 }
 0x143   : > { %2484 = vmatmul.mubr.msk.f32.gmra.mrb[12].mxu0 %vm476_vm3, %v446_v55  ;;  %720 = vmatprep.mubr.f32.mxu1 %v4622_v2 }
 0x144   : > { %1060 = vmatprep.mubr.f32.mxu0 %v4622_v2 }
 0x146   : > { %2449 = vmatmul.mubr.msk.f32.gmra.mrb[14].mxu1 %vm476_vm3, %v447_v56 }
 0x147   : > { %2485 = vmatmul.mubr.msk.f32.gmra.mrb[14].mxu0 %vm476_vm3, %v447_v56  ;;  %726 = vmatprep.mubr.f32.mxu1 %v4622_v2 }
 0x148   : > { %1066 = vmatprep.mubr.f32.mxu0 %v4622_v2 }
 0x14a   : > { %2450 = vmatmul.mubr.msk.f32.gmra.mrb[16].mxu1 %vm476_vm3, %v448_v57 }
 0x14b   : > { %2486 = vmatmul.mubr.msk.f32.gmra.mrb[16].mxu0 %vm476_vm3, %v448_v57  ;;  %732 = vmatprep.mubr.f32.mxu1 %v4622_v2 }
 0x14c   : > { %1072 = vmatprep.mubr.f32.mxu0 %v4622_v2 }
 0x14e   : > { %2451 = vmatmul.mubr.msk.f32.gmra.mrb[18].mxu1 %vm476_vm3, %v449_v58 }
 0x14f   : > { %2487 = vmatmul.mubr.msk.f32.gmra.mrb[18].mxu0 %vm476_vm3, %v449_v58  ;;  %738 = vmatprep.mubr.f32.mxu1 %v4622_v2 }
 0x150   : > { %1078 = vmatprep.mubr.f32.mxu0 %v4622_v2 }
 0x152   : > { %2452 = vmatmul.mubr.msk.f32.gmra.mrb[20].mxu1 %vm476_vm3, %v450_v59 }
 0x153   : > { %2488 = vmatmul.mubr.msk.f32.gmra.mrb[20].mxu0 %vm476_vm3, %v450_v59  ;;  %744 = vmatprep.mubr.f32.mxu1 %v4622_v2 }
 0x154   : > { %1084 = vmatprep.mubr.f32.mxu0 %v4622_v2 }
 0x156   : > { %2453 = vmatmul.mubr.msk.f32.gmra.mrb[22].mxu1 %vm476_vm3, %v451_v60 }
 0x157   : > { %2489 = vmatmul.mubr.msk.f32.gmra.mrb[22].mxu0 %vm476_vm3, %v451_v60  ;;  %750 = vmatprep.mubr.f32.mxu1 %v4622_v2 }
 0x158   : > { %1090 = vmatprep.mubr.f32.mxu0 %v4622_v2 }
 0x15a   : > { %2454 = vmatmul.mubr.msk.f32.gmra.mrb[24].mxu1 %vm476_vm3, %v452_v61 }
 0x15b   : > { %2490 = vmatmul.mubr.msk.f32.gmra.mrb[24].mxu0 %vm476_vm3, %v452_v61  ;;  %756 = vmatprep.mubr.f32.mxu1 %v4622_v2 }
 0x15c   : > { %1096 = vmatprep.mubr.f32.mxu0 %v4622_v2 }
 0x15e   : > { %2455 = vmatmul.mubr.msk.f32.gmra.mrb[26].mxu1 %vm476_vm3, %v453_v62 }
 0x15f   : > { %2491 = vmatmul.mubr.msk.f32.gmra.mrb[26].mxu0 %vm476_vm3, %v453_v62  ;;  %762 = vmatprep.mubr.f32.mxu1 %v4622_v2 }
 0x160   : > { %1102 = vmatprep.mubr.f32.mxu0 %v4622_v2 }
 0x162   : > { %2456 = vmatmul.mubr.msk.f32.gmra.mrb[28].mxu1 %vm476_vm3, %v454_v63 }
 0x163   : > { %2492 = vmatmul.mubr.msk.f32.gmra.mrb[28].mxu0 %vm476_vm3, %v454_v63  ;;  %768 = vmatprep.mubr.f32.mxu1 %v4622_v2 }
 0x164   : > { %1108 = vmatprep.mubr.f32.mxu0 %v4622_v2 }
 0x166   : > { %2457 = vmatmul.mubr.msk.f32.gmra.mrb[30].mxu1 %vm476_vm3, %v455_v0 }
 0x167   : > { %2493 = vmatmul.mubr.msk.f32.gmra.mrb[30].mxu0 %vm476_vm3, %v455_v0  ;;  %774 = vmatprep.mubr.f32.mxu1 %v4622_v2 }
 0x168   : > { %1114 = vmatprep.mubr.f32.mxu0 %v4622_v2 }
 0x16a   : > { %2458 = vmatmul.mubr.msk.f32.gmra.mrb[32].mxu1 %vm476_vm3, %v456_v1 }
 0x16b   : > { %2494 = vmatmul.mubr.msk.f32.gmra.mrb[32].mxu0 %vm476_vm3, %v456_v1  ;;  %780 = vmatprep.mubr.f32.mxu1 %v4622_v2 }
 0x16c   : > { %1120 = vmatprep.mubr.f32.mxu0 %v4622_v2 }
 0x16e   : > { %2459 = vmatmul.mubr.msk.f32.gmra.mrb[34].mxu1 %vm476_vm3, %v457_v3 }
 0x16f   : > { %2495 = vmatmul.mubr.msk.f32.gmra.mrb[34].mxu0 %vm476_vm3, %v457_v3  ;;  %786 = vmatprep.mubr.f32.mxu1 %v4622_v2 }
 0x170   : > { %1126 = vmatprep.mubr.f32.mxu0 %v4622_v2 }
 0x172   : > { %2460 = vmatmul.mubr.msk.f32.gmra.mrb[36].mxu1 %vm476_vm3, %v458_v4 }
 0x173   : > { %2496 = vmatmul.mubr.msk.f32.gmra.mrb[36].mxu0 %vm476_vm3, %v458_v4  ;;  %792 = vmatprep.mubr.f32.mxu1 %v4622_v2 }
 0x174   : > { %1132 = vmatprep.mubr.f32.mxu0 %v4622_v2 }
 0x176   : > { %2461 = vmatmul.mubr.msk.f32.gmra.mrb[38].mxu1 %vm476_vm3, %v459_v5 }
 0x177   : > { %2497 = vmatmul.mubr.msk.f32.gmra.mrb[38].mxu0 %vm476_vm3, %v459_v5  ;;  %798 = vmatprep.mubr.f32.mxu1 %v4622_v2 }
 0x178   : > { %1138 = vmatprep.mubr.f32.mxu0 %v4622_v2 }
 0x17a   : > { %2462 = vmatmul.mubr.msk.f32.gmra.mrb[40].mxu1 %vm476_vm3, %v460_v6 }
 0x17b   : > { %2498 = vmatmul.mubr.msk.f32.gmra.mrb[40].mxu0 %vm476_vm3, %v460_v6  ;;  %804 = vmatprep.mubr.f32.mxu1 %v4622_v2 }
 0x17c   : > { %1144 = vmatprep.mubr.f32.mxu0 %v4622_v2 }
 0x17e   : > { %2463 = vmatmul.mubr.msk.f32.gmra.mrb[42].mxu1 %vm476_vm3, %v461_v7 }
 0x17f   : > { %2499 = vmatmul.mubr.msk.f32.gmra.mrb[42].mxu0 %vm476_vm3, %v461_v7  ;;  %810 = vmatprep.mubr.f32.mxu1 %v4622_v2 }
 0x180   : > { %1150 = vmatprep.mubr.f32.mxu0 %v4622_v2 }
 0x182   : > { %2464 = vmatmul.mubr.msk.f32.gmra.mrb[44].mxu1 %vm476_vm3, %v462_v8 }
 0x183   : > { %2500 = vmatmul.mubr.msk.f32.gmra.mrb[44].mxu0 %vm476_vm3, %v462_v8  ;;  %816 = vmatprep.mubr.f32.mxu1 %v4622_v2 }
 0x184   : > { %1156 = vmatprep.mubr.f32.mxu0 %v4622_v2 }
 0x186   : > { %2465 = vmatmul.mubr.msk.f32.gmra.mrb[46].mxu1 %vm476_vm3, %v463_v9 }
 0x187   : > { %2501 = vmatmul.mubr.msk.f32.gmra.mrb[46].mxu0 %vm476_vm3, %v463_v9 }
 0x20d   : > { %v704_v10 = vpop.f32.mrb[8].mxu1 }
 0x20e   : > { %v1044_v11 = vpop.f32.mrb[8].mxu0  ;;  %823 = vst [vmem:[#allocation2] sm:$0xff] %v704_v10  ;;  %v706_v12 = vpop.f32.mrb[9].mxu1 }
 0x20f   : > { %1164 = vst [vmem:[#allocation2 + $0x50] sm:$0xff] %v1044_v11  ;;  %v1046_v13 = vpop.f32.mrb[9].mxu0  ;;  %824 = vst.msk [vmem:[#allocation2 + $0x8] sm:$0xff] %vm476_vm3, %v706_v12 }
 0x210   : > { %1165 = vst.msk [vmem:[#allocation2 + $0x58] sm:$0xff] %vm476_vm3, %v1046_v13 }
 0x211   : > { %v710_v14 = vpop.f32.mrb[10].mxu1 }
 0x212   : > { %v1050_v2 = vpop.f32.mrb[10].mxu0  ;;  %825 = vst [vmem:[#allocation2 + $0x10] sm:$0xff] %v710_v14  ;;  %v712_v15 = vpop.f32.mrb[11].mxu1 }
 0x213   : > { %1166 = vst [vmem:[#allocation2 + $0x60] sm:$0xff] %v1050_v2  ;;  %v1052_v16 = vpop.f32.mrb[11].mxu0  ;;  %826 = vst.msk [vmem:[#allocation2 + $0x18] sm:$0xff] %vm476_vm3, %v712_v15 }
 0x214   : > { %1167 = vst.msk [vmem:[#allocation2 + $0x68] sm:$0xff] %vm476_vm3, %v1052_v16 }
 0x215   : > { %v716_v17 = vpop.f32.mrb[12].mxu1 }
 0x216   : > { %v1056_v18 = vpop.f32.mrb[12].mxu0  ;;  %827 = vst [vmem:[#allocation2 + $0x20] sm:$0xff] %v716_v17  ;;  %v718_v19 = vpop.f32.mrb[13].mxu1 }
 0x217   : > { %1168 = vst [vmem:[#allocation2 + $0x70] sm:$0xff] %v1056_v18  ;;  %v1058_v20 = vpop.f32.mrb[13].mxu0  ;;  %828 = vst.msk [vmem:[#allocation2 + $0x28] sm:$0xff] %vm476_vm3, %v718_v19 }
 0x218   : > { %1169 = vst.msk [vmem:[#allocation2 + $0x78] sm:$0xff] %vm476_vm3, %v1058_v20 }
 0x219   : > { %v722_v21 = vpop.f32.mrb[14].mxu1 }
 0x21a   : > { %v1062_v22 = vpop.f32.mrb[14].mxu0  ;;  %829 = vst [vmem:[#allocation2 + $0x30] sm:$0xff] %v722_v21  ;;  %v724_v23 = vpop.f32.mrb[15].mxu1 }
 0x21b   : > { %1170 = vst [vmem:[#allocation2 + $0x80] sm:$0xff] %v1062_v22  ;;  %v1064_v24 = vpop.f32.mrb[15].mxu0  ;;  %830 = vst.msk [vmem:[#allocation2 + $0x38] sm:$0xff] %vm476_vm3, %v724_v23 }
 0x21c   : > { %1171 = vst.msk [vmem:[#allocation2 + $0x88] sm:$0xff] %vm476_vm3, %v1064_v24 }
 0x21d   : > { %v728_v25 = vpop.f32.mrb[16].mxu1 }
 0x21e   : > { %v1068_v26 = vpop.f32.mrb[16].mxu0  ;;  %831 = vst [vmem:[#allocation2 + $0x40] sm:$0xff] %v728_v25  ;;  %v730_v27 = vpop.f32.mrb[17].mxu1 }
 0x21f   : > { %1172 = vst [vmem:[#allocation2 + $0x90] sm:$0xff] %v1068_v26  ;;  %v1070_v28 = vpop.f32.mrb[17].mxu0  ;;  %832 = vst.msk [vmem:[#allocation2 + $0x48] sm:$0xff] %vm476_vm3, %v730_v27 }
 0x220   : > { %1173 = vst.msk [vmem:[#allocation2 + $0x98] sm:$0xff] %vm476_vm3, %v1070_v28 }
 0x221   : > { %v734_v29 = vpop.f32.mrb[18].mxu1 }
 0x222   : > { %v1074_v30 = vpop.f32.mrb[18].mxu0  ;;  %833 = vst [vmem:[#allocation2 + $0xa0] sm:$0xff] %v734_v29  ;;  %v736_v31 = vpop.f32.mrb[19].mxu1 }
 0x223   : > { %1174 = vst [vmem:[#allocation2 + $0xf0] sm:$0xff] %v1074_v30  ;;  %v1076_v32 = vpop.f32.mrb[19].mxu0  ;;  %834 = vst.msk [vmem:[#allocation2 + $0xa8] sm:$0xff] %vm476_vm3, %v736_v31 }
 0x224   : > { %1175 = vst.msk [vmem:[#allocation2 + $0xf8] sm:$0xff] %vm476_vm3, %v1076_v32 }
 0x225   : > { %v740_v33 = vpop.f32.mrb[20].mxu1 }
 0x226   : > { %v1080_v34 = vpop.f32.mrb[20].mxu0  ;;  %835 = vst [vmem:[#allocation2 + $0xb0] sm:$0xff] %v740_v33  ;;  %v742_v35 = vpop.f32.mrb[21].mxu1 }
 0x227   : > { %1176 = vst [vmem:[#allocation2 + $0x100] sm:$0xff] %v1080_v34  ;;  %v1082_v36 = vpop.f32.mrb[21].mxu0  ;;  %836 = vst.msk [vmem:[#allocation2 + $0xb8] sm:$0xff] %vm476_vm3, %v742_v35 }
 0x228   : > { %1177 = vst.msk [vmem:[#allocation2 + $0x108] sm:$0xff] %vm476_vm3, %v1082_v36 }
 0x229   : > { %v746_v37 = vpop.f32.mrb[22].mxu1 }
 0x22a   : > { %v1086_v38 = vpop.f32.mrb[22].mxu0  ;;  %837 = vst [vmem:[#allocation2 + $0xc0] sm:$0xff] %v746_v37  ;;  %v748_v39 = vpop.f32.mrb[23].mxu1 }
 0x22b   : > { %1178 = vst [vmem:[#allocation2 + $0x110] sm:$0xff] %v1086_v38  ;;  %v1088_v40 = vpop.f32.mrb[23].mxu0  ;;  %838 = vst.msk [vmem:[#allocation2 + $0xc8] sm:$0xff] %vm476_vm3, %v748_v39 }
 0x22c   : > { %1179 = vst.msk [vmem:[#allocation2 + $0x118] sm:$0xff] %vm476_vm3, %v1088_v40 }
 0x22d   : > { %v752_v41 = vpop.f32.mrb[24].mxu1 }
 0x22e   : > { %v1092_v42 = vpop.f32.mrb[24].mxu0  ;;  %839 = vst [vmem:[#allocation2 + $0xd0] sm:$0xff] %v752_v41  ;;  %v754_v43 = vpop.f32.mrb[25].mxu1 }
 0x22f   : > { %1180 = vst [vmem:[#allocation2 + $0x120] sm:$0xff] %v1092_v42  ;;  %v1094_v44 = vpop.f32.mrb[25].mxu0  ;;  %840 = vst.msk [vmem:[#allocation2 + $0xd8] sm:$0xff] %vm476_vm3, %v754_v43 }
 0x230   : > { %1181 = vst.msk [vmem:[#allocation2 + $0x128] sm:$0xff] %vm476_vm3, %v1094_v44 }
 0x231   : > { %v758_v45 = vpop.f32.mrb[26].mxu1 }
 0x232   : > { %v1098_v46 = vpop.f32.mrb[26].mxu0  ;;  %841 = vst [vmem:[#allocation2 + $0xe0] sm:$0xff] %v758_v45  ;;  %v760_v47 = vpop.f32.mrb[27].mxu1 }
 0x233   : > { %1182 = vst [vmem:[#allocation2 + $0x130] sm:$0xff] %v1098_v46  ;;  %v1100_v48 = vpop.f32.mrb[27].mxu0  ;;  %842 = vst.msk [vmem:[#allocation2 + $0xe8] sm:$0xff] %vm476_vm3, %v760_v47 }
 0x234   : > { %1183 = vst.msk [vmem:[#allocation2 + $0x138] sm:$0xff] %vm476_vm3, %v1100_v48 }
 0x235   : > { %v764_v49 = vpop.f32.mrb[28].mxu1 }
 0x236   : > { %v1104_v50 = vpop.f32.mrb[28].mxu0  ;;  %843 = vst [vmem:[#allocation2 + $0x140] sm:$0xff] %v764_v49  ;;  %v766_v51 = vpop.f32.mrb[29].mxu1 }
 0x237   : > { %1184 = vst [vmem:[#allocation2 + $0x190] sm:$0xff] %v1104_v50  ;;  %v1106_v52 = vpop.f32.mrb[29].mxu0  ;;  %844 = vst.msk [vmem:[#allocation2 + $0x148] sm:$0xff] %vm476_vm3, %v766_v51 }
 0x238   : > { %1185 = vst.msk [vmem:[#allocation2 + $0x198] sm:$0xff] %vm476_vm3, %v1106_v52 }
 0x239   : > { %v770_v53 = vpop.f32.mrb[30].mxu1 }
 0x23a   : > { %v1110_v54 = vpop.f32.mrb[30].mxu0  ;;  %845 = vst [vmem:[#allocation2 + $0x150] sm:$0xff] %v770_v53  ;;  %v772_v55 = vpop.f32.mrb[31].mxu1 }
 0x23b   : > { %1186 = vst [vmem:[#allocation2 + $0x1a0] sm:$0xff] %v1110_v54  ;;  %v1112_v56 = vpop.f32.mrb[31].mxu0  ;;  %846 = vst.msk [vmem:[#allocation2 + $0x158] sm:$0xff] %vm476_vm3, %v772_v55 }
 0x23c   : > { %1187 = vst.msk [vmem:[#allocation2 + $0x1a8] sm:$0xff] %vm476_vm3, %v1112_v56 }
 0x23d   : > { %v776_v57 = vpop.f32.mrb[32].mxu1 }
 0x23e   : > { %v1116_v58 = vpop.f32.mrb[32].mxu0  ;;  %847 = vst [vmem:[#allocation2 + $0x160] sm:$0xff] %v776_v57  ;;  %v778_v59 = vpop.f32.mrb[33].mxu1 }
 0x23f   : > { %1188 = vst [vmem:[#allocation2 + $0x1b0] sm:$0xff] %v1116_v58  ;;  %v1118_v60 = vpop.f32.mrb[33].mxu0  ;;  %848 = vst.msk [vmem:[#allocation2 + $0x168] sm:$0xff] %vm476_vm3, %v778_v59 }
 0x240   : > { %1189 = vst.msk [vmem:[#allocation2 + $0x1b8] sm:$0xff] %vm476_vm3, %v1118_v60 }
 0x241   : > { %v782_v61 = vpop.f32.mrb[34].mxu1 }
 0x242   : > { %v1122_v62 = vpop.f32.mrb[34].mxu0  ;;  %849 = vst [vmem:[#allocation2 + $0x170] sm:$0xff] %v782_v61  ;;  %v784_v63 = vpop.f32.mrb[35].mxu1 }
 0x243   : > { %1190 = vst [vmem:[#allocation2 + $0x1c0] sm:$0xff] %v1122_v62  ;;  %v1124_v0 = vpop.f32.mrb[35].mxu0  ;;  %850 = vst.msk [vmem:[#allocation2 + $0x178] sm:$0xff] %vm476_vm3, %v784_v63 }
 0x244   : > { %1191 = vst.msk [vmem:[#allocation2 + $0x1c8] sm:$0xff] %vm476_vm3, %v1124_v0 }
 0x245   : > { %v788_v1 = vpop.f32.mrb[36].mxu1 }
 0x246   : > { %v1128_v3 = vpop.f32.mrb[36].mxu0  ;;  %851 = vst [vmem:[#allocation2 + $0x180] sm:$0xff] %v788_v1  ;;  %v790_v4 = vpop.f32.mrb[37].mxu1 }
 0x247   : > { %1192 = vst [vmem:[#allocation2 + $0x1d0] sm:$0xff] %v1128_v3  ;;  %v1130_v5 = vpop.f32.mrb[37].mxu0  ;;  %852 = vst.msk [vmem:[#allocation2 + $0x188] sm:$0xff] %vm476_vm3, %v790_v4 }
 0x248   : > { %1193 = vst.msk [vmem:[#allocation2 + $0x1d8] sm:$0xff] %vm476_vm3, %v1130_v5 }
 0x249   : > { %v794_v6 = vpop.f32.mrb[38].mxu1 }
 0x24a   : > { %v1134_v7 = vpop.f32.mrb[38].mxu0  ;;  %853 = vst [vmem:[#allocation2 + $0x1e0] sm:$0xff] %v794_v6  ;;  %v796_v8 = vpop.f32.mrb[39].mxu1 }
 0x24b   : > { %1194 = vst [vmem:[#allocation2 + $0x230] sm:$0xff] %v1134_v7  ;;  %v1136_v9 = vpop.f32.mrb[39].mxu0  ;;  %854 = vst.msk [vmem:[#allocation2 + $0x1e8] sm:$0xff] %vm476_vm3, %v796_v8 }
 0x24c   : > { %1195 = vst.msk [vmem:[#allocation2 + $0x238] sm:$0xff] %vm476_vm3, %v1136_v9 }
 0x24d   : > { %v800_v10 = vpop.f32.mrb[40].mxu1 }
 0x24e   : > { %v1140_v11 = vpop.f32.mrb[40].mxu0  ;;  %855 = vst [vmem:[#allocation2 + $0x1f0] sm:$0xff] %v800_v10  ;;  %v802_v12 = vpop.f32.mrb[41].mxu1 }
 0x24f   : > { %1196 = vst [vmem:[#allocation2 + $0x240] sm:$0xff] %v1140_v11  ;;  %v1142_v13 = vpop.f32.mrb[41].mxu0  ;;  %856 = vst.msk [vmem:[#allocation2 + $0x1f8] sm:$0xff] %vm476_vm3, %v802_v12 }
 0x250   : > { %1197 = vst.msk [vmem:[#allocation2 + $0x248] sm:$0xff] %vm476_vm3, %v1142_v13 }
 0x251   : > { %v806_v14 = vpop.f32.mrb[42].mxu1 }
 0x252   : > { %v1146_v2 = vpop.f32.mrb[42].mxu0  ;;  %857 = vst [vmem:[#allocation2 + $0x200] sm:$0xff] %v806_v14  ;;  %v808_v15 = vpop.f32.mrb[43].mxu1 }
 0x253   : > { %1198 = vst [vmem:[#allocation2 + $0x250] sm:$0xff] %v1146_v2  ;;  %v1148_v16 = vpop.f32.mrb[43].mxu0  ;;  %858 = vst.msk [vmem:[#allocation2 + $0x208] sm:$0xff] %vm476_vm3, %v808_v15 }
 0x254   : > { %1199 = vst.msk [vmem:[#allocation2 + $0x258] sm:$0xff] %vm476_vm3, %v1148_v16 }
 0x255   : > { %v812_v17 = vpop.f32.mrb[44].mxu1 }
 0x256   : > { %v1152_v18 = vpop.f32.mrb[44].mxu0  ;;  %859 = vst [vmem:[#allocation2 + $0x210] sm:$0xff] %v812_v17  ;;  %v814_v19 = vpop.f32.mrb[45].mxu1 }
 0x257   : > { %1200 = vst [vmem:[#allocation2 + $0x260] sm:$0xff] %v1152_v18  ;;  %v1154_v20 = vpop.f32.mrb[45].mxu0  ;;  %860 = vst.msk [vmem:[#allocation2 + $0x218] sm:$0xff] %vm476_vm3, %v814_v19 }
 0x258   : > { %1201 = vst.msk [vmem:[#allocation2 + $0x268] sm:$0xff] %vm476_vm3, %v1154_v20 }
 0x259   : > { %v818_v21 = vpop.f32.mrb[46].mxu1 }
 0x25a   : > { %v1158_v22 = vpop.f32.mrb[46].mxu0  ;;  %861 = vst [vmem:[#allocation2 + $0x220] sm:$0xff] %v818_v21  ;;  %v820_v23 = vpop.f32.mrb[47].mxu1 }
 0x25b   : > { %1202 = vst [vmem:[#allocation2 + $0x270] sm:$0xff] %v1158_v22  ;;  %v1160_v24 = vpop.f32.mrb[47].mxu0  ;;  %862 = vst.msk [vmem:[#allocation2 + $0x228] sm:$0xff] %vm476_vm3, %v820_v23 }
 0x25c   : > { %1203 = vst.msk [vmem:[#allocation2 + $0x278] sm:$0xff] %vm476_vm3, %v1160_v24 }
 0x25d PF: > { %s2549_s9 = smul.u32 160, %s4604_s20  ;;  %v1227_v25 = vld [vmem:[%s4862_s3] sm:$0xff]  ;;  %v1237_v26 = vld [vmem:[%s4862_s3 + $0x50] sm:$0xff]  ;;  %v1228_v27 = vld [vmem:[%s4862_s3 + $0x8] sm:$0xff]  ;;  %p2543_p13 = scmp.ne.s32.totalorder %s4604_s20, 3 }
 0x25e   : > { %v1238_v28 = vld [vmem:[%s4862_s3 + $0x58] sm:$0xff]  ;;  %v1229_v29 = vld [vmem:[%s4862_s3 + $0x10] sm:$0xff]  ;;  %v1239_v30 = vld [vmem:[%s4862_s3 + $0x60] sm:$0xff] }
 0x25f   : > { %s5125_s10 = scalar_lea.vmem [#allocation2], %s2549_s9  ;;  %v1230_v44 = vld [vmem:[%s4862_s3 + $0x18] sm:$0xff]  ;;  %v1240_v58 = vld [vmem:[%s4862_s3 + $0x68] sm:$0xff]  ;;  %v1231_v63 = vld [vmem:[%s4862_s3 + $0x20] sm:$0xff] }
 0x263   : > { %v1207_v31 = vld [vmem:[%s5125_s10] sm:$0xff]  ;;  %v1217_v32 = vld [vmem:[%s5125_s10 + $0x50] sm:$0xff]  ;;  %v1208_v33 = vld [vmem:[%s5125_s10 + $0x8] sm:$0xff] }
 0x264   : > { %v1247_v34 = vsub.f32 %v1207_v31, %v1227_v25  ;;  %v1257_v35 = vsub.f32 %v1217_v32, %v1237_v26  ;;  %v1218_v36 = vld [vmem:[%s5125_s10 + $0x58] sm:$0xff]  ;;  %v1248_v37 = vsub.f32 %v1208_v33, %v1228_v27  ;;  %v1209_v38 = vld [vmem:[%s5125_s10 + $0x10] sm:$0xff]  ;;  %v1219_v39 = vld [vmem:[%s5125_s10 + $0x60] sm:$0xff] }
 0x265   : > { %v1258_v40 = vsub.f32 %v1218_v36, %v1238_v28  ;;  %v1249_v41 = vsub.f32 %v1209_v38, %v1229_v29  ;;  %v1259_v42 = vsub.f32 %v1219_v39, %v1239_v30  ;;  %v1210_v43 = vld [vmem:[%s5125_s10 + $0x18] sm:$0xff]  ;;  %v1220_v57 = vld [vmem:[%s5125_s10 + $0x68] sm:$0xff]  ;;  %v1211_v62 = vld [vmem:[%s5125_s10 + $0x20] sm:$0xff] }
 0x266   : > { %v1267_v45 = vmul.f32 %v1247_v34, %v1247_v34  ;;  %v1277_v46 = vmul.f32 %v1257_v35, %v1257_v35  ;;  %v1268_v47 = vmul.f32 %v1248_v37, %v1248_v37  ;;  %v1250_v54 = vsub.f32 %v1210_v43, %v1230_v44  ;;  %v1221_v33 = vld [vmem:[%s5125_s10 + $0x70] sm:$0xff]  ;;  %v1241_v34 = vld [vmem:[%s4862_s3 + $0x70] sm:$0xff]  ;;  %v1222_v37 = vld [vmem:[%s5125_s10 + $0x78] sm:$0xff] }
 0x267   : > { %v1278_v48 = vmul.f32 %v1258_v40, %v1258_v40  ;;  %v1269_v49 = vmul.f32 %v1249_v41, %v1249_v41  ;;  %v1279_v50 = vmul.f32 %v1259_v42, %v1259_v42  ;;  %v1260_v61 = vsub.f32 %v1220_v57, %v1240_v58  ;;  %v1212_v35 = vld [vmem:[%s5125_s10 + $0x28] sm:$0xff]  ;;  %v1232_v38 = vld [vmem:[%s4862_s3 + $0x28] sm:$0xff]  ;;  %v1213_v42 = vld [vmem:[%s5125_s10 + $0x30] sm:$0xff] }
 0x268   : > { %v1287_v51 = vadd.f32 1e-06, %v1267_v45  ;;  %v1297_v52 = vadd.f32 1e-06, %v1277_v46  ;;  %v1288_v53 = vadd.f32 1e-06, %v1268_v47  ;;  %v1270_v60 = vmul.f32 %v1250_v54, %v1250_v54 }
 0x269   : > { %v5135_v55 = vadd.f32 1e-06, %v1278_v48  ;;  %v5137_v56 = vadd.f32 1e-06, %v1269_v49  ;;  %v5141_v59 = vadd.f32 1e-06, %v1279_v50  ;;  %v1251_v1 = vsub.f32 %v1211_v62, %v1231_v63 }
 0x26a   : > { %4204 = vrsqrt.f32 %v1287_v51  ;;  %v5148_v0 = vadd.f32 1e-06, %v1270_v60  ;;  %v1280_v3 = vmul.f32 %v1260_v61, %v1260_v61  ;;  %vm1309_vm4 = vcmp.eq.f32.partialorder %v1287_v51, inf  ;;  %v1242_v39 = vld [vmem:[%s4862_s3 + $0x78] sm:$0xff]  ;;  %v1223_v43 = vld [vmem:[%s5125_s10 + $0x80] sm:$0xff]  ;;  %v1243_v48 = vld [vmem:[%s4862_s3 + $0x80] sm:$0xff] }
 0x26b   : > { %4206 = vrsqrt.f32 %v1297_v52  ;;  %vm1311_vm5 = vcmp.eq.f32.partialorder %v1287_v51, 0.0  ;;  %v1312_v5 = vand.u32 2147483648, %v1287_v51  ;;  %v1271_v6 = vmul.f32 %v1251_v1, %v1251_v1  ;;  %v1233_v44 = vld [vmem:[%s4862_s3 + $0x30] sm:$0xff] }
 0x26c   : > { %4208 = vrsqrt.f32 %v1288_v53  ;;  %vm1379_vm6 = vcmp.eq.f32.partialorder %v1297_v52, inf  ;;  %v1382_v9 = vand.u32 2147483648, %v1297_v52  ;;  %v5151_v10 = vadd.f32 1e-06, %v1280_v3 }
 0x26d   : > { %4210 = vrsqrt.f32 %v5135_v55  ;;  %vm1381_vm7 = vcmp.eq.f32.partialorder %v1297_v52, 0.0  ;;  %vm1316_vm8 = vcmp.eq.f32.partialorder %v1288_v53, inf  ;;  %v5153_v13 = vadd.f32 1e-06, %v1271_v6 }
 0x26e   : > { %4212 = vrsqrt.f32 %v5137_v56  ;;  %vm1318_vm9 = vcmp.eq.f32.partialorder %v1288_v53, 0.0  ;;  %v1319_v16 = vand.u32 2147483648, %v1288_v53  ;;  %vm1386_vm10 = vcmp.eq.f32.partialorder %v5135_v55, inf }
 0x26f   : > { %4214 = vrsqrt.f32 %v5141_v59  ;;  %v1389_v26 = vand.u32 2147483648, %v5135_v55  ;;  %vm1388_vm11 = vcmp.eq.f32.partialorder %v5135_v55, 0.0  ;;  %vm1323_vm12 = vcmp.eq.f32.partialorder %v5137_v56, inf }
 0x270   : > { %4216 = vrsqrt.f32 %v5148_v0  ;;  %vm1393_vm13 = vcmp.eq.f32.partialorder %v5141_v59, inf  ;;  %vm1325_vm14 = vcmp.eq.f32.partialorder %v5137_v56, 0.0  ;;  %v1326_v46 = vand.u32 2147483648, %v5137_v56 }
 0x271   : > { %4218 = vrsqrt.f32 %v5151_v10  ;;  %vm1395_vm15 = vcmp.eq.f32.partialorder %v5141_v59, 0.0  ;;  %v1396_v47 = vand.u32 2147483648, %v5141_v59  ;;  %vm1330_vm0 = vcmp.eq.f32.partialorder %v5148_v0, inf }
 0x272   : > { %4220 = vrsqrt.f32 %v5153_v13  ;;  %v1261_v54 = vsub.f32 %v1221_v33, %v1241_v34  ;;  %v1262_v57 = vsub.f32 %v1222_v37, %v1242_v39  ;;  %v1253_v58 = vsub.f32 %v1213_v42, %v1233_v44 }
 0x273   : > { %v1263_v60 = vsub.f32 %v1223_v43, %v1243_v48  ;;  %v1333_v1 = vand.u32 2147483648, %v5148_v0  ;;  %vm1332_vm1 = vcmp.eq.f32.partialorder %v5148_v0, 0.0  ;;  %vm1400_vm2 = vcmp.eq.f32.partialorder %v5151_v10, inf }
 0x274   : > { %v4205_v4 = vpop.eup %4204  ;;  %vm1402_vm3 = vcmp.eq.f32.partialorder %v5151_v10, 0.0 }
 0x275   : > { %v4207_v7 = vpop.eup %4206  ;;  %v1308_v8 = vmul.f32 %v4205_v4, %v1287_v51 }
 0x276   : > { %v4209_v11 = vpop.eup %4208  ;;  %v1378_v12 = vmul.f32 %v4207_v7, %v1297_v52 }
 0x277   : > { %v4211_v14 = vpop.eup %4210  ;;  %v1310_v2 = vsel %vm1309_vm4, %v1287_v51, %v1308_v8  ;;  %v1315_v15 = vmul.f32 %v4209_v11, %v1288_v53  ;;  %v1282_v11 = vmul.f32 %v1262_v57, %v1262_v57  ;;  %vm1337_vm4 = vcmp.eq.f32.partialorder %v5153_v13, inf }
 0x278   : > { %v4213_v17 = vpop.eup %4212  ;;  %v1313_v18 = vsel %vm1311_vm5, %v1312_v5, %v1310_v2  ;;  %v1380_v19 = vsel %vm1379_vm6, %v1297_v52, %v1378_v12  ;;  %v1385_v20 = vmul.f32 %v4211_v14, %v5135_v55  ;;  %vm1339_vm5 = vcmp.eq.f32.partialorder %v5153_v13, 0.0 }
 0x279   : > { %v4215_v21 = vpop.eup %4214  ;;  %v1383_v22 = vsel %vm1381_vm7, %v1382_v9, %v1380_v19  ;;  %v5158_v23 = vadd.f32 0.01, %v1313_v18  ;;  %v1317_v24 = vsel %vm1316_vm8, %v1288_v53, %v1315_v15  ;;  %v1322_v31 = vmul.f32 %v4213_v17, %v5137_v56  ;;  %v1214_v19 = vld [vmem:[%s5125_s10 + $0x38] sm:$0xff] }
 0x27a   : > { %v5161_v25 = vadd.f32 0.01, %v1383_v22  ;;  %v1320_v28 = vsel %vm1318_vm9, %v1319_v16, %v1317_v24  ;;  %v1387_v29 = vsel %vm1386_vm10, %v5135_v55, %v1385_v20  ;;  %v1392_v32 = vmul.f32 %v4215_v21, %v5141_v59  ;;  %v4217_v36 = vpop.eup %4216  ;;  %v1234_v20 = vld [vmem:[%s4862_s3 + $0x38] sm:$0xff] }
 0x27b   : > { %v2590_v27 = vand.u32 2147483647, %v5158_v23  ;;  %v1390_v40 = vsel %vm1388_vm11, %v1389_v26, %v1387_v29  ;;  %v5184_v41 = vadd.f32 0.01, %v1320_v28  ;;  %v1324_v50 = vsel %vm1323_vm12, %v5137_v56, %v1322_v31  ;;  %v4219_v61 = vpop.eup %4218 }
 0x27c   : > { %v2850_v30 = vand.u32 2147483647, %v5161_v25  ;;  %v5190_v45 = vadd.f32 0.01, %v1390_v40  ;;  %v1394_v51 = vsel %vm1393_vm13, %v5141_v59, %v1392_v32  ;;  %v1329_v52 = vmul.f32 %v4217_v36, %v5148_v0  ;;  %v4221_v3 = vpop.eup %4220 }
 0x27d   : > { %4222 = vlog2.f32 %v2590_v27  ;;  %v2616_v49 = vand.u32 2147483647, %v5184_v41  ;;  %v1252_v55 = vsub.f32 %v1212_v35, %v1232_v38  ;;  %v1327_v62 = vsel %vm1325_vm14, %v1326_v46, %v1324_v50 }
 0x27e   : > { %4224 = vlog2.f32 %v2850_v30  ;;  %v2876_v53 = vand.u32 2147483647, %v5190_v45  ;;  %v1397_v63 = vsel %vm1395_vm15, %v1396_v47, %v1394_v51  ;;  %v5215_v4 = vadd.f32 0.01, %v1327_v62 }
 0x27f   : > { %4226 = vlog2.f32 %v2616_v49  ;;  %v5217_v5 = vadd.f32 0.01, %v1397_v63  ;;  %v1331_v6 = vsel %vm1330_vm0, %v5148_v0, %v1329_v52  ;;  %v1281_v56 = vmul.f32 %v1261_v54, %v1261_v54 }
 0x280   : > { %4228 = vlog2.f32 %v2876_v53  ;;  %v1272_v7 = vmul.f32 %v1252_v55, %v1252_v55  ;;  %v2642_v59 = vand.u32 2147483647, %v5215_v4  ;;  %v1399_v8 = vmul.f32 %v4219_v61, %v5151_v10 }
 0x281   : > { %v1403_v9 = vand.u32 2147483648, %v5151_v10  ;;  %v2902_v14 = vand.u32 2147483647, %v5217_v5  ;;  %v1334_v2 = vsel %vm1332_vm1, %v1333_v1, %v1331_v6  ;;  %v1336_v0 = vmul.f32 %v4221_v3, %v5153_v13 }
 0x282   : > { %v1273_v15 = vmul.f32 %v1253_v58, %v1253_v58  ;;  %4230 = vlog2.f32 %v2642_v59  ;;  %v5231_v18 = vmul.f32 %v1263_v60, %v1263_v60  ;;  %v5237_v22 = vadd.f32 1e-06, %v1281_v56 }
 0x283   : > { %4232 = vlog2.f32 %v2902_v14  ;;  %v5239_v24 = vadd.f32 1e-06, %v1272_v7  ;;  %v1401_v26 = vsel %vm1400_vm2, %v5151_v10, %v1399_v8  ;;  %v5244_v28 = vadd.f32 0.01, %v1334_v2 }
 0x284   : > { %v1404_v29 = vsel %vm1402_vm3, %v1403_v9, %v1401_v26  ;;  %v1338_v31 = vsel %vm1337_vm4, %v5153_v13, %v1336_v0  ;;  %v1340_v32 = vand.u32 2147483648, %v5153_v13  ;;  %v5254_v36 = vadd.f32 1e-06, %v1282_v11 }
 0x285   : > { %v5251_v34 = vadd.f32 0.01, %v1404_v29  ;;  %v2668_v35 = vand.u32 2147483647, %v5244_v28  ;;  %v5256_v37 = vsub.f32 %v1214_v19, %v1234_v20  ;;  %vm2594_vm6 = vcmp.lt.f32.partialorder %v5158_v23, 0 }
 0x286   : > { %vm2595_vm7 = vcmp.eq.f32.partialorder %v5158_v23, 0  ;;  %v5260_v39 = vadd.f32 1e-06, %v1273_v15  ;;  %vm2596_vm8 = vcmp.eq.f32.partialorder %v5158_v23, 1065353216  ;;  %v1341_v43 = vsel %vm1339_vm5, %v1340_v32, %v1338_v31 }
 0x287   : > { %v4223_v12 = vpop.eup %4222  ;;  %v2928_v42 = vand.u32 2147483647, %v5251_v34  ;;  %vm2607_vm9 = vcmp.ne.f32.partialorder %v5158_v23, %v5158_v23  ;;  %vm2854_vm10 = vcmp.lt.f32.partialorder %v5161_v25, 0  ;;  %vm2855_vm11 = vcmp.eq.f32.partialorder %v5161_v25, 0 }
 0x288   : > { %v4225_v16 = vpop.eup %4224  ;;  %v2592_v17 = vmul.f32 0.4, %v4223_v12  ;;  %vm5274_vm12 = vcmp.eq.f32.partialorder %v2590_v27, 2139095040  ;;  %vm2856_vm13 = vcmp.eq.f32.partialorder %v5161_v25, 1065353216  ;;  %vm2867_vm14 = vcmp.ne.f32.partialorder %v5161_v25, %v5161_v25 }
 0x289   : > { %v2852_v21 = vmul.f32 0.4, %v4225_v16  ;;  %v4227_v33 = vpop.eup %4226  ;;  %vm5283_vm15 = vcmp.eq.f32.partialorder %v2850_v30, 2139095040  ;;  %v5290_v27 = vadd.f32 0.01, %v1341_v43  ;;  %vm2621_vm1 = vcmp.eq.f32.partialorder %v5184_v41, 0 }
 0x28a   : > { %4234 = vpow2.f32 %v2592_v17  ;;  %v4229_v38 = vpop.eup %4228  ;;  %v2618_v10 = vmul.f32 0.4, %v4227_v33  ;;  %vm5300_vm5 = vcmp.eq.f32.partialorder %v2616_v49, 2139095040  ;;  %vm5314_vm4 = vcmp.eq.f32.partialorder %v2876_v53, 2139095040 }
 0x28b   : > { %4236 = vpow2.f32 %v2852_v21  ;;  %v2878_v40 = vmul.f32 0.4, %v4229_v38  ;;  %v2694_v50 = vand.u32 2147483647, %v5290_v27  ;;  %vm2647_vm2 = vcmp.eq.f32.partialorder %v5215_v4, 0 }
 0x28c   : > { %4238 = vlog2.f32 %v2668_v35  ;;  %v4231_v46 = vpop.eup %4230  ;;  %vm7521_vm3 = vcmask 261120   ;;  %vm5331_vm0 = vcmp.eq.f32.partialorder %v2642_v59, 2139095040  ;;  %v5353_v6 = vadd.f32 1e-06, %v5231_v18 }
 0x28d   : > { %4240 = vpow2.f32 %v2618_v10  ;;  %v4233_v30 = vpop.eup %4232  ;;  %v2644_v48 = vmul.f32 0.4, %v4231_v46  ;;  %v1410_v12 = vand.u32 2147483648, %v5237_v22  ;;  %v1347_v44 = vand.u32 2147483648, %v5239_v24 }
 0x28e   : > { %4242 = vpow2.f32 %v2878_v40  ;;  %v2904_v52 = vmul.f32 0.4, %v4233_v30  ;;  %v1274_v21 = vmul.f32 %v5256_v37, %v5256_v37 }
 0x28f   : > { %4244 = vlog2.f32 %v2928_v42 }
 0x290   : > { %4246 = vrsqrt.f32 %v5237_v22 }
 0x291   : > { %4248 = vrsqrt.f32 %v5239_v24 }
 0x292   : > { %4250 = vpow2.f32 %v2644_v48 }
 0x293   : > { %4252 = vpow2.f32 %v2904_v52 }
 0x294   : > { %v4235_v51 = vpop.eup %4234  ;;  %4254 = vlog2.f32 %v2694_v50 }
 0x295   : > { %v4237_v54 = vpop.eup %4236  ;;  %v2600_v49 = vsel %vm2594_vm6, 2143289344, %v4235_v51  ;;  %vm2906_vm6 = vcmp.lt.f32.partialorder %v5217_v5, 0  ;;  %4256 = vrsqrt.f32 %v5254_v36 }
 0x296   : > { %v2601_v57 = vsel %vm2595_vm7, 0, %v2600_v49  ;;  %v2860_v58 = vsel %vm2854_vm10, 2143289344, %v4237_v54  ;;  %v4239_v62 = vpop.eup %4238  ;;  %vm7536_vm10 = vcmp.lt.f32.partialorder %v5184_v41, 0  ;;  %vm1409_vm7 = vcmp.eq.f32.partialorder %v5237_v22, 0.0 }
 0x297   : > { %v2606_v53 = vsel %vm5274_vm12, 2139095040, %v2601_v57  ;;  %v2861_v60 = vsel %vm2855_vm11, 0, %v2860_v58  ;;  %vm5347_vm11 = vcmp.eq.f32.partialorder %v2902_v14, 2139095040  ;;  %vm1407_vm12 = vcmp.eq.f32.partialorder %v5237_v22, inf  ;;  %v4241_v56 = vpop.eup %4240 }
 0x298   : > { %v2610_v63 = vsel %vm2607_vm9, 2143289344, %v2606_v53  ;;  %v2866_v1 = vsel %vm5283_vm15, 2139095040, %v2861_v60  ;;  %vm2648_vm9 = vcmp.eq.f32.partialorder %v5215_v4, 1065353216  ;;  %v2670_v8 = vmul.f32 0.4, %v4239_v62  ;;  %v4243_v9 = vpop.eup %4242 }
 0x299   : > { %v2611_v7 = vsel %vm2596_vm8, 1065353216, %v2610_v63  ;;  %v2870_v59 = vsel %vm2867_vm14, 2143289344, %v2866_v1  ;;  %v2626_v23 = vsel %vm7536_vm10, 2143289344, %v4241_v56  ;;  %v4245_v14 = vpop.eup %4244  ;;  %vm7537_vm14 = vcmp.lt.f32.partialorder %v5190_v45, 0  ;;  %v1224_v63 = vld [vmem:[%s5125_s10 + $0x88] sm:$0xff]  ;;  %v1244_v1 = vld [vmem:[%s4862_s3 + $0x88] sm:$0xff] }
 0x29a   : > { %v2871_v11 = vsel %vm2856_vm13, 1065353216, %v2870_v59  ;;  %v2627_v0 = vsel %vm2621_vm1, 0, %v2626_v23  ;;  %v2886_v15 = vsel %vm7537_vm14, 2143289344, %v4243_v9  ;;  %4258 = vpow2.f32 %v2670_v8  ;;  %v4247_v25 = vpop.eup %4246 }
 0x29b   : > { %v1487_v2 = vadd.f32 %v2871_v11, %v2611_v7  ;;  %v2632_v16 = vsel %vm5300_vm5, 2139095040, %v2627_v0  ;;  %vm7538_vm10 = vcmp.eq.f32.partialorder %v5190_v45, 0  ;;  %v2930_v18 = vmul.f32 0.4, %v4245_v14  ;;  %v4249_v29 = vpop.eup %4248 }
 0x29c   : > { %v2887_v17 = vsel %vm7538_vm10, 0, %v2886_v15  ;;  %4260 = vrsqrt.f32 %v5260_v39  ;;  %vm7539_vm1 = vcmp.ne.f32.partialorder %v5184_v41, %v5184_v41  ;;  %vm5389_vm14 = vcmp.eq.f32.partialorder %v2668_v35, 2139095040  ;;  %v4251_v33 = vpop.eup %4250 }
 0x29d   : > { %1497 = vst [vmem:[#allocation3] sm:$0xff] %v1487_v2  ;;  %v2636_v19 = vsel %vm7539_vm1, 2143289344, %v2632_v16  ;;  %v2892_v20 = vsel %vm5314_vm4, 2139095040, %v2887_v17  ;;  %v1406_v26 = vmul.f32 %v4247_v25, %v5237_v22  ;;  %4262 = vrsqrt.f32 %v5353_v6  ;;  %v4253_v10 = vpop.eup %4252 }
 0x29e   : > { %vm7542_vm5 = vcmp.eq.f32.partialorder %v5184_v41, 1065353216  ;;  %vm7543_vm10 = vcmp.ne.f32.partialorder %v5190_v45, %v5190_v45  ;;  %vm2685_vm4 = vcmp.ne.f32.partialorder %v5244_v28, %v5244_v28  ;;  %4264 = vpow2.f32 %v2930_v18  ;;  %v4255_v13 = vpop.eup %4254 }
 0x29f   : > { %v2637_v31 = vsel %vm7542_vm5, 1065353216, %v2636_v19  ;;  %v2896_v32 = vsel %vm7543_vm10, 2143289344, %v2892_v20  ;;  %vm1344_vm8 = vcmp.eq.f32.partialorder %v5239_v24, inf  ;;  %vm7544_vm13 = vcmp.eq.f32.partialorder %v5190_v45, 1065353216  ;;  %v4257_v54 = vpop.eup %4256 }
 0x2a0   : > { %v2897_v35 = vsel %vm7544_vm13, 1065353216, %v2896_v32  ;;  %vm2933_vm15 = vcmp.eq.f32.partialorder %v5251_v34, 0  ;;  %v1408_v41 = vsel %vm1407_vm12, %v5237_v22, %v1406_v26  ;;  %v1343_v38 = vmul.f32 %v4249_v29, %v5239_v24 }
 0x2a1   : > { %vm1346_vm5 = vcmp.eq.f32.partialorder %v5239_v24, 0.0  ;;  %v1488_v40 = vadd.f32 %v2897_v35, %v2637_v31  ;;  %vm7545_vm10 = vcmp.lt.f32.partialorder %v5215_v4, 0  ;;  %vm2674_vm1 = vcmp.eq.f32.partialorder %v5244_v28, 1065353216 }
 0x2a2   : > { %v2652_v43 = vsel %vm7545_vm10, 2143289344, %v4251_v33  ;;  %v1411_v45 = vsel %vm1409_vm7, %v1410_v12, %v1408_v41  ;;  %v2912_v30 = vsel %vm2906_vm6, 2143289344, %v4253_v10  ;;  %v1345_v48 = vsel %vm1344_vm8, %v5239_v24, %v1343_v38 }
 0x2a3   : > { %v2653_v46 = vsel %vm2647_vm2, 0, %v2652_v43  ;;  %v5422_v47 = vadd.f32 0.01, %v1411_v45  ;;  %1499 = vst.msk [vmem:[#allocation3 + $0x8] sm:$0xff] %vm7521_vm3, %v1488_v40  ;;  %vm7546_vm7 = vcmp.eq.f32.partialorder %v5217_v5, 0  ;;  %vm2934_vm12 = vcmp.eq.f32.partialorder %v5251_v34, 1065353216 }
 0x2a4   : > { %v2658_v22 = vsel %vm5331_vm0, 2139095040, %v2653_v46  ;;  %v2913_v51 = vsel %vm7546_vm7, 0, %v2912_v30  ;;  %v2696_v52 = vmul.f32 0.4, %v4255_v13  ;;  %vm7547_vm2 = vcmp.ne.f32.partialorder %v5215_v4, %v5215_v4  ;;  %v4259_v62 = vpop.eup %4258 }
 0x2a5   : > { %v2662_v49 = vsel %vm7547_vm2, 2143289344, %v2658_v22  ;;  %v2918_v55 = vsel %vm5347_vm11, 2139095040, %v2913_v51  ;;  %vm5440_vm6 = vcmp.eq.f32.partialorder %v2928_v42, 2139095040  ;;  %v2954_v58 = vand.u32 2147483647, %v5422_v47  ;;  %v1215_v51 = vld [vmem:[%s5125_s10 + $0x40] sm:$0xff] }
 0x2a6   : > { %v2663_v53 = vsel %vm2648_vm9, 1065353216, %v2662_v49  ;;  %vm7550_vm0 = vcmp.ne.f32.partialorder %v5217_v5, %v5217_v5  ;;  %4266 = vpow2.f32 %v2696_v52  ;;  %v1348_v61 = vsel %vm1346_vm5, %v1347_v44, %v1345_v48  ;;  %v4261_v3 = vpop.eup %4260  ;;  %v1235_v52 = vld [vmem:[%s4862_s3 + $0x40] sm:$0xff]  ;;  %v1245_v49 = vld [vmem:[%s4862_s3 + $0x90] sm:$0xff] }
 0x2a7   : > { %v2922_v60 = vsel %vm7550_vm0, 2143289344, %v2918_v55  ;;  %vm7551_vm11 = vcmp.eq.f32.partialorder %v5217_v5, 1065353216  ;;  %4268 = vlog2.f32 %v2954_v58  ;;  %vm1414_vm8 = vcmp.eq.f32.partialorder %v5254_v36, inf  ;;  %v4263_v5 = vpop.eup %4262 }
 0x2a8   : > { %v2923_v42 = vsel %vm7551_vm11, 1065353216, %v2922_v60  ;;  %v1417_v4 = vand.u32 2147483648, %v5254_v36  ;;  %vm7552_vm9 = vcmp.lt.f32.partialorder %v5244_v28, 0  ;;  %v1413_v24 = vmul.f32 %v4257_v54, %v5254_v36  ;;  %v4265_v9 = vpop.eup %4264  ;;  %v1225_v54 = vld [vmem:[%s5125_s10 + $0x90] sm:$0xff] }
 0x2a9   : > { %v1489_v56 = vadd.f32 %v2923_v42, %v2663_v53  ;;  %v2678_v7 = vsel %vm7552_vm9, 2143289344, %v4259_v62  ;;  %vm1416_vm13 = vcmp.eq.f32.partialorder %v5254_v36, 0.0  ;;  %vm7553_vm5 = vcmp.eq.f32.partialorder %v5244_v28, 0  ;;  %v1236_v62 = vld [vmem:[%s4862_s3 + $0x48] sm:$0xff] }
 0x2aa   : > { %v2679_v59 = vsel %vm7553_vm5, 0, %v2678_v7  ;;  %vm2945_vm10 = vcmp.ne.f32.partialorder %v5251_v34, %v5251_v34  ;;  %v5468_v8 = vadd.f32 0.01, %v1348_v61  ;;  %vm1351_vm7 = vcmp.eq.f32.partialorder %v5260_v39, inf  ;;  %v1216_v61 = vld [vmem:[%s5125_s10 + $0x48] sm:$0xff] }
 0x2ab   : > { %1500 = vst [vmem:[#allocation3 + $0x10] sm:$0xff] %v1489_v56  ;;  %v2684_v11 = vsel %vm5389_vm14, 2139095040, %v2679_v59  ;;  %v1415_v23 = vsel %vm1414_vm8, %v5254_v36, %v1413_v24  ;;  %v1354_v12 = vand.u32 2147483648, %v5260_v39  ;;  %v1264_v14 = vsub.f32 %v1224_v63, %v1244_v1 }
 0x2ac   : > { %v2688_v2 = vsel %vm2685_vm4, 2143289344, %v2684_v11  ;;  %vm7554_vm2 = vcmp.lt.f32.partialorder %v5251_v34, 0  ;;  %v1418_v15 = vsel %vm1416_vm13, %v1417_v4, %v1415_v23  ;;  %v2720_v25 = vand.u32 2147483647, %v5468_v8  ;;  %v1226_v11 = vld [vmem:[%s5125_s10 + $0x98] sm:$0xff]  ;;  %v1246_v23 = vld [vmem:[%s4862_s3 + $0x98] sm:$0xff] }
 0x2ad   : > { %v2938_v0 = vsel %vm7554_vm2, 2143289344, %v4265_v9  ;;  %v5485_v17 = vadd.f32 0.01, %v1418_v15  ;;  %v1350_v36 = vmul.f32 %v4261_v3, %v5260_v39  ;;  %v1420_v18 = vmul.f32 %v4263_v5, %v5353_v6 }
 0x2ae   : > { %v2939_v16 = vsel %vm2933_vm15, 0, %v2938_v0  ;;  %v2689_v19 = vsel %vm2674_vm1, 1065353216, %v2688_v2  ;;  %4270 = vlog2.f32 %v2720_v25  ;;  %vm1421_vm15 = vcmp.eq.f32.partialorder %v5353_v6, inf }
 0x2af   : > { %v2944_v20 = vsel %vm5440_vm6, 2139095040, %v2939_v16  ;;  %v2980_v29 = vand.u32 2147483647, %v5485_v17  ;;  %v1424_v28 = vand.u32 2147483648, %v5353_v6  ;;  %vm1353_vm14 = vcmp.eq.f32.partialorder %v5260_v39, 0.0 }
 0x2b0   : > { %v2948_v26 = vsel %vm2945_vm10, 2143289344, %v2944_v20  ;;  %vm1423_vm4 = vcmp.eq.f32.partialorder %v5353_v6, 0.0  ;;  %v4267_v32 = vpop.eup %4266  ;;  %vm2698_vm1 = vcmp.lt.f32.partialorder %v5290_v27, 0  ;;  %v1352_v35 = vsel %vm1351_vm7, %v5260_v39, %v1350_v36 }
 0x2b1   : > { %v2949_v31 = vsel %vm2934_vm12, 1065353216, %v2948_v26  ;;  %4272 = vlog2.f32 %v2980_v29  ;;  %v4269_v37 = vpop.eup %4268  ;;  %v1422_v41 = vsel %vm1421_vm15, %v5353_v6, %v1420_v18  ;;  %v1284_v34 = vmul.f32 %v1264_v14, %v1264_v14 }
 0x2b2   : > { %v1490_v33 = vadd.f32 %v2949_v31, %v2689_v19  ;;  %v5514_v38 = vadd.f32 1e-06, %v1274_v21  ;;  %vm2699_vm12 = vcmp.eq.f32.partialorder %v5290_v27, 0  ;;  %v2956_v10 = vmul.f32 0.4, %v4269_v37 }
 0x2b3   : > { %v1355_v40 = vsel %vm1353_vm14, %v1354_v12, %v1352_v35  ;;  %v1425_v43 = vsel %vm1423_vm4, %v1424_v28, %v1422_v41  ;;  %v2704_v45 = vsel %vm2698_vm1, 2143289344, %v4267_v32  ;;  %v5524_v6 = vadd.f32 1e-06, %v1284_v34 }
 0x2b4   : > { %1501 = vst.msk [vmem:[#allocation3 + $0x18] sm:$0xff] %vm7521_vm3, %v1490_v33  ;;  %v5518_v44 = vadd.f32 0.01, %v1355_v40  ;;  %v5520_v13 = vadd.f32 0.01, %v1425_v43  ;;  %4274 = vrsqrt.f32 %v5514_v38  ;;  %vm5528_vm6 = vcmp.eq.f32.partialorder %v2694_v50, 2139095040 }
 0x2b5   : > { %4276 = vpow2.f32 %v2956_v10  ;;  %v2705_v30 = vsel %vm2699_vm12, 0, %v2704_v45  ;;  %vm2700_vm0 = vcmp.eq.f32.partialorder %v5290_v27, 1065353216  ;;  %vm2711_vm11 = vcmp.ne.f32.partialorder %v5290_v27, %v5290_v27 }
 0x2b6   : > { %v2746_v39 = vand.u32 2147483647, %v5518_v44  ;;  %v3006_v48 = vand.u32 2147483647, %v5520_v13  ;;  %vm2958_vm8 = vcmp.lt.f32.partialorder %v5422_v47, 0  ;;  %v2710_v55 = vsel %vm5528_vm6, 2139095040, %v2705_v30 }
 0x2b7   : > { %vm2959_vm9 = vcmp.eq.f32.partialorder %v5422_v47, 0  ;;  %vm2960_vm13 = vcmp.eq.f32.partialorder %v5422_v47, 1065353216  ;;  %vm5552_vm5 = vcmp.eq.f32.partialorder %v2954_v58, 2139095040  ;;  %vm2971_vm10 = vcmp.ne.f32.partialorder %v5422_v47, %v5422_v47 }
 0x2b8   : > { %v4271_v22 = vpop.eup %4270  ;;  %4278 = vlog2.f32 %v2746_v39  ;;  %v1255_v60 = vsub.f32 %v1215_v51, %v1235_v52  ;;  %vm2724_vm7 = vcmp.lt.f32.partialorder %v5468_v8, 0  ;;  %vm2725_vm2 = vcmp.eq.f32.partialorder %v5468_v8, 0 }
 0x2b9   : > { %v2722_v50 = vmul.f32 0.4, %v4271_v22  ;;  %4280 = vlog2.f32 %v3006_v48  ;;  %v1265_v4 = vsub.f32 %v1225_v54, %v1245_v49  ;;  %v2714_v58 = vsel %vm2711_vm11, 2143289344, %v2710_v55 }
 0x2ba   : > { %4282 = vrsqrt.f32 %v5524_v6  ;;  %vm5567_vm15 = vcmp.eq.f32.partialorder %v2720_v25, 2139095040  ;;  %vm1358_vm14 = vcmp.eq.f32.partialorder %v5514_v38, inf  ;;  %v1275_v1 = vmul.f32 %v1255_v60, %v1255_v60 }
 0x2bb   : > { %v4273_v57 = vpop.eup %4272  ;;  %4284 = vpow2.f32 %v2722_v50  ;;  %vm2737_vm4 = vcmp.ne.f32.partialorder %v5468_v8, %v5468_v8  ;;  %vm2984_vm1 = vcmp.lt.f32.partialorder %v5485_v17, 0  ;;  %v1361_v56 = vand.u32 2147483648, %v5514_v38 }
 0x2bc   : > { %v2982_v42 = vmul.f32 0.4, %v4273_v57  ;;  %v1285_v7 = vmul.f32 %v1265_v4, %v1265_v4  ;;  %v1256_v24 = vsub.f32 %v1216_v61, %v1236_v62  ;;  %vm1360_vm6 = vcmp.eq.f32.partialorder %v5514_v38, 0.0  ;;  %v1508_v4 = vld [vmem:[%s5125_s10] sm:$0xff] }
 0x2bd   : > { %v5579_v9 = vadd.f32 1e-06, %v1275_v1  ;;  %v2715_v12 = vsel %vm2700_vm0, 1065353216, %v2714_v58  ;;  %vm2726_vm11 = vcmp.eq.f32.partialorder %v5468_v8, 1065353216  ;;  %vm5590_vm3 = vcmp.eq.f32.partialorder %v2980_v29, 2139095040  ;;  %v2503_v58 = vld [vmem:[%s4862_s3 + $0xa0] sm:$0xff] }
 0x2be   : > { %v4275_v3 = vpop.eup %4274  ;;  %4286 = vpow2.f32 %v2982_v42  ;;  %v5594_v0 = vadd.f32 1e-06, %v1285_v7  ;;  %vm2997_vm12 = vcmp.ne.f32.partialorder %v5485_v17, %v5485_v17  ;;  %vm1428_vm0 = vcmp.eq.f32.partialorder %v5524_v6, inf }
 0x2bf   : > { %v4277_v5 = vpop.eup %4276  ;;  %v1357_v59 = vmul.f32 %v4275_v3, %v5514_v38  ;;  %4288 = vrsqrt.f32 %v5579_v9  ;;  %v1266_v18 = vsub.f32 %v1226_v11, %v1246_v23  ;;  %v1276_v19 = vmul.f32 %v1256_v24, %v1256_v24 }
 0x2c0   : > { %v2964_v14 = vsel %vm2958_vm8, 2143289344, %v4277_v5  ;;  %vm2986_vm8 = vcmp.eq.f32.partialorder %v5485_v17, 1065353216  ;;  %4290 = vrsqrt.f32 %v5594_v0  ;;  %v1431_v33 = vand.u32 2147483648, %v5524_v6 }
 0x2c1   : > { %v2965_v15 = vsel %vm2959_vm9, 0, %v2964_v14  ;;  %v1359_v27 = vsel %vm1358_vm14, %v5514_v38, %v1357_v59  ;;  %vm1430_vm9 = vcmp.eq.f32.partialorder %v5524_v6, 0.0  ;;  %v5626_v47 = vadd.f32 1e-06, %v1276_v19 }
 0x2c2   : > { %v4279_v25 = vpop.eup %4278  ;;  %v2970_v16 = vsel %vm5552_vm5, 2139095040, %v2965_v15  ;;  %v1362_v36 = vsel %vm1360_vm6, %v1361_v56, %v1359_v27  ;;  %vm2750_vm5 = vcmp.lt.f32.partialorder %v5518_v44, 0  ;;  %v1286_v43 = vmul.f32 %v1266_v18, %v1266_v18  ;;  %v2513_v56 = vld [vmem:[%s4862_s3 + $0xf0] sm:$0xff] }
 0x2c3   : > { %v4281_v20 = vpop.eup %4280  ;;  %v2974_v21 = vsel %vm2971_vm10, 2143289344, %v2970_v16  ;;  %v2748_v26 = vmul.f32 0.4, %v4279_v25  ;;  %v5613_v29 = vadd.f32 0.01, %v1362_v36  ;;  %vm2751_vm10 = vcmp.eq.f32.partialorder %v5518_v44, 0 }
 0x2c4   : > { %v4283_v28 = vpop.eup %4282  ;;  %v2975_v31 = vsel %vm2960_vm13, 1065353216, %v2974_v21  ;;  %v3008_v32 = vmul.f32 0.4, %v4281_v20  ;;  %vm5639_vm13 = vcmp.eq.f32.partialorder %v2746_v39, 2139095040  ;;  %vm3011_vm14 = vcmp.eq.f32.partialorder %v5520_v13, 0 }
 0x2c5   : > { %v4285_v37 = vpop.eup %4284  ;;  %v1491_v35 = vadd.f32 %v2975_v31, %v2715_v12  ;;  %4292 = vpow2.f32 %v2748_v26  ;;  %v1427_v41 = vmul.f32 %v4283_v28, %v5524_v6  ;;  %v2772_v34 = vand.u32 2147483647, %v5613_v29 }
 0x2c6   : > { %v2730_v38 = vsel %vm2724_vm7, 2143289344, %v4285_v37  ;;  %4294 = vpow2.f32 %v3008_v32  ;;  %vm2763_vm7 = vcmp.ne.f32.partialorder %v5518_v44, %v5518_v44  ;;  %vm7565_vm6 = vcmp.eq.f32.partialorder %v5485_v17, 0  ;;  %v1518_v17 = vld [vmem:[%s5125_s10 + $0x50] sm:$0xff]  ;;  %v1509_v32 = vld [vmem:[%s5125_s10 + $0x8] sm:$0xff] }
 0x2c7   : > { %1502 = vst [vmem:[#allocation3 + $0x20] sm:$0xff] %v1491_v35  ;;  %v2731_v10 = vsel %vm2725_vm2, 0, %v2730_v38  ;;  %v1429_v40 = vsel %vm1428_vm0, %v5524_v6, %v1427_v41  ;;  %4296 = vlog2.f32 %v2772_v34  ;;  %vm3010_vm2 = vcmp.lt.f32.partialorder %v5520_v13, 0  ;;  %v1519_v41 = vld [vmem:[%s5125_s10 + $0x58] sm:$0xff]  ;;  %v2514_v38 = vld [vmem:[%s4862_s3 + $0xf8] sm:$0xff] }
 0x2c8   : > { %v4287_v45 = vpop.eup %4286  ;;  %v2736_v46 = vsel %vm5567_vm15, 2139095040, %v2731_v10  ;;  %v1432_v22 = vsel %vm1430_vm9, %v1431_v33, %v1429_v40  ;;  %vm2752_vm15 = vcmp.eq.f32.partialorder %v5518_v44, 1065353216  ;;  %vm1365_vm0 = vcmp.eq.f32.partialorder %v5579_v9, inf  ;;  %v2504_v33 = vld [vmem:[%s4862_s3 + $0xa8] sm:$0xff] }
 0x2c9   : > { %v2740_v51 = vsel %vm2737_vm4, 2143289344, %v2736_v46  ;;  %v2990_v52 = vsel %vm2984_vm1, 2143289344, %v4287_v45  ;;  %v5655_v39 = vadd.f32 0.01, %v1432_v22  ;;  %v1368_v6 = vand.u32 2147483648, %v5579_v9  ;;  %v4289_v54 = vpop.eup %4288 }
 0x2ca   : > { %v2991_v50 = vsel %vm7565_vm6, 0, %v2990_v52  ;;  %4298 = vrsqrt.f32 %v5626_v47  ;;  %v2741_v49 = vsel %vm2726_vm11, 1065353216, %v2740_v51  ;;  %v5667_v53 = vadd.f32 1e-06, %v1286_v43  ;;  %v4291_v8 = vpop.eup %4290 }
 0x2cb   : > { %v2996_v55 = vsel %vm5590_vm3, 2139095040, %v2991_v50  ;;  %v3032_v57 = vand.u32 2147483647, %v5655_v39  ;;  %vm3012_vm4 = vcmp.eq.f32.partialorder %v5520_v13, 1065353216  ;;  %v1364_v61 = vmul.f32 %v4289_v54, %v5579_v9 }
 0x2cc   : > { %v3000_v60 = vsel %vm2997_vm12, 2143289344, %v2996_v55  ;;  %vm1367_vm1 = vcmp.eq.f32.partialorder %v5579_v9, 0.0  ;;  %vm1435_vm3 = vcmp.eq.f32.partialorder %v5594_v0, inf  ;;  %v1438_v42 = vand.u32 2147483648, %v5594_v0 }
 0x2cd   : > { %v3001_v62 = vsel %vm2986_vm8, 1065353216, %v3000_v60  ;;  %4300 = vlog2.f32 %v3032_v57  ;;  %v1366_v1 = vsel %vm1365_vm0, %v5579_v9, %v1364_v61  ;;  %v1434_v3 = vmul.f32 %v4291_v8, %v5594_v0 }
 0x2ce   : > { %v1492_v63 = vadd.f32 %v3001_v62, %v2741_v49  ;;  %vm1437_vm12 = vcmp.eq.f32.partialorder %v5594_v0, 0.0  ;;  %vm5692_vm11 = vcmp.eq.f32.partialorder %v3006_v48, 2139095040  ;;  %vm3023_vm8 = vcmp.ne.f32.partialorder %v5520_v13, %v5520_v13 }
 0x2cf   : > { %v4293_v7 = vpop.eup %4292  ;;  %v1369_v5 = vsel %vm1367_vm1, %v1368_v6, %v1366_v1  ;;  %4302 = vrsqrt.f32 %v5667_v53  ;;  %vm7568_vm9 = vcmask 261120   ;;  %v1436_v48 = vsel %vm1435_vm3, %v5594_v0, %v1434_v3 }
 0x2d0   : > { %v4295_v59 = vpop.eup %4294  ;;  %1503 = vst.msk [vmem:[#allocation3 + $0x28] sm:$0xff] %vm7568_vm9, %v1492_v63  ;;  %v2756_v11 = vsel %vm2750_vm5, 2143289344, %v4293_v7  ;;  %v5707_v23 = vadd.f32 0.01, %v1369_v5  ;;  %v1549_v12 = vsub.f32 %v1508_v4, %v2503_v58  ;;  %v1439_v15 = vsel %vm1437_vm12, %v1438_v42, %v1436_v48 }
 0x2d1   : > { %v4297_v14 = vpop.eup %4296  ;;  %v2757_v9 = vsel %vm2751_vm10, 0, %v2756_v11  ;;  %v3016_v2 = vsel %vm3010_vm2, 2143289344, %v4295_v59  ;;  %v1559_v27 = vsub.f32 %v1518_v17, %v2513_v56  ;;  %v5719_v18 = vadd.f32 0.01, %v1439_v15  ;;  %v1510_v11 = vld [vmem:[%s5125_s10 + $0x10] sm:$0xff] }
 0x2d2   : > { %v2762_v25 = vsel %vm5639_vm13, 2139095040, %v2757_v9  ;;  %v3017_v16 = vsel %vm3011_vm14, 0, %v3016_v2  ;;  %v2774_v36 = vmul.f32 0.4, %v4297_v14  ;;  %v2798_v20 = vand.u32 2147483647, %v5707_v23 }
 0x2d3   : > { %v2766_v19 = vsel %vm2763_vm7, 2143289344, %v2762_v25  ;;  %v3022_v0 = vsel %vm5692_vm11, 2139095040, %v3017_v16  ;;  %v1569_v31 = vmul.f32 %v1549_v12, %v1549_v12  ;;  %v1579_v35 = vmul.f32 %v1559_v27, %v1559_v27  ;;  %v1520_v25 = vld [vmem:[%s5125_s10 + $0x60] sm:$0xff]  ;;  %v2515_v16 = vld [vmem:[%s4862_s3 + $0x100] sm:$0xff] }
 0x2d4   : > { %v4299_v21 = vpop.eup %4298  ;;  %v2767_v26 = vsel %vm2752_vm15, 1065353216, %v2766_v19  ;;  %v3026_v28 = vsel %vm3023_vm8, 2143289344, %v3022_v0  ;;  %4304 = vpow2.f32 %v2774_v36  ;;  %v3058_v44 = vand.u32 2147483647, %v5719_v18 }
 0x2d5   : > { %v3027_v37 = vsel %vm3012_vm4, 1065353216, %v3026_v28  ;;  %4306 = vlog2.f32 %v2798_v20  ;;  %vm1372_vm5 = vcmp.eq.f32.partialorder %v5626_v47, inf  ;;  %v1375_v40 = vand.u32 2147483648, %v5626_v47 }
 0x2d6   : > { %v1493_v10 = vadd.f32 %v3027_v37, %v2767_v26  ;;  %v1371_v45 = vmul.f32 %v4299_v21, %v5626_v47  ;;  %vm1374_vm10 = vcmp.eq.f32.partialorder %v5626_v47, 0.0  ;;  %v1550_v13 = vsub.f32 %v1509_v32, %v2504_v33 }
 0x2d7   : > { %v4301_v43 = vpop.eup %4300  ;;  %4308 = vlog2.f32 %v3058_v44  ;;  %v5747_v30 = vadd.f32 1e-06, %v1569_v31  ;;  %v1560_v22 = vsub.f32 %v1519_v41, %v2514_v38  ;;  %vm1442_vm13 = vcmp.eq.f32.partialorder %v5667_v53, inf }
 0x2d8   : > { %1504 = vst [vmem:[#allocation3 + $0x30] sm:$0xff] %v1493_v10  ;;  %v3034_v46 = vmul.f32 0.4, %v4301_v43  ;;  %v1373_v52 = vsel %vm1372_vm5, %v5626_v47, %v1371_v45  ;;  %v1445_v50 = vand.u32 2147483648, %v5667_v53  ;;  %v5752_v6 = vadd.f32 1e-06, %v1579_v35 }
 0x2d9   : > { %v4303_v51 = vpop.eup %4302  ;;  %v1376_v54 = vsel %vm1374_vm10, %v1375_v40, %v1373_v52  ;;  %vm1444_vm7 = vcmp.eq.f32.partialorder %v5667_v53, 0.0  ;;  %v1570_v60 = vmul.f32 %v1550_v13, %v1550_v13  ;;  %vm2776_vm2 = vcmp.lt.f32.partialorder %v5613_v29, 0 }
 0x2da   : > { %4310 = vpow2.f32 %v3034_v46  ;;  %v1441_v49 = vmul.f32 %v4303_v51, %v5667_v53  ;;  %v5756_v55 = vadd.f32 0.01, %v1376_v54  ;;  %vm2777_vm15 = vcmp.eq.f32.partialorder %v5613_v29, 0 }
 0x2db   : > { %4312 = vrsqrt.f32 %v5747_v30  ;;  %vm2778_vm14 = vcmp.eq.f32.partialorder %v5613_v29, 1065353216  ;;  %vm5767_vm6 = vcmp.eq.f32.partialorder %v2772_v34, 2139095040  ;;  %v1580_v58 = vmul.f32 %v1560_v22, %v1560_v22 }
 0x2dc   : > { %v1443_v47 = vsel %vm1442_vm13, %v5667_v53, %v1441_v49  ;;  %4314 = vrsqrt.f32 %v5752_v6  ;;  %v2824_v8 = vand.u32 2147483647, %v5756_v55  ;;  %vm2789_vm0 = vcmp.ne.f32.partialorder %v5613_v29, %v5613_v29 }
 0x2dd   : > { %v1446_v61 = vsel %vm1444_vm7, %v1445_v50, %v1443_v47  ;;  %v5777_v1 = vadd.f32 1e-06, %v1570_v60  ;;  %vm3036_vm4 = vcmp.lt.f32.partialorder %v5655_v39, 0  ;;  %vm3037_vm1 = vcmp.eq.f32.partialorder %v5655_v39, 0 }
 0x2de   : > { %v4305_v62 = vpop.eup %4304  ;;  %v5771_v4 = vadd.f32 0.01, %v1446_v61  ;;  %4316 = vlog2.f32 %v2824_v8  ;;  %vm3038_vm3 = vcmp.eq.f32.partialorder %v5655_v39, 1065353216  ;;  %vm3049_vm12 = vcmp.ne.f32.partialorder %v5655_v39, %v5655_v39 }
 0x2df   : > { %v4307_v53 = vpop.eup %4306  ;;  %v2782_v63 = vsel %vm2776_vm2, 2143289344, %v4305_v62  ;;  %vm5789_vm11 = vcmp.eq.f32.partialorder %v3032_v57, 2139095040  ;;  %vm2802_vm8 = vcmp.lt.f32.partialorder %v5707_v23, 0  ;;  %v5794_v5 = vadd.f32 1e-06, %v1580_v58  ;;  %v2505_v57 = vld [vmem:[%s4862_s3 + $0xb0] sm:$0xff] }
 0x2e0   : > { %v2783_v3 = vsel %vm2777_vm15, 0, %v2782_v63  ;;  %v2800_v34 = vmul.f32 0.4, %v4307_v53  ;;  %v3084_v17 = vand.u32 2147483647, %v5771_v4  ;;  %vm2803_vm9 = vcmp.eq.f32.partialorder %v5707_v23, 0 }
 0x2e1   : > { %v2788_v56 = vsel %vm5767_vm6, 2139095040, %v2783_v3  ;;  %v4309_v7 = vpop.eup %4308  ;;  %vm1611_vm5 = vcmp.eq.f32.partialorder %v5747_v30, inf  ;;  %vm5807_vm10 = vcmp.eq.f32.partialorder %v2798_v20, 2139095040  ;;  %vm1613_vm13 = vcmp.eq.f32.partialorder %v5747_v30, 0.0  ;;  %v1511_v63 = vld [vmem:[%s5125_s10 + $0x18] sm:$0xff]  ;;  %v2506_v3 = vld [vmem:[%s4862_s3 + $0xb8] sm:$0xff] }
 0x2e2   : > { %4318 = vpow2.f32 %v2800_v34  ;;  %v3060_v59 = vmul.f32 0.4, %v4309_v7  ;;  %v2792_v12 = vsel %vm2789_vm0, 2143289344, %v2788_v56  ;;  %v1614_v9 = vand.u32 2147483648, %v5747_v30 }
 0x2e3   : > { %4320 = vlog2.f32 %v3084_v17  ;;  %vm2815_vm7 = vcmp.ne.f32.partialorder %v5707_v23, %v5707_v23  ;;  %vm3062_vm2 = vcmp.lt.f32.partialorder %v5719_v18, 0  ;;  %vm1681_vm15 = vcmp.eq.f32.partialorder %v5752_v6, inf }
 0x2e4   : > { %v4311_v48 = vpop.eup %4310  ;;  %4322 = vrsqrt.f32 %v5777_v1  ;;  %v1684_v27 = vand.u32 2147483648, %v5752_v6  ;;  %vm2804_vm6 = vcmp.eq.f32.partialorder %v5707_v23, 1065353216  ;;  %v1551_v20 = vsub.f32 %v1510_v11, %v2505_v57  ;;  %v1521_v57 = vld [vmem:[%s5125_s10 + $0x68] sm:$0xff] }
 0x2e5   : > { %v4313_v2 = vpop.eup %4312  ;;  %v3042_v15 = vsel %vm3036_vm4, 2143289344, %v4311_v48  ;;  %4324 = vpow2.f32 %v3060_v59  ;;  %v2793_v21 = vsel %vm2778_vm14, 1065353216, %v2792_v12  ;;  %vm1683_vm0 = vcmp.eq.f32.partialorder %v5752_v6, 0.0  ;;  %v2516_v48 = vld [vmem:[%s4862_s3 + $0x108] sm:$0xff] }
 0x2e6   : > { %v4315_v36 = vpop.eup %4314  ;;  %v3043_v19 = vsel %vm3037_vm1, 0, %v3042_v15  ;;  %v1610_v0 = vmul.f32 %v4313_v2, %v5747_v30  ;;  %4326 = vrsqrt.f32 %v5794_v5  ;;  %vm3063_vm4 = vcmp.eq.f32.partialorder %v5719_v18, 0 }
 0x2e7   : > { %v3048_v26 = vsel %vm5789_vm11, 2139095040, %v3043_v19  ;;  %v1680_v28 = vmul.f32 %v4315_v36, %v5752_v6  ;;  %v1561_v33 = vsub.f32 %v1520_v25, %v2515_v16  ;;  %v1571_v38 = vmul.f32 %v1551_v20, %v1551_v20 }
 0x2e8   : > { %v3052_v31 = vsel %vm3049_vm12, 2143289344, %v3048_v26  ;;  %v1612_v32 = vsel %vm1611_vm5, %v5747_v30, %v1610_v0  ;;  %v4317_v29 = vpop.eup %4316  ;;  %vm3064_vm14 = vcmp.eq.f32.partialorder %v5719_v18, 1065353216  ;;  %vm5853_vm1 = vcmp.eq.f32.partialorder %v3058_v44, 2139095040 }
 0x2e9   : > { %v3053_v37 = vsel %vm3038_vm3, 1065353216, %v3052_v31  ;;  %v1615_v35 = vsel %vm1613_vm13, %v1614_v9, %v1612_v32  ;;  %v1682_v41 = vsel %vm1681_vm15, %v5752_v6, %v1680_v28  ;;  %v2826_v40 = vmul.f32 0.4, %v4317_v29 }
 0x2ea   : > { %v1494_v10 = vadd.f32 %v3053_v37, %v2793_v21  ;;  %v1685_v43 = vsel %vm1683_vm0, %v1684_v27, %v1682_v41  ;;  %v5848_v45 = vadd.f32 0.01, %v1615_v35  ;;  %vm3075_vm3 = vcmp.ne.f32.partialorder %v5719_v18, %v5719_v18 }
 0x2eb   : > { %v5859_v13 = vadd.f32 0.01, %v1685_v43  ;;  %vm7577_vm12 = vcmask 261120   ;;  %4328 = vpow2.f32 %v2826_v40  ;;  %vm2828_vm11 = vcmp.lt.f32.partialorder %v5756_v55, 0 }
 0x2ec   : > { %v4319_v46 = vpop.eup %4318  ;;  %1505 = vst.msk [vmem:[#allocation3 + $0x38] sm:$0xff] %vm7577_vm12, %v1494_v10  ;;  %v3110_v30 = vand.u32 2147483647, %v5848_v45  ;;  %v1581_v22 = vmul.f32 %v1561_v33, %v1561_v33  ;;  %vm1618_vm5 = vcmp.eq.f32.partialorder %v5777_v1, inf  ;;  %vm1620_vm13 = vcmp.eq.f32.partialorder %v5777_v1, 0.0 }
 0x2ed   : > { %v4321_v51 = vpop.eup %4320  ;;  %v2808_v44 = vsel %vm2802_vm8, 2143289344, %v4319_v46  ;;  %v3370_v52 = vand.u32 2147483647, %v5859_v13  ;;  %v5873_v49 = vadd.f32 1e-06, %v1571_v38  ;;  %v1621_v61 = vand.u32 2147483648, %v5777_v1 }
 0x2ee   : > { %v4323_v50 = vpop.eup %4322  ;;  %v2809_v6 = vsel %vm2803_vm9, 0, %v2808_v44  ;;  %v3086_v54 = vmul.f32 0.4, %v4321_v51  ;;  %4330 = vlog2.f32 %v3110_v30  ;;  %vm1688_vm8 = vcmp.eq.f32.partialorder %v5794_v5, inf }
 0x2ef   : > { %v4325_v60 = vpop.eup %4324  ;;  %v2814_v47 = vsel %vm5807_vm10, 2139095040, %v2809_v6  ;;  %4332 = vlog2.f32 %v3370_v52  ;;  %v5886_v53 = vadd.f32 1e-06, %v1581_v22  ;;  %vm1690_vm9 = vcmp.eq.f32.partialorder %v5794_v5, 0.0 }
 0x2f0   : > { %v4327_v62 = vpop.eup %4326  ;;  %v2818_v42 = vsel %vm2815_vm7, 2143289344, %v2814_v47  ;;  %v3068_v58 = vsel %vm3062_vm2, 2143289344, %v4325_v60  ;;  %4334 = vpow2.f32 %v3086_v54  ;;  %v1691_v7 = vand.u32 2147483648, %v5794_v5 }
 0x2f1   : > { %v2819_v34 = vsel %vm2804_vm6, 1065353216, %v2818_v42  ;;  %v3069_v56 = vsel %vm3063_vm4, 0, %v3068_v58  ;;  %v1617_v59 = vmul.f32 %v4323_v50, %v5777_v1  ;;  %v1687_v11 = vmul.f32 %v4327_v62, %v5794_v5  ;;  %v2507_v62 = vld [vmem:[%s4862_s3 + $0xc0] sm:$0xff] }
 0x2f2   : > { %v3074_v24 = vsel %vm5853_vm1, 2139095040, %v3069_v56  ;;  %4336 = vrsqrt.f32 %v5873_v49  ;;  %vm2829_vm10 = vcmp.eq.f32.partialorder %v5756_v55, 0  ;;  %vm2830_vm7 = vcmp.eq.f32.partialorder %v5756_v55, 1065353216 }
 0x2f3   : > { %v3078_v23 = vsel %vm3075_vm3, 2143289344, %v3074_v24  ;;  %v1552_v12 = vsub.f32 %v1511_v63, %v2506_v3  ;;  %v1619_v9 = vsel %vm1618_vm5, %v5777_v1, %v1617_v59  ;;  %v1689_v2 = vsel %vm1688_vm8, %v5794_v5, %v1687_v11  ;;  %v1522_v3 = vld [vmem:[%s5125_s10 + $0x70] sm:$0xff] }
 0x2f4   : > { %v3079_v14 = vsel %vm3064_vm14, 1065353216, %v3078_v23  ;;  %4338 = vrsqrt.f32 %v5886_v53  ;;  %vm2841_vm2 = vcmp.ne.f32.partialorder %v5756_v55, %v5756_v55  ;;  %v1622_v27 = vsel %vm1620_vm13, %v1621_v61, %v1619_v9  ;;  %v1512_v61 = vld [vmem:[%s5125_s10 + $0x20] sm:$0xff] }
 0x2f5   : > { %v1495_v15 = vadd.f32 %v3079_v14, %v2819_v34  ;;  %v1692_v18 = vsel %vm1690_vm9, %v1691_v7, %v1689_v2  ;;  %v4329_v25 = vpop.eup %4328  ;;  %vm5925_vm15 = vcmp.eq.f32.partialorder %v2824_v8, 2139095040  ;;  %vm3088_vm6 = vcmp.lt.f32.partialorder %v5771_v4, 0  ;;  %v2517_v34 = vld [vmem:[%s4862_s3 + $0x110] sm:$0xff] }
 0x2f6   : > { %v5930_v36 = vadd.f32 0.01, %v1622_v27  ;;  %v1562_v19 = vsub.f32 %v1521_v57, %v2516_v48  ;;  %v2834_v1 = vsel %vm2828_vm11, 2143289344, %v4329_v25  ;;  %vm3089_vm0 = vcmp.eq.f32.partialorder %v5771_v4, 0 }
 0x2f7   : > { %1506 = vst [vmem:[#allocation3 + $0x40] sm:$0xff] %v1495_v15  ;;  %v5935_v5 = vadd.f32 0.01, %v1692_v18  ;;  %v1572_v0 = vmul.f32 %v1552_v12, %v1552_v12  ;;  %v2835_v8 = vsel %vm2829_vm10, 0, %v2834_v1  ;;  %vm3090_vm4 = vcmp.eq.f32.partialorder %v5771_v4, 1065353216 }
 0x2f8   : > { %v4331_v20 = vpop.eup %4330  ;;  %vm3101_vm14 = vcmp.ne.f32.partialorder %v5771_v4, %v5771_v4  ;;  %v3136_v21 = vand.u32 2147483647, %v5930_v36  ;;  %v2840_v28 = vsel %vm5925_vm15, 2139095040, %v2835_v8  ;;  %vm5947_vm1 = vcmp.eq.f32.partialorder %v3084_v17, 2139095040 }
 0x2f9   : > { %v4333_v26 = vpop.eup %4332  ;;  %v3112_v32 = vmul.f32 0.4, %v4331_v20  ;;  %vm1625_vm3 = vcmp.eq.f32.partialorder %v5873_v49, inf  ;;  %v2844_v29 = vsel %vm2841_vm2, 2143289344, %v2840_v28  ;;  %v1582_v35 = vmul.f32 %v1562_v19, %v1562_v19 }
 0x2fa   : > { %v4335_v33 = vpop.eup %4334  ;;  %v3372_v37 = vmul.f32 0.4, %v4333_v26  ;;  %4340 = vlog2.f32 %v3136_v21  ;;  %v3396_v17 = vand.u32 2147483647, %v5935_v5  ;;  %v5960_v38 = vadd.f32 1e-06, %v1572_v0 }
 0x2fb   : > { %v3094_v41 = vsel %vm3088_vm6, 2143289344, %v4335_v33  ;;  %4342 = vpow2.f32 %v3112_v32  ;;  %vm1627_vm12 = vcmp.eq.f32.partialorder %v5873_v49, 0.0  ;;  %v1628_v43 = vand.u32 2147483648, %v5873_v49 }
 0x2fc   : > { %v4337_v10 = vpop.eup %4336  ;;  %v3095_v40 = vsel %vm3089_vm0, 0, %v3094_v41  ;;  %4344 = vpow2.f32 %v3372_v37  ;;  %v2845_v39 = vsel %vm2830_vm7, 1065353216, %v2844_v29  ;;  %vm1695_vm11 = vcmp.eq.f32.partialorder %v5886_v53, inf  ;;  %v2508_v41 = vld [vmem:[%s4862_s3 + $0xc8] sm:$0xff] }
 0x2fd   : > { %v3100_v46 = vsel %vm5947_vm1, 2139095040, %v3095_v40  ;;  %4346 = vlog2.f32 %v3396_v17  ;;  %v1624_v44 = vmul.f32 %v4337_v10, %v5873_v49  ;;  %v1698_v55 = vand.u32 2147483648, %v5886_v53 }
 0x2fe   : > { %v4339_v22 = vpop.eup %4338  ;;  %v3104_v51 = vsel %vm3101_vm14, 2143289344, %v3100_v46  ;;  %v5978_v50 = vadd.f32 1e-06, %v1582_v35  ;;  %vm1697_vm5 = vcmp.eq.f32.partialorder %v5886_v53, 0.0  ;;  %4348 = vrsqrt.f32 %v5960_v38  ;;  %v1513_v35 = vld [vmem:[%s5125_s10 + $0x28] sm:$0xff] }
 0x2ff   : > { %v3105_v6 = vsel %vm3090_vm4, 1065353216, %v3104_v51  ;;  %v1694_v54 = vmul.f32 %v4339_v22, %v5886_v53  ;;  %vm3114_vm13 = vcmp.lt.f32.partialorder %v5848_v45, 0  ;;  %v1626_v47 = vsel %vm1625_vm3, %v5873_v49, %v1624_v44  ;;  %v1523_v51 = vld [vmem:[%s5125_s10 + $0x78] sm:$0xff]  ;;  %v2518_v44 = vld [vmem:[%s4862_s3 + $0x118] sm:$0xff] }
 0x300   : > { %v1496_v60 = vadd.f32 %v3105_v6, %v2845_v39  ;;  %vm3115_vm8 = vcmp.eq.f32.partialorder %v5848_v45, 0  ;;  %v1629_v4 = vsel %vm1627_vm12, %v1628_v43, %v1626_v47  ;;  %4350 = vrsqrt.f32 %v5978_v50 }
 0x301   : > { %v1696_v42 = vsel %vm1695_vm11, %v5886_v53, %v1694_v54  ;;  %vm7582_vm9 = vcmask 261120   ;;  %vm3116_vm10 = vcmp.eq.f32.partialorder %v5848_v45, 1065353216  ;;  %vm3127_vm7 = vcmp.ne.f32.partialorder %v5848_v45, %v5848_v45 }
 0x302   : > { %1507 = vst.msk [vmem:[#allocation3 + $0x48] sm:$0xff] %vm7582_vm9, %v1496_v60  ;;  %v1699_v58 = vsel %vm1697_vm5, %v1698_v55, %v1696_v42  ;;  %v6002_v63 = vadd.f32 0.01, %v1629_v4  ;;  %vm6006_vm2 = vcmp.eq.f32.partialorder %v3110_v30, 2139095040  ;;  %vm3374_vm15 = vcmp.lt.f32.partialorder %v5859_v13, 0 }
 0x303   : > { %v6011_v53 = vadd.f32 0.01, %v1699_v58  ;;  %v1553_v56 = vsub.f32 %v1512_v61, %v2507_v62  ;;  %vm3375_vm6 = vcmp.eq.f32.partialorder %v5859_v13, 0  ;;  %vm3376_vm0 = vcmp.eq.f32.partialorder %v5859_v13, 1065353216 }
 0x304   : > { %v4341_v7 = vpop.eup %4340  ;;  %vm6019_vm4 = vcmp.eq.f32.partialorder %v3370_v52, 2139095040  ;;  %v3162_v30 = vand.u32 2147483647, %v6002_v63  ;;  %vm3387_vm14 = vcmp.ne.f32.partialorder %v5859_v13, %v5859_v13  ;;  %vm1632_vm1 = vcmp.eq.f32.partialorder %v5960_v38, inf  ;;  %v1809_v13 = vld [vmem:[#allocation3] sm:$0xff] }
 0x305   : > { %v4343_v59 = vpop.eup %4342  ;;  %v3138_v11 = vmul.f32 0.4, %v4341_v7  ;;  %v3422_v23 = vand.u32 2147483647, %v6011_v53  ;;  %vm1634_vm3 = vcmp.eq.f32.partialorder %v5960_v38, 0.0  ;;  %v1563_v52 = vsub.f32 %v1522_v3, %v2517_v34 }
 0x306   : > { %v4345_v57 = vpop.eup %4344  ;;  %v3120_v48 = vsel %vm3114_vm13, 2143289344, %v4343_v59  ;;  %4352 = vlog2.f32 %v3162_v30  ;;  %vm3140_vm12 = vcmp.lt.f32.partialorder %v5930_v36, 0  ;;  %v1573_v2 = vmul.f32 %v1553_v56, %v1553_v56 }
 0x307   : > { %v4347_v12 = vpop.eup %4346  ;;  %v3121_v14 = vsel %vm3115_vm8, 0, %v3120_v48  ;;  %v3380_v9 = vsel %vm3374_vm15, 2143289344, %v4345_v57  ;;  %4354 = vpow2.f32 %v3138_v11  ;;  %vm3141_vm11 = vcmp.eq.f32.partialorder %v5930_v36, 0 }
 0x308   : > { %v3126_v15 = vsel %vm6006_vm2, 2139095040, %v3121_v14  ;;  %v3381_v27 = vsel %vm3375_vm6, 0, %v3380_v9  ;;  %v3398_v18 = vmul.f32 0.4, %v4347_v12  ;;  %4356 = vlog2.f32 %v3422_v23  ;;  %v4349_v25 = vpop.eup %4348 }
 0x309   : > { %v3130_v16 = vsel %vm3127_vm7, 2143289344, %v3126_v15  ;;  %v3386_v19 = vsel %vm6019_vm4, 2139095040, %v3381_v27  ;;  %v1635_v1 = vand.u32 2147483648, %v5960_v38  ;;  %vm1702_vm5 = vcmp.eq.f32.partialorder %v5978_v50, inf }
 0x30a   : > { %v3131_v0 = vsel %vm3116_vm10, 1065353216, %v3130_v16  ;;  %v3390_v20 = vsel %vm3387_vm14, 2143289344, %v3386_v19  ;;  %4358 = vpow2.f32 %v3398_v18  ;;  %v1631_v8 = vmul.f32 %v4349_v25, %v5960_v38  ;;  %v4351_v26 = vpop.eup %4350 }
 0x30b   : > { %v3391_v28 = vsel %vm3376_vm0, 1065353216, %v3390_v20  ;;  %v1705_v31 = vand.u32 2147483648, %v5978_v50  ;;  %v1583_v32 = vmul.f32 %v1563_v52, %v1563_v52  ;;  %v6061_v33 = vadd.f32 1e-06, %v1573_v2  ;;  %v1514_v20 = vld [vmem:[%s5125_s10 + $0x30] sm:$0xff] }
 0x30c   : > { %v1789_v29 = vadd.f32 %v3391_v28, %v3131_v0  ;;  %v1633_v45 = vsel %vm1632_vm1, %v5960_v38, %v1631_v8  ;;  %v1701_v37 = vmul.f32 %v4351_v26, %v5978_v50  ;;  %vm1704_vm13 = vcmp.eq.f32.partialorder %v5978_v50, 0.0  ;;  %v2509_v8 = vld [vmem:[%s4862_s3 + $0xd0] sm:$0xff] }
 0x30d   : > { %vm3142_vm8 = vcmp.eq.f32.partialorder %v5930_v36, 1065353216  ;;  %v1636_v10 = vsel %vm1634_vm3, %v1635_v1, %v1633_v45  ;;  %v6073_v40 = vadd.f32 1e-06, %v1583_v32  ;;  %4360 = vrsqrt.f32 %v6061_v33  ;;  %v1810_v1 = vld [vmem:[#allocation3 + $0x8] sm:$0xff] }
 0x30e   : > { %v1799_v43 = vmul.f32 0.8, %v1789_v29  ;;  %vm3153_vm9 = vcmp.ne.f32.partialorder %v5930_v36, %v5930_v36  ;;  %v1703_v39 = vsel %vm1702_vm5, %v5978_v50, %v1701_v37  ;;  %v6081_v46 = vadd.f32 0.01, %v1636_v10 }
 0x30f   : > { %vm6085_vm10 = vcmp.eq.f32.partialorder %v3136_v21, 2139095040  ;;  %v1706_v38 = vsel %vm1704_vm13, %v1705_v31, %v1703_v39  ;;  %4362 = vrsqrt.f32 %v6073_v40  ;;  %v1554_v55 = vsub.f32 %v1513_v35, %v2508_v41 }
 0x310   : > { %v4353_v6 = vpop.eup %4352  ;;  %v1819_v54 = vadd.f32 %v1809_v13, %v1799_v43  ;;  %vm3400_vm7 = vcmp.lt.f32.partialorder %v5935_v5, 0  ;;  %v6093_v60 = vadd.f32 0.01, %v1706_v38  ;;  %v3188_v50 = vand.u32 2147483647, %v6081_v46 }
 0x311   : > { %v4355_v47 = vpop.eup %4354  ;;  %vm3401_vm2 = vcmp.eq.f32.partialorder %v5935_v5, 0  ;;  %vm3402_vm15 = vcmp.eq.f32.partialorder %v5935_v5, 1065353216  ;;  %vm6100_vm6 = vcmp.eq.f32.partialorder %v3396_v17, 2139095040  ;;  %v3164_v61 = vmul.f32 0.4, %v4353_v6  ;;  %v2519_v6 = vld [vmem:[%s4862_s3 + $0x120] sm:$0xff] }
 0x312   : > { %v4357_v62 = vpop.eup %4356  ;;  %1829 = vst [vmem:[#allocation3] sm:$0xff] %v1819_v54  ;;  %v3146_v4 = vsel %vm3140_vm12, 2143289344, %v4355_v47  ;;  %4364 = vlog2.f32 %v3188_v50  ;;  %v3448_v42 = vand.u32 2147483647, %v6093_v60  ;;  %v1564_v58 = vsub.f32 %v1523_v51, %v2518_v44 }
 0x313   : > { %v3147_v49 = vsel %vm3141_vm11, 0, %v3146_v4  ;;  %4366 = vpow2.f32 %v3164_v61  ;;  %v3424_v17 = vmul.f32 0.4, %v4357_v62  ;;  %v1574_v3 = vmul.f32 %v1554_v55, %v1554_v55  ;;  %v1524_v55 = vld [vmem:[%s5125_s10 + $0x80] sm:$0xff] }
 0x314   : > { %v4359_v34 = vpop.eup %4358  ;;  %v3152_v56 = vsel %vm6085_vm10, 2139095040, %v3147_v49  ;;  %vm3413_vm0 = vcmp.ne.f32.partialorder %v5935_v5, %v5935_v5  ;;  %vm3166_vm4 = vcmp.lt.f32.partialorder %v6002_v63, 0  ;;  %4368 = vlog2.f32 %v3448_v42 }
 0x315   : > { %v3156_v7 = vsel %vm3153_vm9, 2143289344, %v3152_v56  ;;  %v3406_v24 = vsel %vm3400_vm7, 2143289344, %v4359_v34  ;;  %vm3167_vm14 = vcmp.eq.f32.partialorder %v6002_v63, 0  ;;  %4370 = vpow2.f32 %v3424_v17 }
 0x316   : > { %v3407_v59 = vsel %vm3401_vm2, 0, %v3406_v24  ;;  %vm3179_vm1 = vcmp.ne.f32.partialorder %v6002_v63, %v6002_v63  ;;  %vm1639_vm3 = vcmp.eq.f32.partialorder %v6061_v33, inf  ;;  %v1642_v11 = vand.u32 2147483648, %v6061_v33 }
 0x317   : > { %v4361_v57 = vpop.eup %4360  ;;  %v3157_v48 = vsel %vm3142_vm8, 1065353216, %v3156_v7  ;;  %v3412_v52 = vsel %vm6100_vm6, 2139095040, %v3407_v59  ;;  %vm3168_vm12 = vcmp.eq.f32.partialorder %v6002_v63, 1065353216  ;;  %v1584_v12 = vmul.f32 %v1564_v58, %v1564_v58  ;;  %v1811_v7 = vld [vmem:[#allocation3 + $0x10] sm:$0xff] }
 0x318   : > { %v6135_v14 = vadd.f32 1e-06, %v1574_v3  ;;  %v3416_v9 = vsel %vm3413_vm0, 2143289344, %v3412_v52  ;;  %v1638_v2 = vmul.f32 %v4361_v57, %v6061_v33  ;;  %vm1641_vm11 = vcmp.eq.f32.partialorder %v6061_v33, 0.0 }
 0x319   : > { %vm1709_vm5 = vcmp.eq.f32.partialorder %v6073_v40, inf  ;;  %v4363_v36 = vpop.eup %4362  ;;  %v3417_v15 = vsel %vm3402_vm15, 1065353216, %v3416_v9  ;;  %v1712_v27 = vand.u32 2147483648, %v6073_v40  ;;  %v6146_v18 = vadd.f32 1e-06, %v1584_v12 }
 0x31a   : > { %4372 = vrsqrt.f32 %v6135_v14  ;;  %v1790_v25 = vadd.f32 %v3417_v15, %v3157_v48  ;;  %v1640_v16 = vsel %vm1639_vm3, %v6061_v33, %v1638_v2  ;;  %v1708_v19 = vmul.f32 %v4363_v36, %v6073_v40  ;;  %v1515_v36 = vld [vmem:[%s5125_s10 + $0x38] sm:$0xff]  ;;  %v2510_v15 = vld [vmem:[%s4862_s3 + $0xd8] sm:$0xff] }
 0x31b   : > { %vm1711_vm13 = vcmp.eq.f32.partialorder %v6073_v40, 0.0  ;;  %vm6156_vm8 = vcmp.eq.f32.partialorder %v3162_v30, 2139095040  ;;  %vm3426_vm9 = vcmp.lt.f32.partialorder %v6011_v53, 0  ;;  %v1643_v0 = vsel %vm1641_vm11, %v1642_v11, %v1640_v16 }
 0x31c   : > { %4374 = vrsqrt.f32 %v6146_v18  ;;  %v4365_v26 = vpop.eup %4364  ;;  %v1800_v28 = vmul.f32 0.8, %v1790_v25  ;;  %vm3427_vm10 = vcmp.eq.f32.partialorder %v6011_v53, 0  ;;  %v1710_v31 = vsel %vm1709_vm5, %v6073_v40, %v1708_v19 }
 0x31d   : > { %v6168_v32 = vadd.f32 0.01, %v1643_v0  ;;  %v4367_v30 = vpop.eup %4366  ;;  %vm3428_vm7 = vcmp.eq.f32.partialorder %v6011_v53, 1065353216  ;;  %vm6173_vm2 = vcmp.eq.f32.partialorder %v3422_v23, 2139095040  ;;  %v3190_v29 = vmul.f32 0.4, %v4365_v26 }
 0x31e   : > { %v1713_v45 = vsel %vm1711_vm13, %v1712_v27, %v1710_v31  ;;  %v4369_v37 = vpop.eup %4368  ;;  %v1820_v35 = vadd.f32 %v1810_v1, %v1800_v28  ;;  %v3172_v41 = vsel %vm3166_vm4, 2143289344, %v4367_v30  ;;  %v1555_v10 = vsub.f32 %v1514_v20, %v2509_v8  ;;  %v1525_v20 = vld [vmem:[%s5125_s10 + $0x88] sm:$0xff]  ;;  %v2520_v8 = vld [vmem:[%s4862_s3 + $0x128] sm:$0xff] }
 0x31f   : > { %v3214_v13 = vand.u32 2147483647, %v6168_v32  ;;  %v4371_v43 = vpop.eup %4370  ;;  %v3173_v23 = vsel %vm3167_vm14, 0, %v3172_v41  ;;  %4376 = vpow2.f32 %v3190_v29  ;;  %v3450_v39 = vmul.f32 0.4, %v4369_v37 }
 0x320   : > { %v6184_v22 = vadd.f32 0.01, %v1713_v45  ;;  %vm7595_vm15 = vcmask 261120   ;;  %v3178_v40 = vsel %vm6156_vm8, 2139095040, %v3173_v23  ;;  %v3432_v38 = vsel %vm3426_vm9, 2143289344, %v4371_v43 }
 0x321   : > { %1830 = vst.msk [vmem:[#allocation3 + $0x8] sm:$0xff] %vm7595_vm15, %v1820_v35  ;;  %vm3439_vm6 = vcmp.ne.f32.partialorder %v6011_v53, %v6011_v53  ;;  %4378 = vlog2.f32 %v3214_v13  ;;  %v3182_v51 = vsel %vm3179_vm1, 2143289344, %v3178_v40  ;;  %v3433_v44 = vsel %vm3427_vm10, 0, %v3432_v38  ;;  %v2511_v40 = vld [vmem:[%s4862_s3 + $0xe0] sm:$0xff] }
 0x322   : > { %vm3192_vm0 = vcmp.lt.f32.partialorder %v6081_v46, 0  ;;  %4380 = vpow2.f32 %v3450_v39  ;;  %v3183_v54 = vsel %vm3168_vm12, 1065353216, %v3182_v51  ;;  %v3438_v47 = vsel %vm6173_vm2, 2139095040, %v3433_v44  ;;  %v1516_v39 = vld [vmem:[%s5125_s10 + $0x40] sm:$0xff]  ;;  %v1812_v51 = vld [vmem:[#allocation3 + $0x18] sm:$0xff] }
 0x323   : > { %vm3193_vm4 = vcmp.eq.f32.partialorder %v6081_v46, 0  ;;  %v1575_v21 = vmul.f32 %v1555_v10, %v1555_v10  ;;  %v3442_v62 = vsel %vm3439_vm6, 2143289344, %v3438_v47  ;;  %vm3194_vm14 = vcmp.eq.f32.partialorder %v6081_v46, 1065353216 }
 0x324   : > { %v4373_v61 = vpop.eup %4372  ;;  %v3474_v4 = vand.u32 2147483647, %v6184_v22  ;;  %vm1646_vm1 = vcmp.eq.f32.partialorder %v6135_v14, inf  ;;  %v1649_v58 = vand.u32 2147483648, %v6135_v14  ;;  %v3443_v63 = vsel %vm3428_vm7, 1065353216, %v3442_v62 }
 0x325   : > { %v1645_v49 = vmul.f32 %v4373_v61, %v6135_v14  ;;  %vm1648_vm3 = vcmp.eq.f32.partialorder %v6135_v14, 0.0  ;;  %v1565_v17 = vsub.f32 %v1524_v55, %v2519_v6  ;;  %v1791_v34 = vadd.f32 %v3443_v63, %v3183_v54  ;;  %v1526_v6 = vld [vmem:[%s5125_s10 + $0x90] sm:$0xff]  ;;  %v2521_v54 = vld [vmem:[%s4862_s3 + $0x130] sm:$0xff] }
 0x326   : > { %v4375_v3 = vpop.eup %4374  ;;  %4382 = vlog2.f32 %v3474_v4  ;;  %vm1716_vm12 = vcmp.eq.f32.partialorder %v6146_v18, inf  ;;  %v1719_v56 = vand.u32 2147483648, %v6146_v18  ;;  %vm1718_vm11 = vcmp.eq.f32.partialorder %v6146_v18, 0.0 }
 0x327   : > { %v1647_v24 = vsel %vm1646_vm1, %v6135_v14, %v1645_v49  ;;  %v1715_v53 = vmul.f32 %v4375_v3, %v6146_v18  ;;  %v6223_v59 = vadd.f32 1e-06, %v1575_v21  ;;  %v1801_v11 = vmul.f32 0.8, %v1791_v34 }
 0x328   : > { %vm6227_vm5 = vcmp.eq.f32.partialorder %v3188_v50, 2139095040  ;;  %vm3205_vm13 = vcmp.ne.f32.partialorder %v6081_v46, %v6081_v46  ;;  %v1650_v48 = vsel %vm1648_vm3, %v1649_v58, %v1647_v24  ;;  %vm3452_vm8 = vcmp.lt.f32.partialorder %v6093_v60, 0 }
 0x329   : > { %v1717_v52 = vsel %vm1716_vm12, %v6146_v18, %v1715_v53  ;;  %v6235_v12 = vadd.f32 0.01, %v1650_v48  ;;  %4384 = vrsqrt.f32 %v6223_v59  ;;  %v4377_v14 = vpop.eup %4376  ;;  %v1821_v9 = vadd.f32 %v1811_v7, %v1801_v11 }
 0x32a   : > { %vm3453_vm9 = vcmp.eq.f32.partialorder %v6093_v60, 0  ;;  %v1720_v50 = vsel %vm1718_vm11, %v1719_v56, %v1717_v52  ;;  %v1585_v2 = vmul.f32 %v1565_v17, %v1565_v17  ;;  %v3198_v25 = vsel %vm3192_vm0, 2143289344, %v4377_v14 }
 0x32b   : > { %v4379_v27 = vpop.eup %4378  ;;  %vm3454_vm10 = vcmp.eq.f32.partialorder %v6093_v60, 1065353216  ;;  %v6244_v18 = vadd.f32 0.01, %v1720_v50  ;;  %v3240_v16 = vand.u32 2147483647, %v6235_v12  ;;  %1831 = vst [vmem:[#allocation3 + $0x10] sm:$0xff] %v1821_v9  ;;  %vm3465_vm2 = vcmp.ne.f32.partialorder %v6093_v60, %v6093_v60 }
 0x32c   : > { %v4381_v19 = vpop.eup %4380  ;;  %v3199_v1 = vsel %vm3193_vm4, 0, %v3198_v25  ;;  %vm6251_vm7 = vcmp.eq.f32.partialorder %v3448_v42, 2139095040  ;;  %v3216_v0 = vmul.f32 0.4, %v4379_v27  ;;  %v1556_v31 = vsub.f32 %v1515_v36, %v2510_v15  ;;  %v1517_v50 = vld [vmem:[%s5125_s10 + $0x48] sm:$0xff]  ;;  %v1527_v25 = vld [vmem:[%s5125_s10 + $0x98] sm:$0xff] }
 0x32d   : > { %v3204_v26 = vsel %vm6227_vm5, 2139095040, %v3199_v1  ;;  %v3458_v28 = vsel %vm3452_vm8, 2143289344, %v4381_v19  ;;  %4386 = vlog2.f32 %v3240_v16  ;;  %v6270_v33 = vadd.f32 1e-06, %v1585_v2  ;;  %v2512_v2 = vld [vmem:[%s4862_s3 + $0xe8] sm:$0xff]  ;;  %v2522_v19 = vld [vmem:[%s4862_s3 + $0x138] sm:$0xff] }
 0x32e   : > { %v3208_v42 = vsel %vm3205_vm13, 2143289344, %v3204_v26  ;;  %v3459_v30 = vsel %vm3453_vm9, 0, %v3458_v28  ;;  %4388 = vpow2.f32 %v3216_v0  ;;  %v3500_v37 = vand.u32 2147483647, %v6244_v18 }
 0x32f   : > { %v3209_v29 = vsel %vm3194_vm14, 1065353216, %v3208_v42  ;;  %v3464_v45 = vsel %vm6251_vm7, 2139095040, %v3459_v30  ;;  %v1566_v35 = vsub.f32 %v1525_v20, %v2520_v8  ;;  %vm3218_vm15 = vcmp.lt.f32.partialorder %v6168_v32, 0 }
 0x330   : > { %v4383_v41 = vpop.eup %4382  ;;  %v3468_v10 = vsel %vm3465_vm2, 2143289344, %v3464_v45  ;;  %4390 = vlog2.f32 %v3500_v37  ;;  %vm1653_vm6 = vcmp.eq.f32.partialorder %v6223_v59, inf  ;;  %v1656_v60 = vand.u32 2147483648, %v6223_v59 }
 0x331   : > { %v3469_v43 = vsel %vm3454_vm10, 1065353216, %v3468_v10  ;;  %v3476_v23 = vmul.f32 0.4, %v4383_v41  ;;  %4392 = vrsqrt.f32 %v6270_v33  ;;  %v1576_v44 = vmul.f32 %v1556_v31, %v1556_v31 }
 0x332   : > { %v1792_v46 = vadd.f32 %v3469_v43, %v3209_v29  ;;  %v1586_v55 = vmul.f32 %v1566_v35, %v1566_v35  ;;  %vm3219_vm0 = vcmp.eq.f32.partialorder %v6168_v32, 0  ;;  %vm1655_vm4 = vcmp.eq.f32.partialorder %v6223_v59, 0.0 }
 0x333   : > { %v4385_v38 = vpop.eup %4384  ;;  %4394 = vpow2.f32 %v3476_v23  ;;  %vm3220_vm14 = vcmp.eq.f32.partialorder %v6168_v32, 1065353216  ;;  %v6296_v61 = vadd.f32 1e-06, %v1576_v44  ;;  %v1557_v58 = vsub.f32 %v1516_v39, %v2511_v40  ;;  %v1849_v44 = vld [vmem:[%s5125_s10 + $0x50] sm:$0xff] }
 0x334   : > { %v1802_v47 = vmul.f32 0.8, %v1792_v46  ;;  %v1652_v21 = vmul.f32 %v4385_v38, %v6223_v59  ;;  %v6298_v62 = vadd.f32 1e-06, %v1586_v55  ;;  %vm6302_vm1 = vcmp.eq.f32.partialorder %v3214_v13, 2139095040 }
 0x335   : > { %v1567_v3 = vsub.f32 %v1526_v6, %v2521_v54  ;;  %vm3231_vm3 = vcmp.ne.f32.partialorder %v6168_v32, %v6168_v32  ;;  %vm3478_vm12 = vcmp.lt.f32.partialorder %v6184_v22, 0  ;;  %4396 = vrsqrt.f32 %v6296_v61 }
 0x336   : > { %v1822_v63 = vadd.f32 %v1812_v51, %v1802_v47  ;;  %v1654_v17 = vsel %vm1653_vm6, %v6223_v59, %v1652_v21  ;;  %vm7602_vm11 = vcmask 261120   ;;  %vm3479_vm5 = vcmp.eq.f32.partialorder %v6184_v22, 0 }
 0x337   : > { %v4387_v34 = vpop.eup %4386  ;;  %v1657_v56 = vsel %vm1655_vm4, %v1656_v60, %v1654_v17  ;;  %4398 = vrsqrt.f32 %v6298_v62  ;;  %vm3480_vm13 = vcmp.eq.f32.partialorder %v6184_v22, 1065353216  ;;  %vm3491_vm8 = vcmp.ne.f32.partialorder %v6184_v22, %v6184_v22  ;;  %v1813_v60 = vld [vmem:[#allocation3 + $0x20] sm:$0xff] }
 0x338   : > { %v4389_v7 = vpop.eup %4388  ;;  %1832 = vst.msk [vmem:[#allocation3 + $0x18] sm:$0xff] %vm7602_vm11, %v1822_v63  ;;  %v3242_v13 = vmul.f32 0.4, %v4387_v34  ;;  %v6315_v24 = vadd.f32 0.01, %v1657_v56  ;;  %v1577_v59 = vmul.f32 %v1557_v58, %v1557_v58  ;;  %v1587_v48 = vmul.f32 %v1567_v3, %v1567_v3 }
 0x339   : > { %v3224_v53 = vsel %vm3218_vm15, 2143289344, %v4389_v7  ;;  %vm6330_vm9 = vcmp.eq.f32.partialorder %v3474_v4, 2139095040  ;;  %vm3244_vm10 = vcmp.lt.f32.partialorder %v6235_v12, 0  ;;  %vm3245_vm7 = vcmp.eq.f32.partialorder %v6235_v12, 0 }
 0x33a   : > { %v3225_v11 = vsel %vm3219_vm0, 0, %v3224_v53  ;;  %4400 = vpow2.f32 %v3242_v13  ;;  %v3266_v57 = vand.u32 2147483647, %v6315_v24  ;;  %v4391_v52 = vpop.eup %4390  ;;  %vm6340_vm2 = vcmp.eq.f32.partialorder %v3240_v16, 2139095040 }
 0x33b   : > { %v3230_v14 = vsel %vm6302_vm1, 2139095040, %v3225_v11  ;;  %v4393_v36 = vpop.eup %4392  ;;  %v3502_v27 = vmul.f32 0.4, %v4391_v52  ;;  %vm1723_vm15 = vcmp.eq.f32.partialorder %v6270_v33, inf  ;;  %v1726_v4 = vand.u32 2147483648, %v6270_v33 }
 0x33c   : > { %4402 = vlog2.f32 %v3266_v57  ;;  %v3234_v5 = vsel %vm3231_vm3, 2143289344, %v3230_v14  ;;  %vm3257_vm6 = vcmp.ne.f32.partialorder %v6235_v12, %v6235_v12  ;;  %v1722_v16 = vmul.f32 %v4393_v36, %v6270_v33 }
 0x33d   : > { %v4395_v1 = vpop.eup %4394  ;;  %vm1725_vm0 = vcmp.eq.f32.partialorder %v6270_v33, 0.0  ;;  %v6357_v0 = vadd.f32 1e-06, %v1577_v59  ;;  %4404 = vpow2.f32 %v3502_v27  ;;  %vm3504_vm4 = vcmp.lt.f32.partialorder %v6244_v18, 0 }
 0x33e   : > { %v3484_v20 = vsel %vm3478_vm12, 2143289344, %v4395_v1  ;;  %v6362_v8 = vadd.f32 1e-06, %v1587_v48  ;;  %v1558_v26 = vsub.f32 %v1517_v50, %v2512_v2  ;;  %vm3505_vm1 = vcmp.eq.f32.partialorder %v6244_v18, 0 }
 0x33f   : > { %v3485_v28 = vsel %vm3479_vm5, 0, %v3484_v20  ;;  %v1724_v31 = vsel %vm1723_vm15, %v6270_v33, %v1722_v16  ;;  %vm1660_vm3 = vcmp.eq.f32.partialorder %v6296_v61, inf  ;;  %v1568_v42 = vsub.f32 %v1527_v25, %v2522_v19  ;;  %v4397_v35 = vpop.eup %4396  ;;  %v1814_v19 = vld [vmem:[#allocation3 + $0x28] sm:$0xff] }
 0x340   : > { %v3235_v30 = vsel %vm3220_vm14, 1065353216, %v3234_v5  ;;  %v3490_v29 = vsel %vm6330_vm9, 2139095040, %v3485_v28  ;;  %vm3246_vm12 = vcmp.eq.f32.partialorder %v6235_v12, 1065353216  ;;  %v1727_v45 = vsel %vm1725_vm0, %v1726_v4, %v1724_v31 }
 0x341   : > { %vm1662_vm11 = vcmp.eq.f32.partialorder %v6296_v61, 0.0  ;;  %v3494_v41 = vsel %vm3491_vm8, 2143289344, %v3490_v29  ;;  %v6380_v33 = vadd.f32 0.01, %v1727_v45  ;;  %v1663_v10 = vand.u32 2147483648, %v6296_v61  ;;  %v4399_v32 = vpop.eup %4398 }
 0x342   : > { %4406 = vrsqrt.f32 %v6357_v0  ;;  %v3495_v43 = vsel %vm3480_vm13, 1065353216, %v3494_v41  ;;  %v1659_v23 = vmul.f32 %v4397_v35, %v6296_v61  ;;  %v1578_v46 = vmul.f32 %v1558_v26, %v1558_v26  ;;  %v1839_v35 = vld [vmem:[%s5125_s10] sm:$0xff]  ;;  %v2523_v41 = vld [vmem:[%s4862_s3 + $0x140] sm:$0xff] }
 0x343   : > { %4408 = vrsqrt.f32 %v6362_v8  ;;  %v1793_v39 = vadd.f32 %v3495_v43, %v3235_v30  ;;  %v3526_v40 = vand.u32 2147483647, %v6380_v33  ;;  %vm1730_vm14 = vcmp.eq.f32.partialorder %v6298_v62, inf }
 0x344   : > { %v1733_v38 = vand.u32 2147483648, %v6298_v62  ;;  %v4401_v51 = vpop.eup %4400  ;;  %vm6393_vm5 = vcmp.eq.f32.partialorder %v3500_v37, 2139095040  ;;  %v1661_v22 = vsel %vm1660_vm3, %v6296_v61, %v1659_v23  ;;  %v1729_v55 = vmul.f32 %v4399_v32, %v6298_v62 }
 0x345   : > { %vm1732_vm13 = vcmp.eq.f32.partialorder %v6298_v62, 0.0  ;;  %v1803_v6 = vmul.f32 0.8, %v1793_v39  ;;  %v3250_v54 = vsel %vm3244_vm10, 2143289344, %v4401_v51  ;;  %4410 = vlog2.f32 %v3526_v40 }
 0x346   : > { %v1588_v47 = vmul.f32 %v1568_v42, %v1568_v42  ;;  %v4403_v37 = vpop.eup %4402  ;;  %v3251_v21 = vsel %vm3245_vm7, 0, %v3250_v54  ;;  %v1664_v58 = vsel %vm1662_vm11, %v1663_v10, %v1661_v22  ;;  %v1731_v63 = vsel %vm1730_vm14, %v6298_v62, %v1729_v55  ;;  %v2533_v22 = vld [vmem:[%s4862_s3 + $0x190] sm:$0xff] }
 0x347   : > { %v6411_v49 = vadd.f32 1e-06, %v1578_v46  ;;  %v1823_v17 = vadd.f32 %v1813_v60, %v1803_v6  ;;  %v3256_v3 = vsel %vm6340_vm2, 2139095040, %v3251_v21  ;;  %v3268_v34 = vmul.f32 0.4, %v4403_v37  ;;  %v4405_v7 = vpop.eup %4404 }
 0x348   : > { %v1734_v56 = vsel %vm1732_vm13, %v1733_v38, %v1731_v63  ;;  %v3260_v13 = vsel %vm3257_vm6, 2143289344, %v3256_v3  ;;  %v6418_v53 = vadd.f32 0.01, %v1664_v58  ;;  %v3510_v61 = vsel %vm3504_vm4, 2143289344, %v4405_v7 }
 0x349   : > { %v6420_v59 = vadd.f32 0.01, %v1734_v56  ;;  %4412 = vrsqrt.f32 %v6411_v49  ;;  %1833 = vst [vmem:[#allocation3 + $0x20] sm:$0xff] %v1823_v17  ;;  %vm3517_vm8 = vcmp.ne.f32.partialorder %v6244_v18, %v6244_v18  ;;  %vm3506_vm9 = vcmp.eq.f32.partialorder %v6244_v18, 1065353216 }
 0x34a   : > { %4414 = vpow2.f32 %v3268_v34  ;;  %v3511_v62 = vsel %vm3505_vm1, 0, %v3510_v61  ;;  %v3292_v11 = vand.u32 2147483647, %v6418_v53  ;;  %v3261_v52 = vsel %vm3246_vm12, 1065353216, %v3260_v13 }
 0x34b   : > { %v3516_v14 = vsel %vm6393_vm5, 2139095040, %v3511_v62  ;;  %v3552_v9 = vand.u32 2147483647, %v6420_v59  ;;  %vm1667_vm10 = vcmp.eq.f32.partialorder %v6357_v0, inf  ;;  %v6439_v18 = vadd.f32 1e-06, %v1588_v47 }
 0x34c   : > { %v4407_v48 = vpop.eup %4406  ;;  %v3520_v2 = vsel %vm3517_vm8, 2143289344, %v3516_v14  ;;  %4416 = vlog2.f32 %v3292_v11  ;;  %vm1669_vm7 = vcmp.eq.f32.partialorder %v6357_v0, 0.0  ;;  %v1670_v12 = vand.u32 2147483648, %v6357_v0 }
 0x34d   : > { %v4409_v50 = vpop.eup %4408  ;;  %v3521_v36 = vsel %vm3506_vm9, 1065353216, %v3520_v2  ;;  %4418 = vlog2.f32 %v3552_v9  ;;  %v1666_v27 = vmul.f32 %v4407_v48, %v6357_v0  ;;  %vm1737_vm2 = vcmp.eq.f32.partialorder %v6362_v8, inf  ;;  %v1840_v48 = vld [vmem:[%s5125_s10 + $0x8] sm:$0xff] }
 0x34e   : > { %v1794_v15 = vadd.f32 %v3521_v36, %v3261_v52  ;;  %v1740_v4 = vand.u32 2147483648, %v6362_v8  ;;  %v1736_v1 = vmul.f32 %v4409_v50, %v6362_v8  ;;  %vm1739_vm15 = vcmp.eq.f32.partialorder %v6362_v8, 0.0  ;;  %v2524_v52 = vld [vmem:[%s4862_s3 + $0x148] sm:$0xff] }
 0x34f   : > { %v4411_v25 = vpop.eup %4410  ;;  %v1668_v20 = vsel %vm1667_vm10, %v6357_v0, %v1666_v27  ;;  %4420 = vrsqrt.f32 %v6439_v18  ;;  %vm3270_vm6 = vcmp.lt.f32.partialorder %v6315_v24, 0  ;;  %vm3271_vm0 = vcmp.eq.f32.partialorder %v6315_v24, 0 }
 0x350   : > { %v1804_v5 = vmul.f32 0.8, %v1794_v15  ;;  %v3528_v16 = vmul.f32 0.4, %v4411_v25  ;;  %v1671_v26 = vsel %vm1669_vm7, %v1670_v12, %v1668_v20  ;;  %v1738_v28 = vsel %vm1737_vm2, %v6362_v8, %v1736_v1  ;;  %v1841_v25 = vld [vmem:[%s5125_s10 + $0x10] sm:$0xff] }
 0x351   : > { %v1741_v30 = vsel %vm1739_vm15, %v1740_v4, %v1738_v28  ;;  %v6456_v29 = vadd.f32 0.01, %v1671_v26  ;;  %vm3283_vm4 = vcmp.ne.f32.partialorder %v6315_v24, %v6315_v24  ;;  %vm7609_vm1 = vcmask 261120  }
 0x352   : > { %v1824_v42 = vadd.f32 %v1814_v19, %v1804_v5  ;;  %4422 = vpow2.f32 %v3528_v16  ;;  %v6461_v0 = vadd.f32 0.01, %v1741_v30  ;;  %vm3272_vm3 = vcmp.eq.f32.partialorder %v6315_v24, 1065353216  ;;  %v1850_v24 = vld [vmem:[%s5125_s10 + $0x58] sm:$0xff] }
 0x353   : > { %v4413_v31 = vpop.eup %4412  ;;  %vm6469_vm12 = vcmp.eq.f32.partialorder %v3266_v57, 2139095040  ;;  %vm3530_vm11 = vcmp.lt.f32.partialorder %v6380_v33, 0  ;;  %v3318_v32 = vand.u32 2147483647, %v6456_v29  ;;  %vm3531_vm14 = vcmp.eq.f32.partialorder %v6380_v33, 0 }
 0x354   : > { %v4415_v45 = vpop.eup %4414  ;;  %1834 = vst.msk [vmem:[#allocation3 + $0x28] sm:$0xff] %vm7609_vm1, %v1824_v42  ;;  %v3578_v43 = vand.u32 2147483647, %v6461_v0  ;;  %v1673_v23 = vmul.f32 %v4413_v31, %v6411_v49  ;;  %vm1674_vm5 = vcmp.eq.f32.partialorder %v6411_v49, inf  ;;  %v1677_v39 = vand.u32 2147483648, %v6411_v49  ;;  %v2525_v42 = vld [vmem:[%s4862_s3 + $0x150] sm:$0xff] }
 0x355   : > { %v3276_v10 = vsel %vm3270_vm6, 2143289344, %v4415_v45  ;;  %4424 = vlog2.f32 %v3318_v32  ;;  %v1880_v38 = vsub.f32 %v1839_v35, %v2523_v41  ;;  %vm3532_vm13 = vcmp.eq.f32.partialorder %v6380_v33, 1065353216 }
 0x356   : > { %v4417_v57 = vpop.eup %4416  ;;  %v3277_v46 = vsel %vm3271_vm0, 0, %v3276_v10  ;;  %4426 = vlog2.f32 %v3578_v43  ;;  %vm1676_vm8 = vcmp.eq.f32.partialorder %v6411_v49, 0.0  ;;  %vm6494_vm9 = vcmp.eq.f32.partialorder %v3526_v40, 2139095040 }
 0x357   : > { %v4419_v51 = vpop.eup %4418  ;;  %v3294_v60 = vmul.f32 0.4, %v4417_v57  ;;  %vm3543_vm10 = vcmp.ne.f32.partialorder %v6380_v33, %v6380_v33  ;;  %vm1744_vm7 = vcmp.eq.f32.partialorder %v6439_v18, inf  ;;  %v3282_v54 = vsel %vm6469_vm12, 2139095040, %v3277_v46  ;;  %v1815_v33 = vld [vmem:[#allocation3 + $0x30] sm:$0xff]  ;;  %v1851_v46 = vld [vmem:[%s5125_s10 + $0x60] sm:$0xff] }
 0x358   : > { %v3554_v6 = vmul.f32 0.4, %v4419_v51  ;;  %v1675_v47 = vsel %vm1674_vm5, %v6411_v49, %v1673_v23  ;;  %v1747_v37 = vand.u32 2147483648, %v6439_v18  ;;  %v1890_v58 = vsub.f32 %v1849_v44, %v2533_v22 }
 0x359   : > { %4428 = vpow2.f32 %v3294_v60  ;;  %v4421_v40 = vpop.eup %4420  ;;  %v1678_v21 = vsel %vm1676_vm8, %v1677_v39, %v1675_v47  ;;  %v1900_v63 = vmul.f32 %v1880_v38, %v1880_v38  ;;  %vm3296_vm2 = vcmp.lt.f32.partialorder %v6418_v53, 0  ;;  %v2535_v39 = vld [vmem:[%s4862_s3 + $0x1a0] sm:$0xff] }
 0x35a   : > { %4430 = vpow2.f32 %v3554_v6  ;;  %v1743_v17 = vmul.f32 %v4421_v40, %v6439_v18  ;;  %vm1746_vm15 = vcmp.eq.f32.partialorder %v6439_v18, 0.0  ;;  %v6510_v3 = vadd.f32 0.01, %v1678_v21 }
 0x35b   : > { %v3286_v49 = vsel %vm3283_vm4, 2143289344, %v3282_v54  ;;  %vm3297_vm6 = vcmp.eq.f32.partialorder %v6418_v53, 0  ;;  %vm3309_vm0 = vcmp.ne.f32.partialorder %v6418_v53, %v6418_v53  ;;  %v6518_v56 = vadd.f32 1e-06, %v1900_v63 }
 0x35c   : > { %v4423_v34 = vpop.eup %4422  ;;  %vm3298_vm1 = vcmp.eq.f32.partialorder %v6418_v53, 1065353216  ;;  %vm6525_vm12 = vcmp.eq.f32.partialorder %v3292_v11, 2139095040  ;;  %v1745_v61 = vsel %vm1744_vm7, %v6439_v18, %v1743_v17  ;;  %v3344_v62 = vand.u32 2147483647, %v6510_v3  ;;  %v2534_v18 = vld [vmem:[%s4862_s3 + $0x198] sm:$0xff] }
 0x35d   : > { %v3536_v7 = vsel %vm3530_vm11, 2143289344, %v4423_v34  ;;  %vm3556_vm4 = vcmp.lt.f32.partialorder %v6420_v59, 0  ;;  %v1748_v11 = vsel %vm1746_vm15, %v1747_v37, %v1745_v61  ;;  %v1910_v50 = vmul.f32 %v1890_v58, %v1890_v58 }
 0x35e   : > { %v3537_v14 = vsel %vm3531_vm14, 0, %v3536_v7  ;;  %v3287_v2 = vsel %vm3272_vm3, 1065353216, %v3286_v49  ;;  %v6544_v12 = vadd.f32 0.01, %v1748_v11  ;;  %4432 = vlog2.f32 %v3344_v62  ;;  %v1816_v7 = vld [vmem:[#allocation3 + $0x38] sm:$0xff] }
 0x35f   : > { %v3542_v36 = vsel %vm6494_vm9, 2139095040, %v3537_v14  ;;  %v4425_v15 = vpop.eup %4424  ;;  %vm3557_vm11 = vcmp.eq.f32.partialorder %v6420_v59, 0  ;;  %4434 = vrsqrt.f32 %v6518_v56  ;;  %v1881_v4 = vsub.f32 %v1840_v48, %v2524_v52 }
 0x360   : > { %v3546_v27 = vsel %vm3543_vm10, 2143289344, %v3542_v36  ;;  %v4427_v19 = vpop.eup %4426  ;;  %vm3558_vm3 = vcmp.eq.f32.partialorder %v6420_v59, 1065353216  ;;  %v3320_v5 = vmul.f32 0.4, %v4425_v15  ;;  %v3604_v16 = vand.u32 2147483647, %v6544_v12 }
 0x361   : > { %v3547_v1 = vsel %vm3532_vm13, 1065353216, %v3546_v27  ;;  %vm6562_vm14 = vcmp.eq.f32.partialorder %v3552_v9, 2139095040  ;;  %v3580_v28 = vmul.f32 0.4, %v4427_v19  ;;  %v6566_v31 = vadd.f32 1e-06, %v1910_v50 }
 0x362   : > { %v1795_v20 = vadd.f32 %v3547_v1, %v3287_v2  ;;  %vm3569_vm5 = vcmp.ne.f32.partialorder %v6420_v59, %v6420_v59  ;;  %4436 = vpow2.f32 %v3320_v5  ;;  %vm3322_vm13 = vcmp.lt.f32.partialorder %v6456_v29, 0 }
 0x363   : > { %v4429_v30 = vpop.eup %4428  ;;  %v1891_v45 = vsub.f32 %v1850_v24, %v2534_v18  ;;  %vm3323_vm8 = vcmp.eq.f32.partialorder %v6456_v29, 0  ;;  %4438 = vpow2.f32 %v3580_v28  ;;  %v1901_v8 = vmul.f32 %v1881_v4, %v1881_v4 }
 0x364   : > { %v4431_v35 = vpop.eup %4430  ;;  %v1805_v9 = vmul.f32 0.8, %v1795_v20  ;;  %v3302_v41 = vsel %vm3296_vm2, 2143289344, %v4429_v30  ;;  %vm6581_vm9 = vcmp.eq.f32.partialorder %v3318_v32, 2139095040  ;;  %4440 = vlog2.f32 %v3604_v16 }
 0x365   : > { %v3303_v10 = vsel %vm3297_vm6, 0, %v3302_v41  ;;  %v3562_v23 = vsel %vm3556_vm4, 2143289344, %v4431_v35  ;;  %v1882_v38 = vsub.f32 %v1841_v25, %v2525_v42  ;;  %vm3335_vm10 = vcmp.ne.f32.partialorder %v6456_v29, %v6456_v29 }
 0x366   : > { %v1825_v51 = vadd.f32 %v1815_v33, %v1805_v9  ;;  %v3308_v60 = vsel %vm6525_vm12, 2139095040, %v3303_v10  ;;  %v3563_v44 = vsel %vm3557_vm11, 0, %v3562_v23  ;;  %4442 = vrsqrt.f32 %v6566_v31 }
 0x367   : > { %v3312_v32 = vsel %vm3309_vm0, 2143289344, %v3308_v60  ;;  %v3568_v22 = vsel %vm6562_vm14, 2139095040, %v3563_v44  ;;  %vm3324_vm7 = vcmp.eq.f32.partialorder %v6456_v29, 1065353216  ;;  %vm3582_vm2 = vcmp.lt.f32.partialorder %v6461_v0, 0  ;;  %v1842_v44 = vld [vmem:[%s5125_s10 + $0x18] sm:$0xff] }
 0x368   : > { %vm3583_vm15 = vcmp.eq.f32.partialorder %v6461_v0, 0  ;;  %1835 = vst [vmem:[#allocation3 + $0x30] sm:$0xff] %v1825_v51  ;;  %v3313_v55 = vsel %vm3298_vm1, 1065353216, %v3312_v32  ;;  %v3572_v6 = vsel %vm3569_vm5, 2143289344, %v3568_v22  ;;  %vm3584_vm6 = vcmp.eq.f32.partialorder %v6461_v0, 1065353216  ;;  %v4433_v37 = vpop.eup %4432  ;;  %v2526_v32 = vld [vmem:[%s4862_s3 + $0x158] sm:$0xff] }
 0x369   : > { %v1911_v54 = vmul.f32 %v1891_v45, %v1891_v45  ;;  %v1892_v47 = vsub.f32 %v1851_v46, %v2535_v39  ;;  %v3573_v40 = vsel %vm3558_vm3, 1065353216, %v3572_v6  ;;  %vm1942_vm0 = vcmp.eq.f32.partialorder %v6518_v56, inf  ;;  %v4435_v53 = vpop.eup %4434 }
 0x36a   : > { %v1945_v21 = vand.u32 2147483648, %v6518_v56  ;;  %v6614_v58 = vadd.f32 1e-06, %v1901_v8  ;;  %v1796_v63 = vadd.f32 %v3573_v40, %v3313_v55  ;;  %v3346_v17 = vmul.f32 0.4, %v4433_v37  ;;  %v1817_v8 = vld [vmem:[#allocation3 + $0x40] sm:$0xff] }
 0x36b   : > { %v6616_v34 = vadd.f32 1e-06, %v1911_v54  ;;  %v1902_v49 = vmul.f32 %v1882_v38, %v1882_v38  ;;  %vm6620_vm1 = vcmp.eq.f32.partialorder %v3578_v43, 2139095040  ;;  %v1941_v59 = vmul.f32 %v4435_v53, %v6518_v56 }
 0x36c   : > { %vm1944_vm12 = vcmp.eq.f32.partialorder %v6518_v56, 0.0  ;;  %4444 = vrsqrt.f32 %v6614_v58  ;;  %v1806_v61 = vmul.f32 0.8, %v1796_v63  ;;  %vm3595_vm4 = vcmp.ne.f32.partialorder %v6461_v0, %v6461_v0  ;;  %v4437_v48 = vpop.eup %4436  ;;  %v1843_v0 = vld [vmem:[%s5125_s10 + $0x20] sm:$0xff] }
 0x36d   : > { %4446 = vpow2.f32 %v3346_v17  ;;  %vm2012_vm11 = vcmp.eq.f32.partialorder %v6566_v31, inf  ;;  %v1943_v43 = vsel %vm1942_vm0, %v6518_v56, %v1941_v59  ;;  %vm2014_vm3 = vcmp.eq.f32.partialorder %v6566_v31, 0.0  ;;  %v4439_v14 = vpop.eup %4438 }
 0x36e   : > { %4448 = vrsqrt.f32 %v6616_v34  ;;  %v1912_v52 = vmul.f32 %v1892_v47, %v1892_v47  ;;  %v1826_v11 = vadd.f32 %v1816_v7, %v1806_v61  ;;  %v3328_v50 = vsel %vm3322_vm13, 2143289344, %v4437_v48  ;;  %v4441_v15 = vpop.eup %4440  ;;  %v1852_v61 = vld [vmem:[%s5125_s10 + $0x68] sm:$0xff]  ;;  %v2536_v48 = vld [vmem:[%s4862_s3 + $0x1a8] sm:$0xff] }
 0x36f   : > { %v1946_v2 = vsel %vm1944_vm12, %v1945_v21, %v1943_v43  ;;  %v6637_v36 = vadd.f32 1e-06, %v1902_v49  ;;  %v3329_v27 = vsel %vm3323_vm8, 0, %v3328_v50  ;;  %v3588_v56 = vsel %vm3582_vm2, 2143289344, %v4439_v14 }
 0x370   : > { %v2015_v24 = vand.u32 2147483648, %v6566_v31  ;;  %v6644_v18 = vadd.f32 0.01, %v1946_v2  ;;  %v4443_v4 = vpop.eup %4442  ;;  %vm7622_vm14 = vcmask 261120   ;;  %v3334_v25 = vsel %vm6581_vm9, 2139095040, %v3329_v27 }
 0x371   : > { %1836 = vst.msk [vmem:[#allocation3 + $0x38] sm:$0xff] %vm7622_vm14, %v1826_v11  ;;  %v3589_v19 = vsel %vm3583_vm15, 0, %v3588_v56  ;;  %v3606_v1 = vmul.f32 0.4, %v4441_v15  ;;  %4450 = vrsqrt.f32 %v6637_v36  ;;  %v3338_v5 = vsel %vm3335_vm10, 2143289344, %v3334_v25 }
 0x372   : > { %v3594_v20 = vsel %vm6620_vm1, 2139095040, %v3589_v19  ;;  %v2011_v26 = vmul.f32 %v4443_v4, %v6566_v31  ;;  %v3630_v28 = vand.u32 2147483647, %v6644_v18  ;;  %v3339_v42 = vsel %vm3324_vm7, 1065353216, %v3338_v5 }
 0x373   : > { %v3598_v30 = vsel %vm3595_vm4, 2143289344, %v3594_v20  ;;  %4452 = vpow2.f32 %v3606_v1  ;;  %v6664_v33 = vadd.f32 1e-06, %v1912_v52  ;;  %vm3348_vm5 = vcmp.lt.f32.partialorder %v6510_v3, 0  ;;  %v1818_v1 = vld [vmem:[#allocation3 + $0x48] sm:$0xff] }
 0x374   : > { %v3599_v45 = vsel %vm3584_vm6, 1065353216, %v3598_v30  ;;  %v2013_v35 = vsel %vm2012_vm11, %v6566_v31, %v2011_v26  ;;  %4454 = vlog2.f32 %v3630_v28  ;;  %vm3349_vm13 = vcmp.eq.f32.partialorder %v6510_v3, 0 }
 0x375   : > { %v1797_v9 = vadd.f32 %v3599_v45, %v3339_v42  ;;  %v2016_v29 = vsel %vm2014_vm3, %v2015_v24, %v2013_v35  ;;  %vm6679_vm8 = vcmp.eq.f32.partialorder %v3344_v62, 2139095040  ;;  %vm1949_vm9 = vcmp.eq.f32.partialorder %v6614_v58, inf }
 0x376   : > { %v4445_v41 = vpop.eup %4444  ;;  %v6683_v10 = vadd.f32 0.01, %v2016_v29  ;;  %v1952_v46 = vand.u32 2147483648, %v6614_v58  ;;  %4456 = vrsqrt.f32 %v6664_v33  ;;  %vm3350_vm10 = vcmp.eq.f32.partialorder %v6510_v3, 1065353216 }
 0x377   : > { %v4447_v23 = vpop.eup %4446  ;;  %v1807_v57 = vmul.f32 0.8, %v1797_v9  ;;  %v1948_v31 = vmul.f32 %v4445_v41, %v6614_v58  ;;  %vm1951_vm7 = vcmp.eq.f32.partialorder %v6614_v58, 0.0  ;;  %vm3361_vm2 = vcmp.ne.f32.partialorder %v6510_v3, %v6510_v3 }
 0x378   : > { %v4449_v39 = vpop.eup %4448  ;;  %v3354_v62 = vsel %vm3348_vm5, 2143289344, %v4447_v23  ;;  %v3890_v38 = vand.u32 2147483647, %v6683_v10  ;;  %vm2019_vm15 = vcmp.eq.f32.partialorder %v6616_v34, inf  ;;  %v2022_v6 = vand.u32 2147483648, %v6616_v34  ;;  %v2527_v23 = vld [vmem:[%s4862_s3 + $0x160] sm:$0xff] }
 0x379   : > { %v1827_v51 = vadd.f32 %v1817_v8, %v1807_v57  ;;  %v3355_v60 = vsel %vm3349_vm13, 0, %v3354_v62  ;;  %v1950_v55 = vsel %vm1949_vm9, %v6614_v58, %v1948_v31  ;;  %vm3608_vm6 = vcmp.lt.f32.partialorder %v6544_v12, 0 }
 0x37a   : > { %v3360_v22 = vsel %vm6679_vm8, 2139095040, %v3355_v60  ;;  %4458 = vlog2.f32 %v3890_v38  ;;  %v1953_v47 = vsel %vm1951_vm7, %v1952_v46, %v1950_v55  ;;  %v2018_v37 = vmul.f32 %v4449_v39, %v6616_v34  ;;  %v2537_v60 = vld [vmem:[%s4862_s3 + $0x1b0] sm:$0xff] }
 0x37b   : > { %v4451_v54 = vpop.eup %4450  ;;  %1837 = vst [vmem:[#allocation3 + $0x40] sm:$0xff] %v1827_v51  ;;  %vm2021_vm0 = vcmp.eq.f32.partialorder %v6616_v34, 0.0  ;;  %v3364_v40 = vsel %vm3361_vm2, 2143289344, %v3360_v22  ;;  %vm3609_vm1 = vcmp.eq.f32.partialorder %v6544_v12, 0  ;;  %v6709_v21 = vadd.f32 0.01, %v1953_v47 }
 0x37c   : > { %v1883_v53 = vsub.f32 %v1842_v44, %v2526_v32  ;;  %vm3610_vm12 = vcmp.eq.f32.partialorder %v6544_v12, 1065353216  ;;  %vm6714_vm4 = vcmp.eq.f32.partialorder %v3604_v16, 2139095040  ;;  %vm3621_vm11 = vcmp.ne.f32.partialorder %v6544_v12, %v6544_v12  ;;  %v1853_v51 = vld [vmem:[%s5125_s10 + $0x70] sm:$0xff] }
 0x37d   : > { %v4453_v58 = vpop.eup %4452  ;;  %v2020_v17 = vsel %vm2019_vm15, %v6616_v34, %v2018_v37  ;;  %v3656_v59 = vand.u32 2147483647, %v6709_v21  ;;  %vm1956_vm3 = vcmp.eq.f32.partialorder %v6637_v36, inf  ;;  %v3365_v16 = vsel %vm3350_vm10, 1065353216, %v3364_v40 }
 0x37e   : > { %v4455_v49 = vpop.eup %4454  ;;  %v3614_v7 = vsel %vm3608_vm6, 2143289344, %v4453_v58  ;;  %v2023_v13 = vsel %vm2021_vm0, %v2022_v6, %v2020_v17  ;;  %v1955_v11 = vmul.f32 %v4451_v54, %v6637_v36  ;;  %v1903_v50 = vmul.f32 %v1883_v53, %v1883_v53 }
 0x37f   : > { %v3615_v43 = vsel %vm3609_vm1, 0, %v3614_v7  ;;  %v3632_v52 = vmul.f32 0.4, %v4455_v49  ;;  %v6731_v14 = vadd.f32 0.01, %v2023_v13  ;;  %4460 = vlog2.f32 %v3656_v59  ;;  %v1844_v13 = vld [vmem:[%s5125_s10 + $0x28] sm:$0xff] }
 0x380   : > { %v3620_v34 = vsel %vm6714_vm4, 2139095040, %v3615_v43  ;;  %v4457_v2 = vpop.eup %4456  ;;  %v1959_v27 = vand.u32 2147483648, %v6637_v36  ;;  %vm1958_vm14 = vcmp.eq.f32.partialorder %v6637_v36, 0.0  ;;  %v1893_v24 = vsub.f32 %v1852_v61, %v2536_v48 }
 0x381   : > { %v3624_v3 = vsel %vm3621_vm11, 2143289344, %v3620_v34  ;;  %4462 = vpow2.f32 %v3632_v52  ;;  %v3916_v15 = vand.u32 2147483647, %v6731_v14  ;;  %vm2026_vm5 = vcmp.eq.f32.partialorder %v6664_v33, inf  ;;  %v1854_v34 = vld [vmem:[%s5125_s10 + $0x78] sm:$0xff] }
 0x382   : > { %v3625_v56 = vsel %vm3610_vm12, 1065353216, %v3624_v3  ;;  %v2029_v25 = vand.u32 2147483648, %v6664_v33  ;;  %v1957_v5 = vsel %vm1956_vm3, %v6637_v36, %v1955_v11  ;;  %v2025_v12 = vmul.f32 %v4457_v2, %v6664_v33  ;;  %v2538_v11 = vld [vmem:[%s4862_s3 + $0x1b8] sm:$0xff] }
 0x383   : > { %v1798_v4 = vadd.f32 %v3625_v56, %v3365_v16  ;;  %4464 = vlog2.f32 %v3916_v15  ;;  %vm2028_vm13 = vcmp.eq.f32.partialorder %v6664_v33, 0.0  ;;  %v6755_v20 = vadd.f32 1e-06, %v1903_v50 }
 0x384   : > { %v4459_v19 = vpop.eup %4458  ;;  %v1960_v30 = vsel %vm1958_vm14, %v1959_v27, %v1957_v5  ;;  %v2027_v45 = vsel %vm2026_vm5, %v6664_v33, %v2025_v12  ;;  %v1913_v9 = vmul.f32 %v1893_v24, %v1893_v24  ;;  %vm7627_vm8 = vcmask 261120  }
 0x385   : > { %v1808_v26 = vmul.f32 0.8, %v1798_v4  ;;  %v3892_v42 = vmul.f32 0.4, %v4459_v19  ;;  %v6758_v35 = vadd.f32 0.01, %v1960_v30  ;;  %4466 = vrsqrt.f32 %v6755_v20 }
 0x386   : > { %v2030_v36 = vsel %vm2028_vm13, %v2029_v25, %v2027_v45  ;;  %vm3634_vm9 = vcmp.lt.f32.partialorder %v6644_v18, 0  ;;  %vm3635_vm10 = vcmp.eq.f32.partialorder %v6644_v18, 0  ;;  %vm3636_vm7 = vcmp.eq.f32.partialorder %v6644_v18, 1065353216 }
 0x387   : > { %v1828_v29 = vadd.f32 %v1818_v1, %v1808_v26  ;;  %4468 = vpow2.f32 %v3892_v42  ;;  %v6761_v41 = vadd.f32 0.01, %v2030_v36  ;;  %v3682_v8 = vand.u32 2147483647, %v6758_v35  ;;  %v2140_v42 = vld [vmem:[#allocation3] sm:$0xff] }
 0x388   : > { %vm6772_vm2 = vcmp.eq.f32.partialorder %v3630_v28, 2139095040  ;;  %v6779_v46 = vadd.f32 1e-06, %v1913_v9  ;;  %vm3647_vm15 = vcmp.ne.f32.partialorder %v6644_v18, %v6644_v18  ;;  %vm3894_vm6 = vcmp.lt.f32.partialorder %v6683_v10, 0 }
 0x389   : > { %1838 = vst.msk [vmem:[#allocation3 + $0x48] sm:$0xff] %vm7627_vm8, %v1828_v29  ;;  %v4461_v33 = vpop.eup %4460  ;;  %4470 = vlog2.f32 %v3682_v8  ;;  %v3942_v31 = vand.u32 2147483647, %v6761_v41  ;;  %v1884_v28 = vsub.f32 %v1843_v0, %v2527_v23  ;;  %vm3895_vm0 = vcmp.eq.f32.partialorder %v6683_v10, 0 }
 0x38a   : > { %v3658_v62 = vmul.f32 0.4, %v4461_v33  ;;  %vm3896_vm1 = vcmp.eq.f32.partialorder %v6683_v10, 1065353216  ;;  %vm6794_vm12 = vcmp.eq.f32.partialorder %v3890_v38, 2139095040  ;;  %vm3907_vm4 = vcmp.ne.f32.partialorder %v6683_v10, %v6683_v10  ;;  %v2529_v38 = vld [vmem:[%s4862_s3 + $0x170] sm:$0xff] }
 0x38b   : > { %v4463_v39 = vpop.eup %4462  ;;  %4472 = vlog2.f32 %v3942_v31  ;;  %v1894_v47 = vsub.f32 %v1853_v51, %v2537_v60  ;;  %vm3660_vm11 = vcmp.lt.f32.partialorder %v6709_v21, 0  ;;  %vm3661_vm3 = vcmp.eq.f32.partialorder %v6709_v21, 0 }
 0x38c   : > { %v3640_v44 = vsel %vm3634_vm9, 2143289344, %v4463_v39  ;;  %4474 = vpow2.f32 %v3658_v62  ;;  %vm6807_vm14 = vcmp.eq.f32.partialorder %v3656_v59, 2139095040  ;;  %v1904_v37 = vmul.f32 %v1884_v28, %v1884_v28  ;;  %v2528_v59 = vld [vmem:[%s4862_s3 + $0x168] sm:$0xff] }
 0x38d   : > { %v4465_v32 = vpop.eup %4464  ;;  %v3641_v22 = vsel %vm3635_vm10, 0, %v3640_v44  ;;  %4476 = vrsqrt.f32 %v6779_v46  ;;  %vm3673_vm5 = vcmp.ne.f32.partialorder %v6709_v21, %v6709_v21  ;;  %vm1963_vm13 = vcmp.eq.f32.partialorder %v6755_v20, inf }
 0x38e   : > { %v3646_v6 = vsel %vm6772_vm2, 2139095040, %v3641_v22  ;;  %v3918_v54 = vmul.f32 0.4, %v4465_v32  ;;  %v1966_v53 = vand.u32 2147483648, %v6755_v20  ;;  %v1914_v58 = vmul.f32 %v1894_v47, %v1894_v47 }
 0x38f   : > { %v4467_v40 = vpop.eup %4466  ;;  %v3650_v17 = vsel %vm3647_vm15, 2143289344, %v3646_v6  ;;  %vm1965_vm8 = vcmp.eq.f32.partialorder %v6755_v20, 0.0  ;;  %v6820_v7 = vadd.f32 1e-06, %v1904_v37  ;;  %vm3662_vm9 = vcmp.eq.f32.partialorder %v6709_v21, 1065353216  ;;  %v1845_v21 = vld [vmem:[%s5125_s10 + $0x30] sm:$0xff] }
 0x390   : > { %4478 = vpow2.f32 %v3918_v54  ;;  %v1962_v49 = vmul.f32 %v4467_v40, %v6755_v20  ;;  %vm3920_vm10 = vcmp.lt.f32.partialorder %v6731_v14, 0  ;;  %vm3921_vm2 = vcmp.eq.f32.partialorder %v6731_v14, 0 }
 0x391   : > { %v4469_v63 = vpop.eup %4468  ;;  %v6829_v48 = vadd.f32 1e-06, %v1914_v58  ;;  %vm6835_vm15 = vcmp.eq.f32.partialorder %v3916_v15, 2139095040  ;;  %4480 = vrsqrt.f32 %v6820_v7  ;;  %v3651_v2 = vsel %vm3636_vm7, 1065353216, %v3650_v17 }
 0x392   : > { %v3900_v61 = vsel %vm3894_vm6, 2143289344, %v4469_v63  ;;  %v1964_v52 = vsel %vm1963_vm13, %v6755_v20, %v1962_v49  ;;  %vm3922_vm6 = vcmp.eq.f32.partialorder %v6731_v14, 1065353216  ;;  %v1885_v27 = vsub.f32 %v1844_v13, %v2528_v59  ;;  %v1855_v13 = vld [vmem:[%s5125_s10 + $0x80] sm:$0xff]  ;;  %v2539_v59 = vld [vmem:[%s4862_s3 + $0x1c0] sm:$0xff] }
 0x393   : > { %v3901_v16 = vsel %vm3895_vm0, 0, %v3900_v61  ;;  %v4471_v50 = vpop.eup %4470  ;;  %v1967_v15 = vsel %vm1965_vm8, %v1966_v53, %v1964_v52  ;;  %4482 = vrsqrt.f32 %v6829_v48  ;;  %vm3933_vm7 = vcmp.ne.f32.partialorder %v6731_v14, %v6731_v14 }
 0x394   : > { %v3906_v3 = vsel %vm6794_vm12, 2139095040, %v3901_v16  ;;  %v3684_v24 = vmul.f32 0.4, %v4471_v50  ;;  %v6855_v4 = vadd.f32 0.01, %v1967_v15  ;;  %vm2033_vm0 = vcmp.eq.f32.partialorder %v6779_v46, inf }
 0x395   : > { %v3910_v56 = vsel %vm3907_vm4, 2143289344, %v3906_v3  ;;  %v4473_v18 = vpop.eup %4472  ;;  %v1895_v19 = vsub.f32 %v1854_v34, %v2538_v11  ;;  %vm3686_vm12 = vcmp.lt.f32.partialorder %v6758_v35, 0  ;;  %vm2035_vm4 = vcmp.eq.f32.partialorder %v6779_v46, 0.0 }
 0x396   : > { %v3911_v25 = vsel %vm3896_vm1, 1065353216, %v3910_v56  ;;  %v4475_v1 = vpop.eup %4474  ;;  %4484 = vpow2.f32 %v3684_v24  ;;  %v3944_v12 = vmul.f32 0.4, %v4473_v18  ;;  %v3708_v20 = vand.u32 2147483647, %v6855_v4 }
 0x397   : > { %v2120_v5 = vadd.f32 %v3911_v25, %v3651_v2  ;;  %v4477_v26 = vpop.eup %4476  ;;  %v3666_v10 = vsel %vm3660_vm11, 2143289344, %v4475_v1  ;;  %vm3687_vm1 = vcmp.eq.f32.partialorder %v6758_v35, 0  ;;  %v2036_v30 = vand.u32 2147483648, %v6779_v46 }
 0x398   : > { %v1905_v45 = vmul.f32 %v1885_v27, %v1885_v27  ;;  %v3667_v29 = vsel %vm3661_vm3, 0, %v3666_v10  ;;  %vm6874_vm13 = vcmp.eq.f32.partialorder %v3682_v8, 2139095040  ;;  %4486 = vpow2.f32 %v3944_v12 }
 0x399   : > { %v2130_v9 = vmul.f32 0.64, %v2120_v5  ;;  %v2032_v0 = vmul.f32 %v4477_v26, %v6779_v46  ;;  %v3672_v33 = vsel %vm6807_vm14, 2139095040, %v3667_v29  ;;  %vm3699_vm8 = vcmp.ne.f32.partialorder %v6758_v35, %v6758_v35 }
 0x39a   : > { %v4479_v23 = vpop.eup %4478  ;;  %vm3947_vm3 = vcmp.eq.f32.partialorder %v6761_v41, 0  ;;  %4488 = vlog2.f32 %v3708_v20  ;;  %v1915_v8 = vmul.f32 %v1895_v19, %v1895_v19  ;;  %v3676_v39 = vsel %vm3673_vm5, 2143289344, %v3672_v33 }
 0x39b   : > { %v2150_v57 = vadd.f32 %v2140_v42, %v2130_v9  ;;  %v3926_v62 = vsel %vm3920_vm10, 2143289344, %v4479_v23  ;;  %vm3688_vm11 = vcmp.eq.f32.partialorder %v6758_v35, 1065353216  ;;  %v2034_v51 = vsel %vm2033_vm0, %v6779_v46, %v2032_v0  ;;  %v4481_v32 = vpop.eup %4480  ;;  %v2142_v23 = vld [vmem:[#allocation3 + $0x10] sm:$0xff] }
 0x39c   : > { %v3927_v60 = vsel %vm3921_vm2, 0, %v3926_v62  ;;  %vm3959_vm14 = vcmp.ne.f32.partialorder %v6761_v41, %v6761_v41  ;;  %v2037_v28 = vsel %vm2035_vm4, %v2036_v30, %v2034_v51  ;;  %vm1970_vm5 = vcmp.eq.f32.partialorder %v6820_v7, inf }
 0x39d   : > { %v6903_v44 = vadd.f32 1e-06, %v1905_v45  ;;  %2160 = vst [vmem:[#allocation3] sm:$0xff] %v2150_v57  ;;  %v3677_v22 = vsel %vm3662_vm9, 1065353216, %v3676_v39  ;;  %v3932_v55 = vsel %vm6835_vm15, 2139095040, %v3927_v60  ;;  %vm3948_vm10 = vcmp.eq.f32.partialorder %v6761_v41, 1065353216  ;;  %v4483_v37 = vpop.eup %4482 }
 0x39e   : > { %v6910_v6 = vadd.f32 0.01, %v2037_v28  ;;  %v1973_v46 = vand.u32 2147483648, %v6820_v7  ;;  %v3936_v54 = vsel %vm3933_vm7, 2143289344, %v3932_v55  ;;  %v1969_v47 = vmul.f32 %v4481_v32, %v6820_v7 }
 0x39f   : > { %vm1972_vm2 = vcmp.eq.f32.partialorder %v6820_v7, 0.0  ;;  %4490 = vrsqrt.f32 %v6903_v44  ;;  %v3937_v40 = vsel %vm3922_vm6, 1065353216, %v3936_v54  ;;  %vm6925_vm9 = vcmp.eq.f32.partialorder %v3942_v31, 2139095040  ;;  %v2141_v31 = vld [vmem:[#allocation3 + $0x8] sm:$0xff] }
 0x3a0   : > { %v3968_v58 = vand.u32 2147483647, %v6910_v6  ;;  %v6930_v63 = vadd.f32 1e-06, %v1915_v8  ;;  %v2121_v17 = vadd.f32 %v3937_v40, %v3677_v22  ;;  %v1971_v49 = vsel %vm1970_vm5, %v6820_v7, %v1969_v47  ;;  %v4485_v61 = vpop.eup %4484  ;;  %v1846_v47 = vld [vmem:[%s5125_s10 + $0x38] sm:$0xff] }
 0x3a1   : > { %vm2040_vm15 = vcmp.eq.f32.partialorder %v6829_v48, inf  ;;  %v2043_v14 = vand.u32 2147483648, %v6829_v48  ;;  %v1974_v16 = vsel %vm1972_vm2, %v1973_v46, %v1971_v49  ;;  %v2039_v43 = vmul.f32 %v4483_v37, %v6829_v48 }
 0x3a2   : > { %4492 = vlog2.f32 %v3968_v58  ;;  %vm2042_vm6 = vcmp.eq.f32.partialorder %v6829_v48, 0.0  ;;  %v2131_v52 = vmul.f32 0.64, %v2121_v17  ;;  %v3692_v34 = vsel %vm3686_vm12, 2143289344, %v4485_v61  ;;  %v4487_v2 = vpop.eup %4486  ;;  %v2540_v61 = vld [vmem:[%s4862_s3 + $0x1c8] sm:$0xff] }
 0x3a3   : > { %v6947_v11 = vadd.f32 0.01, %v1974_v16  ;;  %v1886_v50 = vsub.f32 %v1845_v21, %v2529_v38  ;;  %v3693_v3 = vsel %vm3687_vm1, 0, %v3692_v34  ;;  %v2041_v7 = vsel %vm2040_vm15, %v6829_v48, %v2039_v43  ;;  %v2530_v21 = vld [vmem:[%s4862_s3 + $0x178] sm:$0xff] }
 0x3a4   : > { %4494 = vrsqrt.f32 %v6930_v63  ;;  %v1896_v15 = vsub.f32 %v1855_v13, %v2539_v59  ;;  %v4489_v27 = vpop.eup %4488  ;;  %v2151_v56 = vadd.f32 %v2141_v31, %v2131_v52  ;;  %v3698_v24 = vsel %vm6874_vm13, 2139095040, %v3693_v3  ;;  %v1856_v59 = vld [vmem:[%s5125_s10 + $0x88] sm:$0xff] }
 0x3a5   : > { %vm7640_vm7 = vcmp.lt.f32.partialorder %v6761_v41, 0  ;;  %v2044_v25 = vsel %vm2042_vm6, %v2043_v14, %v2041_v7  ;;  %v3702_v19 = vsel %vm3699_vm8, 2143289344, %v3698_v24  ;;  %v3710_v48 = vmul.f32 0.4, %v4489_v27 }
 0x3a6   : > { %v3952_v18 = vsel %vm7640_vm7, 2143289344, %v4487_v2  ;;  %v6964_v5 = vadd.f32 0.01, %v2044_v25  ;;  %vm7641_vm0 = vcmask 261120   ;;  %v3703_v12 = vsel %vm3688_vm11, 1065353216, %v3702_v19 }
 0x3a7   : > { %v3953_v1 = vsel %vm3947_vm3, 0, %v3952_v18  ;;  %2161 = vst.msk [vmem:[#allocation3 + $0x8] sm:$0xff] %vm7641_vm0, %v2151_v56  ;;  %v3734_v42 = vand.u32 2147483647, %v6947_v11  ;;  %4496 = vpow2.f32 %v3710_v48  ;;  %v1906_v9 = vmul.f32 %v1886_v50, %v1886_v50 }
 0x3a8   : > { %v3958_v26 = vsel %vm6925_vm9, 2139095040, %v3953_v1  ;;  %v1916_v35 = vmul.f32 %v1896_v15, %v1896_v15  ;;  %v3994_v36 = vand.u32 2147483647, %v6964_v5  ;;  %vm1977_vm12 = vcmp.eq.f32.partialorder %v6903_v44, inf }
 0x3a9   : > { %v3962_v10 = vsel %vm3959_vm14, 2143289344, %v3958_v26  ;;  %v4491_v30 = vpop.eup %4490  ;;  %4498 = vlog2.f32 %v3734_v42  ;;  %v1980_v0 = vand.u32 2147483648, %v6903_v44  ;;  %vm1979_vm1 = vcmp.eq.f32.partialorder %v6903_v44, 0.0 }
 0x3aa   : > { %v3963_v45 = vsel %vm3948_vm10, 1065353216, %v3962_v10  ;;  %v1976_v33 = vmul.f32 %v4491_v30, %v6903_v44  ;;  %4500 = vlog2.f32 %v3994_v36  ;;  %vm2047_vm4 = vcmp.eq.f32.partialorder %v6930_v63, inf }
 0x3ab   : > { %v2122_v29 = vadd.f32 %v3963_v45, %v3703_v12  ;;  %v6988_v62 = vadd.f32 1e-06, %v1906_v9  ;;  %v2050_v32 = vand.u32 2147483648, %v6930_v63  ;;  %v6993_v22 = vadd.f32 1e-06, %v1916_v35  ;;  %v1847_v45 = vld [vmem:[%s5125_s10 + $0x40] sm:$0xff] }
 0x3ac   : > { %v4493_v8 = vpop.eup %4492  ;;  %v1978_v39 = vsel %vm1977_vm12, %v6903_v44, %v1976_v33  ;;  %vm2049_vm13 = vcmp.eq.f32.partialorder %v6930_v63, 0.0  ;;  %vm3712_vm11 = vcmp.lt.f32.partialorder %v6855_v4, 0  ;;  %vm3713_vm8 = vcmp.eq.f32.partialorder %v6855_v4, 0  ;;  %v2531_v9 = vld [vmem:[%s4862_s3 + $0x180] sm:$0xff] }
 0x3ad   : > { %v2132_v41 = vmul.f32 0.64, %v2122_v29  ;;  %v3970_v57 = vmul.f32 0.4, %v4493_v8  ;;  %v1981_v28 = vsel %vm1979_vm1, %v1980_v0, %v1978_v39  ;;  %vm7010_vm3 = vcmp.eq.f32.partialorder %v3708_v20, 2139095040  ;;  %v1857_v33 = vld [vmem:[%s5125_s10 + $0x90] sm:$0xff] }
 0x3ae   : > { %v4495_v51 = vpop.eup %4494  ;;  %v6997_v44 = vadd.f32 0.01, %v1981_v28  ;;  %vm3714_vm14 = vcmp.eq.f32.partialorder %v6855_v4, 1065353216  ;;  %v1887_v13 = vsub.f32 %v1846_v47, %v2530_v21  ;;  %vm3725_vm5 = vcmp.ne.f32.partialorder %v6855_v4, %v6855_v4  ;;  %v2541_v8 = vld [vmem:[%s4862_s3 + $0x1d0] sm:$0xff] }
 0x3af   : > { %v6990_v60 = vadd.f32 %v2142_v23, %v2132_v41  ;;  %4502 = vpow2.f32 %v3970_v57  ;;  %v2046_v55 = vmul.f32 %v4495_v51, %v6930_v63  ;;  %vm3972_vm10 = vcmp.lt.f32.partialorder %v6910_v6, 0 }
 0x3b0   : > { %4504 = vrsqrt.f32 %v6988_v62  ;;  %v3760_v54 = vand.u32 2147483647, %v6997_v44  ;;  %vm3973_vm2 = vcmp.eq.f32.partialorder %v6910_v6, 0  ;;  %vm3974_vm9 = vcmp.eq.f32.partialorder %v6910_v6, 1065353216 }
 0x3b1   : > { %2162 = vst [vmem:[#allocation3 + $0x10] sm:$0xff] %v6990_v60  ;;  %v2048_v46 = vsel %vm2047_vm4, %v6930_v63, %v2046_v55  ;;  %v4497_v38 = vpop.eup %4496  ;;  %4506 = vrsqrt.f32 %v6993_v22  ;;  %vm3985_vm15 = vcmp.ne.f32.partialorder %v6910_v6, %v6910_v6  ;;  %vm7033_vm6 = vcmp.eq.f32.partialorder %v3968_v58, 2139095040 }
 0x3b2   : > { %v2051_v37 = vsel %vm2049_vm13, %v2050_v32, %v2048_v46  ;;  %v3718_v17 = vsel %vm3712_vm11, 2143289344, %v4497_v38  ;;  %4508 = vlog2.f32 %v3760_v54  ;;  %vm3738_vm7 = vcmp.lt.f32.partialorder %v6947_v11, 0 }
 0x3b3   : > { %v4499_v40 = vpop.eup %4498  ;;  %v7014_v49 = vadd.f32 0.01, %v2051_v37  ;;  %v3719_v63 = vsel %vm3713_vm8, 0, %v3718_v17  ;;  %vm3739_vm0 = vcmp.eq.f32.partialorder %v6947_v11, 0  ;;  %vm7043_vm12 = vcmp.eq.f32.partialorder %v3734_v42, 2139095040 }
 0x3b4   : > { %v3736_v14 = vmul.f32 0.4, %v4499_v40  ;;  %v4501_v31 = vpop.eup %4500  ;;  %v3724_v16 = vsel %vm7010_vm3, 2139095040, %v3719_v63  ;;  %v1897_v50 = vsub.f32 %v1856_v59, %v2540_v61  ;;  %v1907_v2 = vmul.f32 %v1887_v13, %v1887_v13  ;;  %v1848_v63 = vld [vmem:[%s5125_s10 + $0x48] sm:$0xff] }
 0x3b5   : > { %v4020_v20 = vand.u32 2147483647, %v7014_v49  ;;  %v3996_v52 = vmul.f32 0.4, %v4501_v31  ;;  %v3728_v3 = vsel %vm3725_vm5, 2143289344, %v3724_v16  ;;  %vm3751_vm1 = vcmp.ne.f32.partialorder %v6947_v11, %v6947_v11 }
 0x3b6   : > { %4510 = vpow2.f32 %v3736_v14  ;;  %vm3998_vm4 = vcmp.lt.f32.partialorder %v6964_v5, 0  ;;  %vm1984_vm13 = vcmp.eq.f32.partialorder %v6988_v62, inf  ;;  %vm1986_vm11 = vcmp.eq.f32.partialorder %v6988_v62, 0.0  ;;  %v2532_v14 = vld [vmem:[%s4862_s3 + $0x188] sm:$0xff] }
 0x3b7   : > { %4512 = vlog2.f32 %v4020_v20  ;;  %vm3999_vm8 = vcmp.eq.f32.partialorder %v6964_v5, 0  ;;  %v1987_v27 = vand.u32 2147483648, %v6988_v62  ;;  %v1917_v56 = vmul.f32 %v1897_v50, %v1897_v50 }
 0x3b8   : > { %4514 = vpow2.f32 %v3996_v52  ;;  %v7059_v24 = vadd.f32 1e-06, %v1907_v2  ;;  %vm3740_vm3 = vcmp.eq.f32.partialorder %v6947_v11, 1065353216  ;;  %vm2054_vm5 = vcmp.eq.f32.partialorder %v6993_v22, inf }
 0x3b9   : > { %v4503_v58 = vpop.eup %4502  ;;  %v2057_v19 = vand.u32 2147483648, %v6993_v22  ;;  %v3729_v48 = vsel %vm3714_vm14, 1065353216, %v3728_v3  ;;  %v7073_v26 = vadd.f32 1e-06, %v1917_v56  ;;  %vm2056_vm14 = vcmp.eq.f32.partialorder %v6993_v22, 0.0 }
 0x3ba   : > { %v4505_v7 = vpop.eup %4504  ;;  %v3978_v15 = vsel %vm3972_vm10, 2143289344, %v4503_v58  ;;  %vm4011_vm10 = vcmp.ne.f32.partialorder %v6964_v5, %v6964_v5  ;;  %4516 = vrsqrt.f32 %v7059_v24  ;;  %v1888_v51 = vsub.f32 %v1847_v45, %v2531_v9 }
 0x3bb   : > { %v3979_v18 = vsel %vm3973_vm2, 0, %v3978_v15  ;;  %v1983_v25 = vmul.f32 %v4505_v7, %v6988_v62  ;;  %v4507_v1 = vpop.eup %4506  ;;  %vm4000_vm2 = vcmp.eq.f32.partialorder %v6964_v5, 1065353216  ;;  %4518 = vrsqrt.f32 %v7073_v26 }
 0x3bc   : > { %v3984_v12 = vsel %vm7033_vm6, 2139095040, %v3979_v18  ;;  %v4509_v42 = vpop.eup %4508  ;;  %v2053_v30 = vmul.f32 %v4507_v1, %v6993_v22  ;;  %vm7091_vm6 = vcmp.eq.f32.partialorder %v3994_v36, 2139095040  ;;  %v2143_v36 = vld [vmem:[#allocation3 + $0x18] sm:$0xff]  ;;  %v1898_v47 = vsub.f32 %v1857_v33, %v2541_v8 }
 0x3bd   : > { %v3988_v10 = vsel %vm3985_vm15, 2143289344, %v3984_v12  ;;  %v1985_v4 = vsel %vm1984_vm13, %v6988_v62, %v1983_v25  ;;  %v3762_v0 = vmul.f32 0.4, %v4509_v42  ;;  %vm3765_vm15 = vcmp.eq.f32.partialorder %v6997_v44, 0  ;;  %v1858_v25 = vld [vmem:[%s5125_s10 + $0x98] sm:$0xff] }
 0x3be   : > { %v3989_v35 = vsel %vm3974_vm9, 1065353216, %v3988_v10  ;;  %v1988_v23 = vsel %vm1986_vm11, %v1987_v27, %v1985_v4  ;;  %v2055_v57 = vsel %vm2054_vm5, %v6993_v22, %v2053_v30  ;;  %vm3764_vm9 = vcmp.lt.f32.partialorder %v6997_v44, 0 }
 0x3bf   : > { %v2123_v41 = vadd.f32 %v3989_v35, %v3729_v48  ;;  %v7102_v39 = vadd.f32 0.01, %v1988_v23  ;;  %4520 = vpow2.f32 %v3762_v0  ;;  %v2058_v62 = vsel %vm2056_vm14, %v2057_v19, %v2055_v57  ;;  %v2542_v19 = vld [vmem:[%s4862_s3 + $0x1d8] sm:$0xff]  ;;  %v2144_v48 = vld [vmem:[#allocation3 + $0x20] sm:$0xff] }
 0x3c0   : > { %v4511_v6 = vpop.eup %4510  ;;  %v7110_v46 = vadd.f32 0.01, %v2058_v62  ;;  %vm7120_vm13 = vcmp.eq.f32.partialorder %v3760_v54, 2139095040  ;;  %v1908_v61 = vmul.f32 %v1888_v51, %v1888_v51  ;;  %v1918_v16 = vmul.f32 %v1898_v47, %v1898_v47 }
 0x3c1   : > { %v4513_v28 = vpop.eup %4512  ;;  %v2133_v32 = vmul.f32 0.64, %v2123_v41  ;;  %v3744_v55 = vsel %vm3738_vm7, 2143289344, %v4511_v6  ;;  %v3786_v22 = vand.u32 2147483647, %v7102_v39  ;;  %vm3777_vm7 = vcmp.ne.f32.partialorder %v6997_v44, %v6997_v44 }
 0x3c2   : > { %v3745_v21 = vsel %vm3739_vm0, 0, %v3744_v55  ;;  %v4022_v38 = vmul.f32 0.4, %v4513_v28  ;;  %v4515_v37 = vpop.eup %4514  ;;  %vm4024_vm0 = vcmp.lt.f32.partialorder %v7014_v49, 0  ;;  %v4046_v31 = vand.u32 2147483647, %v7110_v46 }
 0x3c3   : > { %v2153_v40 = vadd.f32 %v2143_v36, %v2133_v32  ;;  %v3750_v53 = vsel %vm7043_vm12, 2139095040, %v3745_v21  ;;  %v4004_v59 = vsel %vm3998_vm4, 2143289344, %v4515_v37  ;;  %vm7652_vm12 = vcmask 261120   ;;  %v7213_v21 = vld [vmem:[%s4860_s17] sm:$0xff] }
 0x3c4   : > { %v3754_v13 = vsel %vm3751_vm1, 2143289344, %v3750_v53  ;;  %4522 = vpow2.f32 %v4022_v38  ;;  %v4005_v54 = vsel %vm3999_vm8, 0, %v4004_v59  ;;  %v4517_v43 = vpop.eup %4516  ;;  %vm3766_vm1 = vcmp.eq.f32.partialorder %v6997_v44, 1065353216 }
 0x3c5   : > { %2163 = vst.msk [vmem:[#allocation3 + $0x18] sm:$0xff] %vm7652_vm12, %v2153_v40  ;;  %4524 = vlog2.f32 %v3786_v22  ;;  %v3755_v52 = vsel %vm3740_vm3, 1065353216, %v3754_v13  ;;  %v4010_v34 = vsel %vm7091_vm6, 2139095040, %v4005_v54  ;;  %vm4025_vm4 = vcmp.eq.f32.partialorder %v7014_v49, 0  ;;  %v4519_v15 = vpop.eup %4518  ;;  %v2181_v40 = vld [vmem:[#allocation3] sm:$0xff] }
 0x3c6   : > { %v1889_v50 = vsub.f32 %v1848_v63, %v2532_v14  ;;  %v4014_v2 = vsel %vm4011_vm10, 2143289344, %v4010_v34  ;;  %4526 = vlog2.f32 %v4046_v31  ;;  %vm1991_vm11 = vcmp.eq.f32.partialorder %v7059_v24, inf  ;;  %v2145_v14 = vld [vmem:[#allocation3 + $0x28] sm:$0xff] }
 0x3c7   : > { %v1994_v11 = vand.u32 2147483648, %v7059_v24  ;;  %v4015_v58 = vsel %vm4000_vm2, 1065353216, %v4014_v2  ;;  %v1990_v3 = vmul.f32 %v4517_v43, %v7059_v24  ;;  %vm1993_vm8 = vcmp.eq.f32.partialorder %v7059_v24, 0.0 }
 0x3c8   : > { %v7157_v7 = vadd.f32 1e-06, %v1908_v61  ;;  %v2124_v27 = vadd.f32 %v4015_v58, %v3755_v52  ;;  %vm2061_vm3 = vcmp.eq.f32.partialorder %v7073_v26, inf  ;;  %v2064_v56 = vand.u32 2147483648, %v7073_v26 }
 0x3c9   : > { %v7161_v18 = vadd.f32 1e-06, %v1918_v16  ;;  %v4521_v1 = vpop.eup %4520  ;;  %v1992_v5 = vsel %vm1991_vm11, %v7059_v24, %v1990_v3  ;;  %v2060_v12 = vmul.f32 %v4519_v15, %v7073_v26  ;;  %vm2063_vm5 = vcmp.eq.f32.partialorder %v7073_v26, 0.0 }
 0x3ca   : > { %4528 = vrsqrt.f32 %v7157_v7  ;;  %v2134_v42 = vmul.f32 0.64, %v2124_v27  ;;  %v3770_v10 = vsel %vm3764_vm9, 2143289344, %v4521_v1  ;;  %vm7173_vm10 = vcmp.eq.f32.partialorder %v4020_v20, 2139095040 }
 0x3cb   : > { %v1995_v30 = vsel %vm1993_vm8, %v1994_v11, %v1992_v5  ;;  %v3771_v45 = vsel %vm3765_vm15, 0, %v3770_v10  ;;  %v2062_v9 = vsel %vm2061_vm3, %v7073_v26, %v2060_v12  ;;  %v1899_v29 = vsub.f32 %v1858_v25, %v2542_v19  ;;  %v7236_v11 = vld [vmem:[%s4860_s17 + $0x10] sm:$0xff] }
 0x3cc   : > { %v7184_v35 = vadd.f32 0.01, %v1995_v30  ;;  %v7186_v0 = vadd.f32 %v2144_v48, %v2134_v42  ;;  %v3776_v20 = vsel %vm7120_vm13, 2139095040, %v3771_v45  ;;  %v2065_v23 = vsel %vm2063_vm5, %v2064_v56, %v2062_v9 }
 0x3cd   : > { %4530 = vrsqrt.f32 %v7161_v18  ;;  %v3780_v33 = vsel %vm3777_vm7, 2143289344, %v3776_v20  ;;  %v7194_v8 = vadd.f32 0.01, %v2065_v23  ;;  %v1909_v41 = vmul.f32 %v1889_v50, %v1889_v50 }
 0x3ce   : > { %v4523_v24 = vpop.eup %4522  ;;  %v3812_v26 = vand.u32 2147483647, %v7184_v35  ;;  %2164 = vst [vmem:[#allocation3 + $0x20] sm:$0xff] %v7186_v0  ;;  %vm4037_vm2 = vcmp.ne.f32.partialorder %v7014_v49, %v7014_v49  ;;  %vm4026_vm14 = vcmp.eq.f32.partialorder %v7014_v49, 1065353216  ;;  %v3781_v28 = vsel %vm3766_vm1, 1065353216, %v3780_v33 }
 0x3cf   : > { %v4525_v57 = vpop.eup %4524  ;;  %v4030_v6 = vsel %vm4024_vm0, 2143289344, %v4523_v24  ;;  %v4072_v55 = vand.u32 2147483647, %v7194_v8  ;;  %v1919_v47 = vmul.f32 %v1899_v29, %v1899_v29  ;;  %v7215_v37 = vadd.f32 1e-06, %v1909_v41 }
 0x3d0   : > { %v4031_v36 = vsel %vm4025_vm4, 0, %v4030_v6  ;;  %v3788_v62 = vmul.f32 0.4, %v4525_v57  ;;  %4532 = vlog2.f32 %v3812_v26  ;;  %v4527_v51 = vpop.eup %4526  ;;  %vm1998_vm6 = vcmp.eq.f32.partialorder %v7157_v7, inf }
 0x3d1   : > { %v4036_v32 = vsel %vm7173_vm10, 2139095040, %v4031_v36  ;;  %v4048_v49 = vmul.f32 0.4, %v4527_v51  ;;  %v2001_v63 = vand.u32 2147483648, %v7157_v7  ;;  %vm2000_vm9 = vcmp.eq.f32.partialorder %v7157_v7, 0.0 }
 0x3d2   : > { %v4040_v38 = vsel %vm4037_vm2, 2143289344, %v4036_v32  ;;  %4534 = vpow2.f32 %v3788_v62  ;;  %v7223_v59 = vadd.f32 1e-06, %v1919_v47  ;;  %v2191_v61 = vmul.f32 %v2181_v40, %v7213_v21 }
 0x3d3   : > { %v4041_v53 = vsel %vm4026_vm14, 1065353216, %v4040_v38  ;;  %4536 = vlog2.f32 %v4072_v55  ;;  %vm3790_vm15 = vcmp.lt.f32.partialorder %v7102_v39, 0  ;;  %vm3791_vm13 = vcmp.eq.f32.partialorder %v7102_v39, 0  ;;  %v2146_v38 = vld [vmem:[#allocation3 + $0x30] sm:$0xff] }
 0x3d4   : > { %v4529_v44 = vpop.eup %4528  ;;  %v2125_v17 = vadd.f32 %v4041_v53, %v3781_v28  ;;  %4538 = vpow2.f32 %v4048_v49  ;;  %vm2068_vm7 = vcmp.eq.f32.partialorder %v7161_v18, inf  ;;  %v2071_v52 = vand.u32 2147483648, %v7161_v18 }
 0x3d5   : > { %v1997_v13 = vmul.f32 %v4529_v44, %v7157_v7  ;;  %4540 = vrsqrt.f32 %v7215_v37  ;;  %vm2070_vm0 = vcmp.eq.f32.partialorder %v7161_v18, 0.0  ;;  %vm3792_vm12 = vcmp.eq.f32.partialorder %v7102_v39, 1065353216 }
 0x3d6   : > { %v2135_v54 = vmul.f32 0.64, %v2125_v17  ;;  %4542 = vrsqrt.f32 %v7223_v59  ;;  %vm7241_vm1 = vcmp.eq.f32.partialorder %v3786_v22, 2139095040  ;;  %vm3803_vm4 = vcmp.ne.f32.partialorder %v7102_v39, %v7102_v39 }
 0x3d7   : > { %v4531_v16 = vpop.eup %4530  ;;  %v1999_v43 = vsel %vm1998_vm6, %v7157_v7, %v1997_v13  ;;  %vm7657_vm11 = vcmask 261120   ;;  %vm4050_vm8 = vcmp.lt.f32.partialorder %v7110_v46, 0  ;;  %vm4051_vm3 = vcmp.eq.f32.partialorder %v7110_v46, 0 }
 0x3d8   : > { %v2155_v34 = vadd.f32 %v2145_v14, %v2135_v54  ;;  %v2002_v50 = vsel %vm2000_vm9, %v2001_v63, %v1999_v43  ;;  %v2067_v2 = vmul.f32 %v4531_v16, %v7161_v18  ;;  %vm4052_vm5 = vcmp.eq.f32.partialorder %v7110_v46, 1065353216 }
 0x3d9   : > { %v7247_v3 = vadd.f32 0.01, %v2002_v50  ;;  %v2193_v25 = vmul.f32 %v7236_v11, %v6990_v60  ;;  %vm7261_vm10 = vcmp.eq.f32.partialorder %v4046_v31, 2139095040  ;;  %vm4063_vm2 = vcmp.ne.f32.partialorder %v7110_v46, %v7110_v46 }
 0x3da   : > { %v4533_v7 = vpop.eup %4532  ;;  %2165 = vst.msk [vmem:[#allocation3 + $0x28] sm:$0xff] %vm7657_vm11, %v2155_v34  ;;  %v2069_v22 = vsel %vm2068_vm7, %v7161_v18, %v2067_v2  ;;  %vm2005_vm14 = vcmp.eq.f32.partialorder %v7215_v37, inf  ;;  %v7271_v18 = vld [vmem:[%s4860_s17 + $0x20] sm:$0xff]  ;;  %vm2007_vm6 = vcmp.eq.f32.partialorder %v7215_v37, 0.0  ;;  %v2008_v31 = vand.u32 2147483648, %v7215_v37 }
 0x3db   : > { %v3814_v15 = vmul.f32 0.4, %v4533_v7  ;;  %v2072_v27 = vsel %vm2070_vm0, %v2071_v52, %v2069_v22  ;;  %v3838_v56 = vand.u32 2147483647, %v7247_v3  ;;  %v2195_v9 = vmul.f32 %v7271_v18, %v7186_v0 }
 0x3dc   : > { %v4535_v19 = vpop.eup %4534  ;;  %v7267_v48 = vadd.f32 0.01, %v2072_v27  ;;  %v2201_v29 = vadd.f32 %v2193_v25, %v2191_v61  ;;  %vm2075_vm9 = vcmp.eq.f32.partialorder %v7223_v59, inf  ;;  %v2078_v0 = vand.u32 2147483648, %v7223_v59  ;;  %v7364_v27 = vld [vmem:[%s4860_s17 + $0x8] sm:$0xff] }
 0x3dd   : > { %v4537_v5 = vpop.eup %4536  ;;  %v3796_v60 = vsel %vm3790_vm15, 2143289344, %v4535_v19  ;;  %4544 = vpow2.f32 %v3814_v15  ;;  %vm2077_vm15 = vcmp.eq.f32.partialorder %v7223_v59, 0.0  ;;  %vm3817_vm7 = vcmp.eq.f32.partialorder %v7184_v35, 0 }
 0x3de   : > { %v4539_v12 = vpop.eup %4538  ;;  %v3797_v42 = vsel %vm3791_vm13, 0, %v3796_v60  ;;  %v4074_v10 = vmul.f32 0.4, %v4537_v5  ;;  %4546 = vlog2.f32 %v3838_v56  ;;  %v4098_v4 = vand.u32 2147483647, %v7267_v48  ;;  %v2147_v60 = vld [vmem:[#allocation3 + $0x38] sm:$0xff] }
 0x3df   : > { %v3802_v30 = vsel %vm7241_vm1, 2139095040, %v3797_v42  ;;  %v4056_v45 = vsel %vm4050_vm8, 2143289344, %v4539_v12  ;;  %v4541_v20 = vpop.eup %4540  ;;  %v7309_v51 = vadd.f32 %v2201_v29, %v2195_v9  ;;  %vm3816_vm13 = vcmp.lt.f32.partialorder %v7184_v35, 0  ;;  %v7381_v12 = vld [vmem:[%s4860_s17 + $0x38] sm:$0xff]  ;;  %v7394_v29 = vld [vmem:[%s4860_s17 + $0x48] sm:$0xff] }
 0x3e0   : > { %v3806_v23 = vsel %vm3803_vm4, 2143289344, %v3802_v30  ;;  %v4057_v24 = vsel %vm4051_vm3, 0, %v4056_v45  ;;  %4548 = vpow2.f32 %v4074_v10  ;;  %v4543_v33 = vpop.eup %4542  ;;  %v2004_v36 = vmul.f32 %v4541_v20, %v7215_v37 }
 0x3e1   : > { %v3807_v41 = vsel %vm3792_vm12, 1065353216, %v3806_v23  ;;  %v4062_v57 = vsel %vm7261_vm10, 2139095040, %v4057_v24  ;;  %4550 = vlog2.f32 %v4098_v4  ;;  %v2074_v62 = vmul.f32 %v4543_v33, %v7223_v59 }
 0x3e2   : > { %v4066_v6 = vsel %vm4063_vm2, 2143289344, %v4062_v57  ;;  %v2006_v32 = vsel %vm2005_vm14, %v7215_v37, %v2004_v36  ;;  %vm7323_vm0 = vcmp.eq.f32.partialorder %v3812_v26, 2139095040  ;;  %vm3829_vm12 = vcmp.ne.f32.partialorder %v7184_v35, %v7184_v35 }
 0x3e3   : > { %v4067_v39 = vsel %vm4052_vm5, 1065353216, %v4066_v6  ;;  %v2076_v47 = vsel %vm2075_vm9, %v7223_v59, %v2074_v62  ;;  %v2009_v49 = vsel %vm2007_vm6, %v2008_v31, %v2006_v32  ;;  %vm4076_vm1 = vcmp.lt.f32.partialorder %v7194_v8, 0  ;;  %v7378_v31 = vld [vmem:[%s4860_s17 + $0x30] sm:$0xff] }
 0x3e4   : > { %v2126_v28 = vadd.f32 %v4067_v39, %v3807_v41  ;;  %v2079_v40 = vsel %vm2077_vm15, %v2078_v0, %v2076_v47  ;;  %v7319_v46 = vadd.f32 0.01, %v2009_v49  ;;  %vm3818_vm4 = vcmp.eq.f32.partialorder %v7184_v35, 1065353216  ;;  %v2149_v49 = vld [vmem:[#allocation3 + $0x48] sm:$0xff] }
 0x3e5   : > { %v7329_v63 = vadd.f32 0.01, %v2079_v40  ;;  %vm4077_vm11 = vcmp.eq.f32.partialorder %v7194_v8, 0  ;;  %vm7342_vm8 = vcmp.eq.f32.partialorder %v4072_v55, 2139095040  ;;  %vm4089_vm3 = vcmp.ne.f32.partialorder %v7194_v8, %v7194_v8 }
 0x3e6   : > { %v2136_v53 = vmul.f32 0.64, %v2126_v28  ;;  %v3864_v59 = vand.u32 2147483647, %v7319_v46  ;;  %vm4078_vm5 = vcmp.eq.f32.partialorder %v7194_v8, 1065353216  ;;  %v2252_v7 = vadd.f32 %v7236_v11, %v7213_v21  ;;  %v7369_v21 = vld [vmem:[%s4860_s17 + $0x18] sm:$0xff] }
 0x3e7   : > { %v4545_v44 = vpop.eup %4544  ;;  %v4124_v55 = vand.u32 2147483647, %v7329_v63  ;;  %vm7664_vm10 = vcmask 261120   ;;  %v7372_v11 = vld [vmem:[%s4860_s17 + $0x28] sm:$0xff]  ;;  %vm3842_vm9 = vcmp.lt.f32.partialorder %v7247_v3, 0  ;;  %vm3843_vm15 = vcmp.eq.f32.partialorder %v7247_v3, 0 }
 0x3e8   : > { %v4547_v37 = vpop.eup %4546  ;;  %v7331_v14 = vadd.f32 %v2146_v38, %v2136_v53  ;;  %v3822_v13 = vsel %vm3816_vm13, 2143289344, %v4545_v44  ;;  %4552 = vlog2.f32 %v3864_v59  ;;  %v2262_v8 = vsel %vm7664_vm10, %v7364_v27, 0.0  ;;  %vm7665_vm2 = vmmov %vm7664_vm10 }
 0x3e9   : > { %v3823_v61 = vsel %vm3817_vm7, 0, %v3822_v13  ;;  %v3840_v26 = vmul.f32 0.4, %v4547_v37  ;;  %v2253_v1 = vadd.f32 %v2252_v7, %v7271_v18  ;;  %v2263_v5 = vsel %vm7665_vm2, %v7369_v21, 0.0  ;;  %vm7666_vm14 = vmmov %vm7665_vm2  ;;  %v7391_v18 = vld [vmem:[%s4860_s17 + $0x40] sm:$0xff] }
 0x3ea   : > { %v4549_v54 = vpop.eup %4548  ;;  %2166 = vst [vmem:[#allocation3 + $0x30] sm:$0xff] %v7331_v14  ;;  %v3828_v16 = vsel %vm7323_vm0, 2139095040, %v3823_v61  ;;  %v2264_v42 = vadd.f32 %v2263_v5, %v2262_v8  ;;  %v2265_v10 = vsel %vm7666_vm14, %v7372_v11, 0.0  ;;  %vm7667_vm6 = vmmov %vm7665_vm2  ;;  %vm3844_vm13 = vcmp.eq.f32.partialorder %v7247_v3, 1065353216 }
 0x3eb   : > { %v4551_v52 = vpop.eup %4550  ;;  %v3832_v34 = vsel %vm3829_vm12, 2143289344, %v3828_v16  ;;  %v4082_v50 = vsel %vm4076_vm1, 2143289344, %v4549_v54  ;;  %4554 = vpow2.f32 %v3840_v26  ;;  %v2254_v45 = vadd.f32 %v2253_v1, %v7378_v31  ;;  %vm7668_vm7 = vmmov %vm7665_vm2 }
 0x3ec   : > { %v4083_v2 = vsel %vm4077_vm11, 0, %v4082_v50  ;;  %v4100_v58 = vmul.f32 0.4, %v4551_v52  ;;  %v3833_v22 = vsel %vm3818_vm4, 1065353216, %v3832_v34  ;;  %4556 = vlog2.f32 %v4124_v55  ;;  %vm7671_vm1 = vmmov %vm7665_vm2 }
 0x3ed   : > { %v4088_v15 = vsel %vm7342_vm8, 2139095040, %v4083_v2  ;;  %v2267_v9 = vsel %vm7667_vm6, %v7381_v12, 0.0  ;;  %v2266_v20 = vadd.f32 %v2265_v10, %v2264_v42  ;;  %v2255_v33 = vadd.f32 %v2254_v45, %v7391_v18 }
 0x3ee   : > { %v4092_v25 = vsel %vm4089_vm3, 2143289344, %v4088_v15  ;;  %4558 = vpow2.f32 %v4100_v58  ;;  %v2269_v41 = vsel %vm7668_vm7, %v7394_v29, 0.0  ;;  %vm7402_vm0 = vcmp.eq.f32.partialorder %v3838_v56, 2139095040  ;;  %v2148_v15 = vld [vmem:[#allocation3 + $0x40] sm:$0xff] }
 0x3ef   : > { %v4093_v19 = vsel %vm4078_vm5, 1065353216, %v4092_v25  ;;  %vm3855_vm12 = vcmp.ne.f32.partialorder %v7247_v3, %v7247_v3  ;;  %v2268_v36 = vadd.f32 %v2267_v9, %v2266_v20  ;;  %vm4102_vm4 = vcmp.lt.f32.partialorder %v7267_v48, 0 }
 0x3f0   : > { %v2127_v35 = vadd.f32 %v4093_v19, %v3833_v22  ;;  %vm4103_vm11 = vcmp.eq.f32.partialorder %v7267_v48, 0  ;;  %v2256_v39 = vrot.slane %v2255_v33, 4  ;;  %vm4104_vm8 = vcmp.eq.f32.partialorder %v7267_v48, 1065353216 }
 0x3f1   : > { %v2270_v32 = vadd.f32 %v2269_v41, %v2268_v36  ;;  %vm7420_vm3 = vcmp.eq.f32.partialorder %v4098_v4, 2139095040  ;;  %vm4115_vm5 = vcmp.ne.f32.partialorder %v7267_v48, %v7267_v48  ;;  %v4623_v61 = vmov 1966171168  }
 0x3f2   : > { %v2137_v30 = vmul.f32 0.64, %v2127_v35  ;;  %v4553_v23 = vpop.eup %4552  ;;  %v2257_v53 = vadd.f32 %v2256_v39, %v2255_v33  ;;  %v2230_v4 = vunpack.c.l.s4 %v4623_v61  ;;  %v2232_v43 = vlaneseq  ;;  %v2184_v33 = vld [vmem:[#allocation3 + $0x18] sm:$0xff] }
 0x3f3   : > { %v3866_v6 = vmul.f32 0.4, %v4553_v23  ;;  %v2271_v37 = vrot.slane %v2270_v32, 4  ;;  %vm3868_vm10 = vcmp.lt.f32.partialorder %v7319_v46, 0  ;;  %vm3869_vm2 = vcmp.eq.f32.partialorder %v7319_v46, 0 }
 0x3f4   : > { %v2157_v24 = vadd.f32 %v2147_v60, %v2137_v30  ;;  %v2258_v26 = vrot.slane %v2257_v53, 2  ;;  %v2231_v25 = vunpack.c.0.s8 %v2230_v4  ;;  %v2233_v8 = vshrl.u32 %v2232_v43, 7 }
 0x3f5   : > { %v4555_v57 = vpop.eup %4554  ;;  %4560 = vpow2.f32 %v3866_v6  ;;  %v2272_v52 = vadd.f32 %v2271_v37, %v2270_v32  ;;  %vm7441_vm14 = vcmp.eq.f32.partialorder %v3864_v59, 2139095040  ;;  %vm3881_vm6 = vcmp.ne.f32.partialorder %v7319_v46, %v7319_v46  ;;  %v2186_v32 = vld [vmem:[#allocation3 + $0x28] sm:$0xff] }
 0x3f6   : > { %2167 = vst.msk [vmem:[#allocation3 + $0x38] sm:$0xff] %vm7671_vm1, %v2157_v24  ;;  %v3848_v62 = vsel %vm3842_vm9, 2143289344, %v4555_v57  ;;  %v4557_v28 = vpop.eup %4556  ;;  %v2259_v50 = vadd.f32 %v2258_v26, %v2257_v53  ;;  %vm4128_vm9 = vcmp.lt.f32.partialorder %v7329_v63, 0  ;;  %v7449_v30 = vsub.s32 %v2231_v25, %v2233_v8  ;;  %v2182_v24 = vld [vmem:[#allocation3 + $0x8] sm:$0xff] }
 0x3f7   : > { %v3849_v56 = vsel %vm3843_vm15, 0, %v3848_v62  ;;  %v4126_v40 = vmul.f32 0.4, %v4557_v28  ;;  %v2273_v58 = vrot.slane %v2272_v52, 2  ;;  %vm4129_vm15 = vcmp.eq.f32.partialorder %v7329_v63, 0 }
 0x3f8   : > { %v4559_v47 = vpop.eup %4558  ;;  %v3854_v38 = vsel %vm7402_vm0, 2139095040, %v3849_v56  ;;  %v2260_v22 = vrot.slane %v2259_v50, 1  ;;  %vm4133_vm7 = vcmp.eq.f32.partialorder %v4124_v55, 2139095040  ;;  %vm4141_vm0 = vcmp.ne.f32.partialorder %v7329_v63, %v7329_v63  ;;  %v2251_v28 = vld [vmem:[#allocation4 + $0x1] ss:$2 sm:$0x3] }
 0x3f9   : > { %v3858_v44 = vsel %vm3855_vm12, 2143289344, %v3854_v38  ;;  %v4108_v17 = vsel %vm4102_vm4, 2143289344, %v4559_v47  ;;  %4562 = vpow2.f32 %v4126_v40  ;;  %v2274_v3 = vadd.f32 %v2273_v58, %v2272_v52 }
 0x3fa   : > { %v4109_v13 = vsel %vm4103_vm11, 0, %v4108_v17  ;;  %v3859_v54 = vsel %vm3844_vm13, 1065353216, %v3858_v44  ;;  %v2261_v48 = vadd.f32 %v2260_v22, %v2259_v50  ;;  %vm3870_vm13 = vcmp.eq.f32.partialorder %v7319_v46, 1065353216 }
 0x3fb   : > { %v4114_v16 = vsel %vm7420_vm3, 2139095040, %v4109_v13  ;;  %v2275_v5 = vrot.slane %v2274_v3, 1  ;;  %v2197_v41 = vmul.f32 %v7378_v31, %v7331_v14  ;;  %vm4130_vm12 = vcmp.eq.f32.partialorder %v7329_v63, 1065353216 }
 0x3fc   : > { %v4118_v34 = vsel %vm4115_vm5, 2143289344, %v4114_v16  ;;  %v2192_v62 = vmul.f32 %v2182_v24, %v7364_v27  ;;  %v2194_v39 = vmul.f32 %v2184_v33, %v7369_v21  ;;  %vm7469_vm1 = vcmp.lt.s32.totalorder %v2232_v43, 160 }
 0x3fd   : > { %v4119_v2 = vsel %vm4104_vm8, 1065353216, %v4118_v34  ;;  %v2276_v45 = vadd.f32 %v2275_v5, %v2274_v3  ;;  %v2203_v31 = vadd.f32 %v7309_v51, %v2197_v41  ;;  %v2196_v27 = vmul.f32 %v2186_v32, %v7372_v11  ;;  %v2188_v17 = vld [vmem:[#allocation3 + $0x38] sm:$0xff] }
 0x3fe   : > { %v2128_v7 = vadd.f32 %v4119_v2, %v3859_v54  ;;  %vm7678_vm4 = vcmask 261120   ;;  %v2198_v13 = vmul.f32 %v2188_v17, %v7381_v12 }
 0x3ff   : > { %v4561_v35 = vpop.eup %4560  ;;  %v2279_v57 = vcombine.low %v2261_v48, %v2276_v45  ;;  %v2211_v21 = vsel %vm7678_vm4, %v2192_v62, 0.0  ;;  %vm7679_vm11 = vmmov %vm7678_vm4  ;;  %v2180_v48 = vld [vmem:[#allocation4] ss:$2 sm:$0x3] }
 0x400   : > { %v2138_v19 = vmul.f32 0.64, %v2128_v7  ;;  %v3874_v42 = vsel %vm3868_vm10, 2143289344, %v4561_v35  ;;  %v2212_v44 = vsel %vm7679_vm11, %v2194_v39, 0.0  ;;  %vm7680_vm8 = vmmov %vm7678_vm4 }
 0x401   : > { %v3875_v10 = vsel %vm3869_vm2, 0, %v3874_v42  ;;  %v2286_v55 = vrot.slane %v2279_v57, %v7449_v30  ;;  %v2213_v37 = vadd.f32 %v2212_v44, %v2211_v21  ;;  %vm7681_vm3 = vmmov %vm7678_vm4  ;;  %vm2313_vm2 = vcmask (!%p2543_p13), 1041408  }
 0x402   : > { %v2158_v60 = vadd.f32 %v2148_v15, %v2138_v19  ;;  %v3880_v59 = vsel %vm7441_vm14, 2139095040, %v3875_v10  ;;  %v2214_v61 = vsel %vm7681_vm3, %v2196_v27, 0.0  ;;  %vm7682_vm5 = vmmov %vm7681_vm3  ;;  %vm2315_vm14 = vcmask (!%p2543_p13), 254976  }
 0x403   : > { %v4563_v9 = vpop.eup %4562  ;;  %v3884_v20 = vsel %vm3881_vm6, 2143289344, %v3880_v59  ;;  %v2293_v47 = vrot.slane %v2286_v55, %v7449_v30  ;;  %v2215_v26 = vadd.f32 %v2214_v61, %v2213_v37  ;;  %v2216_v11 = vsel %vm7682_vm5, %v2198_v13, 0.0  ;;  %vm7683_vm10 = vmmov %vm7681_vm3 }
 0x404   : > { %2168 = vst [vmem:[#allocation3 + $0x40] sm:$0xff] %v2158_v60  ;;  %v4134_v23 = vsel %vm4128_vm9, 2143289344, %v4563_v9  ;;  %v3885_v0 = vsel %vm3870_vm13, 1065353216, %v3884_v20  ;;  %v2199_v14 = vmul.f32 %v7391_v18, %v2158_v60  ;;  %vm2326_vm6 = vcmask (!%p2543_p13), 0  }
 0x405   : > { %v4135_v46 = vsel %vm4129_vm15, 0, %v4134_v23  ;;  %v2295_v40 = vadd.f32 %v2293_v47, %v2251_v28  ;;  %v2217_v43 = vadd.f32 %v2216_v11, %v2215_v26 }
 0x406   : > { %v4140_v6 = vsel %vm4133_vm7, 2139095040, %v4135_v46  ;;  %v2204_v18 = vadd.f32 %v2203_v31, %v2199_v14 }
 0x407   : > { %v4144_v36 = vsel %vm4141_vm0, 2143289344, %v4140_v6  ;;  %2296 = vst.msk [vmem:[#allocation4 + $0x1] ss:$2 sm:$0x3] %vm7469_vm1, %v2295_v40 }
 0x408   : > { %v4145_v56 = vsel %vm4130_vm12, 1065353216, %v4144_v36  ;;  %v2205_v4 = vrot.slane %v2204_v18, 4 }
 0x409   : > { %v2129_v63 = vadd.f32 %v4145_v56, %v3885_v0 }
 0x40a   : > { %v2206_v54 = vadd.f32 %v2205_v4, %v2204_v18 }
 0x40b   : > { %v2139_v53 = vmul.f32 0.64, %v2129_v63 }
 0x40c   : > { %v2207_v34 = vrot.slane %v2206_v54, 2 }
 0x40d   : > { %v2159_v51 = vadd.f32 %v2149_v49, %v2139_v53 }
 0x40e   : > { %v2208_v58 = vadd.f32 %v2207_v34, %v2206_v54 }
 0x40f   : > { %2169 = vst.msk [vmem:[#allocation3 + $0x48] sm:$0xff] %vm7680_vm8, %v2159_v51 }
 0x410   : > { %v2209_v15 = vrot.slane %v2208_v58, 1 }
 0x412   : > { %v2210_v8 = vadd.f32 %v2209_v15, %v2208_v58 }
 0x416   : > { %v2190_v16 = vld [vmem:[#allocation3 + $0x48] sm:$0xff] }
 0x417   : > { %v2200_v52 = vmul.f32 %v2190_v16, %v7394_v29 }
 0x419   : > { %v2218_v50 = vsel %vm7683_vm10, %v2200_v52, 0.0 }
 0x41a   : > { %v2219_v2 = vadd.f32 %v2218_v50, %v2217_v43 }
 0x41c   : > { %v2220_v7 = vrot.slane %v2219_v2, 4 }
 0x41e   : > { %v2221_v22 = vadd.f32 %v2220_v7, %v2219_v2 }
 0x420   : > { %v2222_v12 = vrot.slane %v2221_v22, 2 }
 0x422   : > { %v2223_v25 = vadd.f32 %v2222_v12, %v2221_v22 }
 0x424   : > { %v2224_v3 = vrot.slane %v2223_v25, 1 }
 0x426   : > { %v2225_v19 = vadd.f32 %v2224_v3, %v2223_v25 }
 0x428   : > { %v2228_v35 = vcombine.low %v2210_v8, %v2225_v19 }
 0x42a   : > { %v2235_v1 = vrot.slane %v2228_v35, %v7449_v30  ;;  %2300 = sbr.rel (%p2543_p13) target bundleno = 1245 (0x4dd), region = 71 }
 0x42c   : > { %v2242_v5 = vrot.slane %v2235_v1, %v7449_v30 }
 0x42e   : > { %v2244_v29 = vadd.f32 %v2242_v5, %v2180_v48 }
 0x430   : > { %2249 = vst.msk [vmem:[#allocation4] ss:$2 sm:$0x3] %vm7469_vm1, %v2244_v29 }
 0x437   : > { %v2544_v60 = vld.sshfl [vmem:[#allocation4] sm:$0x33 pattern:$0x76325410] }
 0x438   : > { %v2310_v42 = vcombine.high %v2544_v60, %v2544_v60  ;;  %v2314_v10 = vsel %vm2313_vm2, %v2544_v60, 0.0 }
 0x43a   : > { %v2316_v45 = vsel %vm2315_vm14, %v2310_v42, 0.0 }
 0x43b   : > { %v2317_v9 = vadd.f32 %v2316_v45, %v2314_v10 }
 0x43d   : > { %2318 = vadd.xlane.f32.xlu0 %v2317_v9 }
 0x4ca   : > { %v2319_v59 = vpop.xlane.xlu0 %2318 }
 0x4cb   : > { %v2320_v20 = vadd.f32 1e-06, %v2319_v59 }
 0x4cd   : > { %v2322_v23 = vrot.slane %v2320_v20, 1 }
 0x4cf   : > { %4564 = vrcp.f32 %v2322_v23 }
 0x4d9   : > { %v4565_v30 = vpop.eup %4564 }
 0x4da   : > { %v2325_v24 = vmul.f32 %v4565_v30, %v2319_v59 }
 0x4dc   : > { %2327 = vst.msk [vmem:[%s435_s18] sm:$0x1] %vm2326_vm6, %v2325_v24 }
 0x4dd PF: > { %s15_s24 = sadd.s32 1, %s4620_s24   ;;  %s7684_s18 = smov %s4600_s19 }
 0x4de   : > { %p12_p0 = scmp.ge.s32.totalorder %s15_s24, 10   ;;  %s7685_s19 = smov %s4705_s6 }
 0x4df   : > { %s7686_s20 = smov %s4612_s22  ;;  %s7687_s21 = smov %s4616_s23 }
 0x4e0   : > { %s7688_s22 = smov %s7691_s25  ;;  %s7689_s23 = smov %s7695_s26 }
 0x4e1   :  { %14 = sbr.rel (!%p12_p0) target bundleno = 6 (0x6), region = 119 }

</bundles_post_ra>
